<compile_context>
chip_gen: v7x
topology: tpu7x:2x2x1
jax: 0.10.0
libtpu: 0.0.40
codegen_flags: <defaults>
</compile_context>

<pallas_src>
import functools

import jax
import jax.numpy as jnp
from jax import lax
from jax.experimental import pallas as pl
from jax.experimental.pallas import tpu as pltpu


def _shift_result_for_dx(z, dx, left_keep, right_keep):
    """Move a per-tap dot result to its output column and apply W zero padding.

    z is (rows*W, C), row-major over (row, col). For tap dx the contribution
    computed at input column c belongs to output column c - (dx - 1); a +/-1 shift
    of the flattened rows plus a boundary-column mask implements both the shift and
    the conv's zero padding at the W edges (and kills the cross-row wrap).
    """
    if dx == 1:
        return z
    zero_row = jnp.zeros((1, z.shape[1]), z.dtype)
    if dx == 0:   # output col x uses input col x-1 -> shift down by one row
        return jnp.concatenate([zero_row, z[:-1, :]], axis=0) * left_keep
    # dx == 2     # output col x uses input col x+1 -> shift up by one row
    return jnp.concatenate([z[1:, :], zero_row], axis=0) * right_keep


def _double_conv_kernel(xb_ref, w1_ref, w2_ref, wr_ref, sb_ref, o_ref, *, nb, h):
    """One (batch, H-band) tile per grid step.

    xb_ref : (1, TB+4, W, Ci)  bf16  raw NHWC input band, 2-row halo above/below
                                     (zero outside the image), Ci = pad128(Cin)
    w1_ref : (3, 3*Ci, Cp)     bf16  conv1 weights, dy folded into K, one slab per dx
    w2_ref : (3, 3*Cp, Cp)     bf16  conv2 weights, dy folded into K, one slab per dx
    wr_ref : (Ci, Cp)          bf16  residual 1x1 weights
    sb_ref : (8, Cp)           f32   rows 0..4 = BN1 scale, BN1 shift, BN2 scale,
                                     BN2 shift, residual bias (padded lanes = 0)
    o_ref  : (1, TB, W, Cp)    f32   output band (NHWC, lane-dense channels)
    """
    TB, W, Cp = o_ref.shape[1], o_ref.shape[2], o_ref.shape[3]
    Ci = xb_ref.shape[3]
    M1 = (TB + 2) * W            # rows of y1 computed (band + 1-row halo each side)
    M = TB * W                   # output rows of this band

    band = pl.program_id(0) % nb

    sb = sb_ref[...]
    s1, b1 = sb[0:1], sb[1:2]
    s2, b2 = sb[2:3], sb[3:4]
    br = sb[4:5]

    xf = xb_ref[0].reshape((TB + 4) * W, Ci)          # bf16

    # ---- residual 1x1 conv on the band's center rows (done first so the raw
    # input's live range ends early; contraction is only Ci, not 9*Ci). ----
    res = jnp.dot(xf[2 * W:2 * W + M, :], wr_ref[...],
                  preferred_element_type=jnp.float32) + br

    # ---- boundary masks (per-axis iota, no div/mod by W) ----
    col = lax.broadcasted_iota(jnp.int32, (TB + 2, W, 1), 1).reshape(M1, 1)
    row = lax.broadcasted_iota(jnp.int32, (TB + 2, W, 1), 0).reshape(M1, 1)
    left_keep1 = (col != 0).astype(jnp.float32)
    right_keep1 = (col != W - 1).astype(jnp.float32)
    left_keep2, right_keep2 = left_keep1[:M, :], right_keep1[:M, :]
    # y1 rows whose global image row falls outside [0, h) are conv2's zero padding
    # (also handles the ragged-H tail and the top/bottom image halos).
    g = band * TB + row - 1
    row_keep = jnp.logical_and(g >= 0, g < h).astype(jnp.float32)

    # ---- conv1: dy folded into the contraction (K = 3*Ci), one MXU dot per dx ----
    xcat = jnp.concatenate(
        [xf[0:M1, :], xf[W:W + M1, :], xf[2 * W:2 * W + M1, :]], axis=-1)
    acc1 = jnp.zeros((M1, Cp), jnp.float32)
    for dx in range(3):
        z = jnp.dot(xcat, w1_ref[dx], preferred_element_type=jnp.float32)
        acc1 = acc1 + _shift_result_for_dx(z, dx, left_keep1, right_keep1)
    # BN1 (folded) + ReLU in f32, then zero the out-of-image halo rows of y1.
    y1 = jnp.maximum(acc1 * s1 + b1, 0.0)
    y1 = (y1 * row_keep).astype(jnp.bfloat16)

    # ---- conv2: same structure over y1 (K = 3*Cp) ----
    ycat = jnp.concatenate(
        [y1[0:M, :], y1[W:W + M, :], y1[2 * W:2 * W + M, :]], axis=-1)
    acc2 = jnp.zeros((M, Cp), jnp.float32)
    for dx in range(3):
        z = jnp.dot(ycat, w2_ref[dx], preferred_element_type=jnp.float32)
        acc2 = acc2 + _shift_result_for_dx(z, dx, left_keep2, right_keep2)
    y2 = jnp.maximum(acc2 * s2 + b2, 0.0)

    o_ref[0] = (y2 + res).reshape(TB, W, Cp).astype(o_ref.dtype)


def _round_up(x, m):
    return ((x + m - 1) // m) * m


def double_conv(x_nchw, w1, s1, b1, w2, s2, b2, wr, br, *, band_rows=8):
    """DoubleConv forward.  x_nchw: (N, Cin, H, W) f32 -> (N, Cout, H, W) f32."""
    N, Cin, H, W = x_nchw.shape
    Cout = w1.shape[-1]

    # Bands of TB output rows; ragged H handled via zero padding + in-kernel mask.
    TB = min(band_rows, H)
    NB = pl.cdiv(H, TB)
    Hp = NB * TB

    Ci = _round_up(Cin, 128)      # lane-dense input channels
    Cp = _round_up(Cout, 128)     # lane-dense output channels

    # Raw NHWC input, bf16, lane-padded channels, zero-padded H (2-row conv halo
    # plus the ragged-H tail). Bands carry a 2-row halo on each side, so the only
    # input duplication into the kernel is (TB+4)/TB (vs 9-10x with im2col).
    x_nhwc = jnp.transpose(x_nchw, (0, 2, 3, 1)).astype(jnp.bfloat16)
    xpad = jnp.pad(x_nhwc, ((0, 0), (2, 2 + Hp - H), (0, 0), (0, Ci - Cin)))
    xb = jnp.stack([xpad[:, i * TB:i * TB + TB + 4] for i in range(NB)], axis=1)
    xb = xb.reshape(N * NB, TB + 4, W, Ci)

    # Weights: channels zero-padded to lane width, dy folded into the contraction
    # dim (one (3*C, Cp) slab per dx), bf16 operands for the MXU (f32 accumulate).
    w1p = jnp.zeros((3, 3, Ci, Cp), jnp.float32).at[:, :, :Cin, :Cout].set(w1)
    w1f = jnp.transpose(w1p, (1, 0, 2, 3)).reshape(3, 3 * Ci, Cp).astype(jnp.bfloat16)
    w2p = jnp.zeros((3, 3, Cp, Cp), jnp.float32).at[:, :, :Cout, :Cout].set(w2)
    w2f = jnp.transpose(w2p, (1, 0, 2, 3)).reshape(3, 3 * Cp, Cp).astype(jnp.bfloat16)
    wrf = jnp.zeros((Ci, Cp), jnp.float32).at[:Cin, :Cout].set(wr).astype(jnp.bfloat16)

    # All per-channel scale/shift vectors packed into one (8, Cp) array (one DMA).
    sb = (jnp.zeros((8, Cp), jnp.float32)
          .at[0, :Cout].set(s1[0]).at[1, :Cout].set(b1[0])
          .at[2, :Cout].set(s2[0]).at[3, :Cout].set(b2[0])
          .at[4, :Cout].set(br[0]))

    kernel = functools.partial(_double_conv_kernel, nb=NB, h=H)

    out = pl.pallas_call(
        kernel,
        out_shape=jax.ShapeDtypeStruct((N * NB, TB, W, Cp), jnp.float32),
        grid_spec=pltpu.PrefetchScalarGridSpec(
            num_scalar_prefetch=0,
            grid=(N * NB,),
            in_specs=[
                pl.BlockSpec((1, TB + 4, W, Ci), lambda i: (i, 0, 0, 0)),
                # Grid-invariant operands (constant index_map -> no per-step copy).
                pl.BlockSpec((3, 3 * Ci, Cp), lambda i: (0, 0, 0)),
                pl.BlockSpec((3, 3 * Cp, Cp), lambda i: (0, 0, 0)),
                pl.BlockSpec((Ci, Cp), lambda i: (0, 0)),
                pl.BlockSpec((8, Cp), lambda i: (0, 0)),
            ],
            out_specs=pl.BlockSpec((1, TB, W, Cp), lambda i: (i, 0, 0, 0)),
        ),
        compiler_params=pltpu.CompilerParams(
            dimension_semantics=("parallel",),
            # 48 MiB fits every generation (v7x physical VMEM is 64 MiB); on
            # v5e/v6e (128 MiB) raise this together with band_rows (16-32).
            vmem_limit_bytes=48 * 1024 * 1024,
        ),
    )(xb, w1f, w2f, wrf, sb)

    out = out.reshape(N, Hp, W, Cp)[:, :H, :, :Cout]          # drop H/lane padding
    return jnp.transpose(out, (0, 3, 1, 2))                   # NHWC -> NCHW


def _reference(x_nchw, w1, s1, b1, w2, s2, b2, wr, br):
    """Pure-JAX f32 reference (NHWC convs), for correctness checking."""
    x = jnp.transpose(x_nchw, (0, 2, 3, 1))
    dn = ('NHWC', 'HWIO', 'NHWC')
    y = lax.conv_general_dilated(x, w1, (1, 1), 'SAME', dimension_numbers=dn,
                                 precision=lax.Precision.HIGHEST)
    y = jnp.maximum(y * s1[0] + b1[0], 0.0)
    y = lax.conv_general_dilated(y, w2, (1, 1), 'SAME', dimension_numbers=dn,
                                 precision=lax.Precision.HIGHEST)
    y = jnp.maximum(y * s2[0] + b2[0], 0.0)
    res = jnp.einsum('nhwi,io->nhwo', x, wr,
                     precision=lax.Precision.HIGHEST) + br[0]
    return jnp.transpose(y + res, (0, 3, 1, 2))


def _fold_bn(gamma, beta, mean, var, eps=1e-5):
    scale = gamma / jnp.sqrt(var + eps)
    shift = beta - mean * scale
    return scale.reshape(1, -1), shift.reshape(1, -1)


if __name__ == "__main__":
    N, Cin, Cout, H, W = 2, 4, 8, 16, 16

    key = jax.random.PRNGKey(0)
    ks = jax.random.split(key, 12)

    x = jax.random.normal(ks[0], (N, Cin, H, W), jnp.float32)

    # Conv weights (HWIO), deterministic small init.
    w1 = jax.random.normal(ks[1], (3, 3, Cin, Cout), jnp.float32) / jnp.sqrt(9.0 * Cin)
    w2 = jax.random.normal(ks[2], (3, 3, Cout, Cout), jnp.float32) / jnp.sqrt(9.0 * Cout)

    # BatchNorm params (eval mode), folded into scale/shift.
    g1 = jax.random.uniform(ks[3], (Cout,), jnp.float32, 0.5, 1.5)
    be1 = 0.1 * jax.random.normal(ks[4], (Cout,), jnp.float32)
    m1 = 0.1 * jax.random.normal(ks[5], (Cout,), jnp.float32)
    v1 = jax.random.uniform(ks[6], (Cout,), jnp.float32, 0.5, 1.5)
    s1, b1 = _fold_bn(g1, be1, m1, v1)

    g2 = jax.random.uniform(ks[7], (Cout,), jnp.float32, 0.5, 1.5)
    be2 = 0.1 * jax.random.normal(ks[8], (Cout,), jnp.float32)
    m2 = 0.1 * jax.random.normal(ks[9], (Cout,), jnp.float32)
    v2 = jax.random.uniform(ks[10], (Cout,), jnp.float32, 0.5, 1.5)
    s2, b2 = _fold_bn(g2, be2, m2, v2)

    # Residual: 1x1 conv (with bias) since Cin != Cout.
    # (If Cin == Cout, pass wr = identity, br = 0 to reproduce nn.Identity.)
    if Cin != Cout:
        wr = jax.random.normal(ks[11], (Cin, Cout), jnp.float32) / jnp.sqrt(float(Cin))
        br = 0.1 * jax.random.normal(jax.random.fold_in(key, 99), (1, Cout), jnp.float32)
    else:
        wr = jnp.eye(Cin, dtype=jnp.float32)
        br = jnp.zeros((1, Cout), jnp.float32)

    out = double_conv(x, w1, s1, b1, w2, s2, b2, wr, br)
    out = jax.block_until_ready(out)

    ref = _reference(x, w1, s1, b1, w2, s2, b2, wr, br)
    assert out.shape == (N, Cout, H, W), out.shape
    # Tolerance reflects the bf16-fed MXU (f32 accumulation, f32 BN/ReLU).
    assert jnp.allclose(out, ref, rtol=2e-2, atol=6e-2), \
        f"max abs err {jnp.max(jnp.abs(out - ref))}"

    print("KERNEL_OK")
</pallas_src>

<mosaic_0001>
module attributes {stable_mosaic.version = 11 : i64} {
  func.func @_double_conv_kernel(%arg0: i32, %arg1: memref<1x12x16x128xbf16, #tpu.memory_space<vmem>>, %arg2: memref<3x384x128xbf16, #tpu.memory_space<vmem>>, %arg3: memref<3x384x128xbf16, #tpu.memory_space<vmem>>, %arg4: memref<128x128xbf16, #tpu.memory_space<vmem>>, %arg5: memref<8x128xf32, #tpu.memory_space<vmem>>, %arg6: memref<1x8x16x128xf32, #tpu.memory_space<vmem>>) attributes {dimension_semantics = [#tpu.dimension_semantics<parallel>], iteration_bounds = array<i64: 4>, scalar_prefetch = 0 : i64, scratch_operands = 0 : i64, tpu.core_type = #tpu.core_type<tc>, window_params = [{transform_indices = @transform_0, window_bounds = array<i64: 1, 12, 16, 128>}, {pipeline_mode = #tpu.pipeline_mode<synchronous>, transform_indices = @transform_1, window_bounds = array<i64: 3, 384, 128>}, {pipeline_mode = #tpu.pipeline_mode<synchronous>, transform_indices = @transform_2, window_bounds = array<i64: 3, 384, 128>}, {pipeline_mode = #tpu.pipeline_mode<synchronous>, transform_indices = @transform_3, window_bounds = array<i64: 128, 128>}, {pipeline_mode = #tpu.pipeline_mode<synchronous>, transform_indices = @transform_4, window_bounds = array<i64: 8, 128>}, {transform_indices = @transform_5, window_bounds = array<i64: 1, 8, 16, 128>}]} {
    %c2_i32 = arith.constant 2 : i32
    %c0_i32 = arith.constant 0 : i32
    %0 = arith.cmpi eq, %c2_i32, %c0_i32 : i32
    %c1_i32 = arith.constant 1 : i32
    %1 = arith.select %0, %c1_i32, %c2_i32 : i32
    %2 = arith.remsi %arg0, %1 : i32
    %c0_i32_0 = arith.constant 0 : i32
    %3 = arith.cmpi ne, %2, %c0_i32_0 : i32
    %c0_i32_1 = arith.constant 0 : i32
    %4 = arith.cmpi slt, %2, %c0_i32_1 : i32
    %c0_i32_2 = arith.constant 0 : i32
    %5 = arith.cmpi slt, %1, %c0_i32_2 : i32
    %6 = arith.xori %4, %5 : i1
    %7 = arith.andi %6, %3 : i1
    %8 = arith.addi %2, %1 : i32
    %9 = arith.select %7, %8, %2 : i32
    %c0 = arith.constant 0 : index
    %c0_3 = arith.constant 0 : index
    %10 = vector.load %arg5[%c0, %c0_3] : memref<8x128xf32, #tpu.memory_space<vmem>>, vector<8x128xf32>
    %11 = vector.extract_strided_slice %10 {offsets = [0, 0], sizes = [1, 128], strides = [1, 1]} : vector<8x128xf32> to vector<1x128xf32>
    %12 = vector.extract_strided_slice %10 {offsets = [1, 0], sizes = [1, 128], strides = [1, 1]} : vector<8x128xf32> to vector<1x128xf32>
    %13 = vector.extract_strided_slice %10 {offsets = [2, 0], sizes = [1, 128], strides = [1, 1]} : vector<8x128xf32> to vector<1x128xf32>
    %14 = vector.extract_strided_slice %10 {offsets = [3, 0], sizes = [1, 128], strides = [1, 1]} : vector<8x128xf32> to vector<1x128xf32>
    %15 = vector.extract_strided_slice %10 {offsets = [4, 0], sizes = [1, 128], strides = [1, 1]} : vector<8x128xf32> to vector<1x128xf32>
    %c0_4 = arith.constant 0 : index
    %c0_5 = arith.constant 0 : index
    %c0_6 = arith.constant 0 : index
    %c0_7 = arith.constant 0 : index
    %16 = vector.load %arg1[%c0_4, %c0_5, %c0_6, %c0_7] : memref<1x12x16x128xbf16, #tpu.memory_space<vmem>>, vector<1x12x16x128xbf16>
    %17 = vector.shape_cast %16 : vector<1x12x16x128xbf16> to vector<12x16x128xbf16>
    %18 = vector.shape_cast %17 : vector<12x16x128xbf16> to vector<192x128xbf16>
    %19 = vector.extract_strided_slice %18 {offsets = [32, 0], sizes = [128, 128], strides = [1, 1]} : vector<192x128xbf16> to vector<128x128xbf16>
    %c0_8 = arith.constant 0 : index
    %c0_9 = arith.constant 0 : index
    %20 = vector.load %arg4[%c0_8, %c0_9] : memref<128x128xbf16, #tpu.memory_space<vmem>>, vector<128x128xbf16>
    %cst = arith.constant dense<0.000000e+00> : vector<128x128xf32>
    %21 = tpu.matmul %19, %20, %cst {dimension_numbers = #tpu.dot_dimension_numbers<[1], [0], [0], [1], [0, 0, 1, 1], [], []>} : vector<128x128xbf16>, vector<128x128xbf16>, vector<128x128xf32> -> vector<128x128xf32>
    %22 = vector.broadcast %15 : vector<1x128xf32> to vector<128x128xf32>
    %23 = arith.addf %21, %22 : vector<128x128xf32>
    %24 = tpu.iota {dimensions = array<i32: 1>} : vector<10x16x1xi32>
    %25 = vector.shape_cast %24 : vector<10x16x1xi32> to vector<160x1xi32>
    %26 = tpu.iota {dimensions = array<i32: 0>} : vector<10x16x1xi32>
    %27 = vector.shape_cast %26 : vector<10x16x1xi32> to vector<160x1xi32>
    %c0_i32_10 = arith.constant 0 : i32
    %28 = vector.broadcast %c0_i32_10 : i32 to vector<160x1xi32>
    %29 = arith.cmpi ne, %25, %28 : vector<160x1xi32>
    %30 = arith.extui %29 : vector<160x1xi1> to vector<160x1xi32>
    %31 = arith.sitofp %30 : vector<160x1xi32> to vector<160x1xf32>
    %c15_i32 = arith.constant 15 : i32
    %32 = vector.broadcast %c15_i32 : i32 to vector<160x1xi32>
    %33 = arith.cmpi ne, %25, %32 : vector<160x1xi32>
    %34 = arith.extui %33 : vector<160x1xi1> to vector<160x1xi32>
    %35 = arith.sitofp %34 : vector<160x1xi32> to vector<160x1xf32>
    %36 = vector.extract_strided_slice %31 {offsets = [0, 0], sizes = [128, 1], strides = [1, 1]} : vector<160x1xf32> to vector<128x1xf32>
    %37 = vector.extract_strided_slice %35 {offsets = [0, 0], sizes = [128, 1], strides = [1, 1]} : vector<160x1xf32> to vector<128x1xf32>
    %c8_i32 = arith.constant 8 : i32
    %38 = arith.muli %9, %c8_i32 : i32
    %39 = vector.broadcast %38 : i32 to vector<160x1xi32>
    %40 = arith.addi %39, %27 : vector<160x1xi32>
    %c1_i32_11 = arith.constant 1 : i32
    %41 = vector.broadcast %c1_i32_11 : i32 to vector<160x1xi32>
    %42 = arith.subi %40, %41 : vector<160x1xi32>
    %c0_i32_12 = arith.constant 0 : i32
    %43 = vector.broadcast %c0_i32_12 : i32 to vector<160x1xi32>
    %44 = arith.cmpi sge, %42, %43 : vector<160x1xi32>
    %c16_i32 = arith.constant 16 : i32
    %45 = vector.broadcast %c16_i32 : i32 to vector<160x1xi32>
    %46 = arith.cmpi slt, %42, %45 : vector<160x1xi32>
    %47 = arith.andi %44, %46 : vector<160x1xi1>
    %48 = arith.extui %47 : vector<160x1xi1> to vector<160x1xi32>
    %49 = arith.sitofp %48 : vector<160x1xi32> to vector<160x1xf32>
    %50 = vector.extract_strided_slice %18 {offsets = [0, 0], sizes = [160, 128], strides = [1, 1]} : vector<192x128xbf16> to vector<160x128xbf16>
    %51 = vector.extract_strided_slice %18 {offsets = [16, 0], sizes = [160, 128], strides = [1, 1]} : vector<192x128xbf16> to vector<160x128xbf16>
    %52 = vector.extract_strided_slice %18 {offsets = [32, 0], sizes = [160, 128], strides = [1, 1]} : vector<192x128xbf16> to vector<160x128xbf16>
    %53 = tpu.concatenate %50, %51, %52 in 1 : vector<160x128xbf16>, vector<160x128xbf16>, vector<160x128xbf16> -> vector<160x384xbf16>
    %cst_13 = arith.constant 0.000000e+00 : f32
    %54 = vector.broadcast %cst_13 : f32 to vector<160x128xf32>
    %c0_14 = arith.constant 0 : index
    %c0_15 = arith.constant 0 : index
    %c0_16 = arith.constant 0 : index
    %55 = vector.load %arg2[%c0_14, %c0_15, %c0_16] : memref<3x384x128xbf16, #tpu.memory_space<vmem>>, vector<1x384x128xbf16>
    %56 = vector.shape_cast %55 : vector<1x384x128xbf16> to vector<384x128xbf16>
    %cst_17 = arith.constant dense<0.000000e+00> : vector<160x128xf32>
    %57 = tpu.matmul %53, %56, %cst_17 {dimension_numbers = #tpu.dot_dimension_numbers<[1], [0], [0], [1], [0, 0, 1, 1], [], []>} : vector<160x384xbf16>, vector<384x128xbf16>, vector<160x128xf32> -> vector<160x128xf32>
    %cst_18 = arith.constant 0.000000e+00 : f32
    %58 = vector.broadcast %cst_18 : f32 to vector<1x128xf32>
    %59 = vector.extract_strided_slice %57 {offsets = [0, 0], sizes = [159, 128], strides = [1, 1]} : vector<160x128xf32> to vector<159x128xf32>
    %60 = tpu.concatenate %58, %59 in 0 : vector<1x128xf32>, vector<159x128xf32> -> vector<160x128xf32>
    %61 = vector.broadcast %31 : vector<160x1xf32> to vector<160x128xf32>
    %62 = arith.mulf %60, %61 : vector<160x128xf32>
    %63 = arith.addf %54, %62 : vector<160x128xf32>
    %c1 = arith.constant 1 : index
    %c0_19 = arith.constant 0 : index
    %c0_20 = arith.constant 0 : index
    %64 = vector.load %arg2[%c1, %c0_19, %c0_20] : memref<3x384x128xbf16, #tpu.memory_space<vmem>>, vector<1x384x128xbf16>
    %65 = vector.shape_cast %64 : vector<1x384x128xbf16> to vector<384x128xbf16>
    %cst_21 = arith.constant dense<0.000000e+00> : vector<160x128xf32>
    %66 = tpu.matmul %53, %65, %cst_21 {dimension_numbers = #tpu.dot_dimension_numbers<[1], [0], [0], [1], [0, 0, 1, 1], [], []>} : vector<160x384xbf16>, vector<384x128xbf16>, vector<160x128xf32> -> vector<160x128xf32>
    %67 = arith.addf %63, %66 : vector<160x128xf32>
    %c2 = arith.constant 2 : index
    %c0_22 = arith.constant 0 : index
    %c0_23 = arith.constant 0 : index
    %68 = vector.load %arg2[%c2, %c0_22, %c0_23] : memref<3x384x128xbf16, #tpu.memory_space<vmem>>, vector<1x384x128xbf16>
    %69 = vector.shape_cast %68 : vector<1x384x128xbf16> to vector<384x128xbf16>
    %cst_24 = arith.constant dense<0.000000e+00> : vector<160x128xf32>
    %70 = tpu.matmul %53, %69, %cst_24 {dimension_numbers = #tpu.dot_dimension_numbers<[1], [0], [0], [1], [0, 0, 1, 1], [], []>} : vector<160x384xbf16>, vector<384x128xbf16>, vector<160x128xf32> -> vector<160x128xf32>
    %cst_25 = arith.constant 0.000000e+00 : f32
    %71 = vector.broadcast %cst_25 : f32 to vector<1x128xf32>
    %72 = vector.extract_strided_slice %70 {offsets = [1, 0], sizes = [159, 128], strides = [1, 1]} : vector<160x128xf32> to vector<159x128xf32>
    %73 = tpu.concatenate %72, %71 in 0 : vector<159x128xf32>, vector<1x128xf32> -> vector<160x128xf32>
    %74 = vector.broadcast %35 : vector<160x1xf32> to vector<160x128xf32>
    %75 = arith.mulf %73, %74 : vector<160x128xf32>
    %76 = arith.addf %67, %75 : vector<160x128xf32>
    %77 = vector.broadcast %11 : vector<1x128xf32> to vector<160x128xf32>
    %78 = arith.mulf %76, %77 : vector<160x128xf32>
    %79 = vector.broadcast %12 : vector<1x128xf32> to vector<160x128xf32>
    %80 = arith.addf %78, %79 : vector<160x128xf32>
    %cst_26 = arith.constant 0.000000e+00 : f32
    %81 = vector.broadcast %cst_26 : f32 to vector<160x128xf32>
    %82 = arith.maximumf %80, %81 : vector<160x128xf32>
    %83 = vector.broadcast %49 : vector<160x1xf32> to vector<160x128xf32>
    %84 = arith.mulf %82, %83 : vector<160x128xf32>
    %85 = arith.truncf %84 : vector<160x128xf32> to vector<160x128xbf16>
    %86 = vector.extract_strided_slice %85 {offsets = [0, 0], sizes = [128, 128], strides = [1, 1]} : vector<160x128xbf16> to vector<128x128xbf16>
    %87 = vector.extract_strided_slice %85 {offsets = [16, 0], sizes = [128, 128], strides = [1, 1]} : vector<160x128xbf16> to vector<128x128xbf16>
    %88 = vector.extract_strided_slice %85 {offsets = [32, 0], sizes = [128, 128], strides = [1, 1]} : vector<160x128xbf16> to vector<128x128xbf16>
    %89 = tpu.concatenate %86, %87, %88 in 1 : vector<128x128xbf16>, vector<128x128xbf16>, vector<128x128xbf16> -> vector<128x384xbf16>
    %cst_27 = arith.constant 0.000000e+00 : f32
    %90 = vector.broadcast %cst_27 : f32 to vector<128x128xf32>
    %c0_28 = arith.constant 0 : index
    %c0_29 = arith.constant 0 : index
    %c0_30 = arith.constant 0 : index
    %91 = vector.load %arg3[%c0_28, %c0_29, %c0_30] : memref<3x384x128xbf16, #tpu.memory_space<vmem>>, vector<1x384x128xbf16>
    %92 = vector.shape_cast %91 : vector<1x384x128xbf16> to vector<384x128xbf16>
    %cst_31 = arith.constant dense<0.000000e+00> : vector<128x128xf32>
    %93 = tpu.matmul %89, %92, %cst_31 {dimension_numbers = #tpu.dot_dimension_numbers<[1], [0], [0], [1], [0, 0, 1, 1], [], []>} : vector<128x384xbf16>, vector<384x128xbf16>, vector<128x128xf32> -> vector<128x128xf32>
    %cst_32 = arith.constant 0.000000e+00 : f32
    %94 = vector.broadcast %cst_32 : f32 to vector<1x128xf32>
    %95 = vector.extract_strided_slice %93 {offsets = [0, 0], sizes = [127, 128], strides = [1, 1]} : vector<128x128xf32> to vector<127x128xf32>
    %96 = tpu.concatenate %94, %95 in 0 : vector<1x128xf32>, vector<127x128xf32> -> vector<128x128xf32>
    %97 = vector.broadcast %36 : vector<128x1xf32> to vector<128x128xf32>
    %98 = arith.mulf %96, %97 : vector<128x128xf32>
    %99 = arith.addf %90, %98 : vector<128x128xf32>
    %c1_33 = arith.constant 1 : index
    %c0_34 = arith.constant 0 : index
    %c0_35 = arith.constant 0 : index
    %100 = vector.load %arg3[%c1_33, %c0_34, %c0_35] : memref<3x384x128xbf16, #tpu.memory_space<vmem>>, vector<1x384x128xbf16>
    %101 = vector.shape_cast %100 : vector<1x384x128xbf16> to vector<384x128xbf16>
    %cst_36 = arith.constant dense<0.000000e+00> : vector<128x128xf32>
    %102 = tpu.matmul %89, %101, %cst_36 {dimension_numbers = #tpu.dot_dimension_numbers<[1], [0], [0], [1], [0, 0, 1, 1], [], []>} : vector<128x384xbf16>, vector<384x128xbf16>, vector<128x128xf32> -> vector<128x128xf32>
    %103 = arith.addf %99, %102 : vector<128x128xf32>
    %c2_37 = arith.constant 2 : index
    %c0_38 = arith.constant 0 : index
    %c0_39 = arith.constant 0 : index
    %104 = vector.load %arg3[%c2_37, %c0_38, %c0_39] : memref<3x384x128xbf16, #tpu.memory_space<vmem>>, vector<1x384x128xbf16>
    %105 = vector.shape_cast %104 : vector<1x384x128xbf16> to vector<384x128xbf16>
    %cst_40 = arith.constant dense<0.000000e+00> : vector<128x128xf32>
    %106 = tpu.matmul %89, %105, %cst_40 {dimension_numbers = #tpu.dot_dimension_numbers<[1], [0], [0], [1], [0, 0, 1, 1], [], []>} : vector<128x384xbf16>, vector<384x128xbf16>, vector<128x128xf32> -> vector<128x128xf32>
    %cst_41 = arith.constant 0.000000e+00 : f32
    %107 = vector.broadcast %cst_41 : f32 to vector<1x128xf32>
    %108 = vector.extract_strided_slice %106 {offsets = [1, 0], sizes = [127, 128], strides = [1, 1]} : vector<128x128xf32> to vector<127x128xf32>
    %109 = tpu.concatenate %108, %107 in 0 : vector<127x128xf32>, vector<1x128xf32> -> vector<128x128xf32>
    %110 = vector.broadcast %37 : vector<128x1xf32> to vector<128x128xf32>
    %111 = arith.mulf %109, %110 : vector<128x128xf32>
    %112 = arith.addf %103, %111 : vector<128x128xf32>
    %113 = vector.broadcast %13 : vector<1x128xf32> to vector<128x128xf32>
    %114 = arith.mulf %112, %113 : vector<128x128xf32>
    %115 = vector.broadcast %14 : vector<1x128xf32> to vector<128x128xf32>
    %116 = arith.addf %114, %115 : vector<128x128xf32>
    %cst_42 = arith.constant 0.000000e+00 : f32
    %117 = vector.broadcast %cst_42 : f32 to vector<128x128xf32>
    %118 = arith.maximumf %116, %117 : vector<128x128xf32>
    %119 = arith.addf %118, %23 : vector<128x128xf32>
    %120 = vector.shape_cast %119 : vector<128x128xf32> to vector<8x16x128xf32>
    %c0_43 = arith.constant 0 : index
    %c0_44 = arith.constant 0 : index
    %c0_45 = arith.constant 0 : index
    %c0_46 = arith.constant 0 : index
    %121 = vector.load %arg6[%c0_43, %c0_44, %c0_45, %c0_46] : memref<1x8x16x128xf32, #tpu.memory_space<vmem>>, vector<1x8x16x128xf32>
    %122 = vector.shape_cast %121 : vector<1x8x16x128xf32> to vector<8x16x128xf32>
    %123 = vector.shape_cast %120 : vector<8x16x128xf32> to vector<1x8x16x128xf32>
    tpu.vector_store %arg6[%c0_43, %c0_44, %c0_45, %c0_46], %123 {strides = array<i32>} : memref<1x8x16x128xf32, #tpu.memory_space<vmem>>, vector<1x8x16x128xf32>,
    return
  }
  func.func @transform_0(%arg0: i32) -> (i32, i32, i32, i32) {
    %c0_i32 = arith.constant 0 : i32
    %c0_i32_0 = arith.constant 0 : i32
    %c0_i32_1 = arith.constant 0 : i32
    %c0_i32_2 = arith.constant 0 : i32
    return %arg0, %c0_i32, %c0_i32_0, %c0_i32_1 : i32, i32, i32, i32
  }
  func.func @transform_1(%arg0: i32) -> (i32, i32, i32) {
    %c0_i32 = arith.constant 0 : i32
    %c0_i32_0 = arith.constant 0 : i32
    %c0_i32_1 = arith.constant 0 : i32
    %c0_i32_2 = arith.constant 0 : i32
    return %c0_i32, %c0_i32_0, %c0_i32_1 : i32, i32, i32
  }
  func.func @transform_2(%arg0: i32) -> (i32, i32, i32) {
    %c0_i32 = arith.constant 0 : i32
    %c0_i32_0 = arith.constant 0 : i32
    %c0_i32_1 = arith.constant 0 : i32
    %c0_i32_2 = arith.constant 0 : i32
    return %c0_i32, %c0_i32_0, %c0_i32_1 : i32, i32, i32
  }
  func.func @transform_3(%arg0: i32) -> (i32, i32) {
    %c0_i32 = arith.constant 0 : i32
    %c0_i32_0 = arith.constant 0 : i32
    %c0_i32_1 = arith.constant 0 : i32
    return %c0_i32, %c0_i32_0 : i32, i32
  }
  func.func @transform_4(%arg0: i32) -> (i32, i32) {
    %c0_i32 = arith.constant 0 : i32
    %c0_i32_0 = arith.constant 0 : i32
    %c0_i32_1 = arith.constant 0 : i32
    return %c0_i32, %c0_i32_0 : i32, i32
  }
  func.func @transform_5(%arg0: i32) -> (i32, i32, i32, i32) {
    %c0_i32 = arith.constant 0 : i32
    %c0_i32_0 = arith.constant 0 : i32
    %c0_i32_1 = arith.constant 0 : i32
    %c0_i32_2 = arith.constant 0 : i32
    return %arg0, %c0_i32, %c0_i32_0, %c0_i32_1 : i32, i32, i32, i32
  }
}

</mosaic_0001>

<bundles_post_ra>
// kernel: tpu_custom_call.1
= control target key start
LH: loop header
LB: loop body
LE: loop exit
PB: predicated region body
PF: predicated region fallthrough
CT: control target
= control target key end

     0   :  { %10 = vsyncpa [#allocation3], 0  ;;  %s6534_s0 = inlined_call_operand.hbm [shape: bf16[4,12,16,128], index: 0, kind: input, shape index: {}]   ;;  %s6535_s1 = inlined_call_operand.hbm [shape: bf16[3,384,128], index: 1, kind: input, shape index: {}]   ;;  %s6536_s2 = inlined_call_operand.hbm [shape: bf16[3,384,128], index: 2, kind: input, shape index: {}]   ;;  %s6537_s3 = inlined_call_operand.hbm [shape: bf16[128,128], index: 3, kind: input, shape index: {}]   ;;  %s6538_s4 = inlined_call_operand.vmem [shape: f32[8,128], index: 4, kind: input, shape index: {}]   ;;  %s6539_s5 = inlined_call_operand.hbm [shape: f32[4,8,16,128], index: 5, kind: output, shape index: {}]  }
   0x1   :  { %12 = vsyncpa [#allocation3 + $0x1], 0 }
   0x2   :  { %13 = vsyncpa [#allocation6], 0 }
   0x3   :  { %14 = vsyncpa [#allocation9], 0 }
   0x4   :  { %15 = vsyncpa [#allocation4], 0 }
   0x5   :  { %17 = vsyncpa [#allocation4 + $0x1], 0  ;;  %s5295_s18 = smov 0   ;;  %s5297_s19 = smov 0  }
   0x6   :  { %s5299_s20 = smov 0   ;;  %s5301_s21 = smov 0  }
   0x7 LB: > { %s5316_s22 = sadd.s32 4294967295, %s5253_s21   ;;  %s3834_s23 = sadd.s32 4294967294, %s5253_s21   ;;  %s5253_s21 = sphi %s5301_s21, %s6602_s21   ;;  %s5249_s20 = sphi %s5299_s20, %s6601_s20   ;;  %s5245_s19 = sphi %s5297_s19, %s6600_s19   ;;  %s5241_s18 = sphi %s5295_s18, %s6599_s18  }
   0x8   : > { %p43_p0 = scmp.ne.s32.totalorder %s5245_s19, %s5241_s18  ;;  %p6540_p1 = scmp.eq.s32.totalorder %s5316_s22, 0 }
   0x9   : > { %p157_p3 = scmp.eq.s32.totalorder %s3834_s23, 3  ;;  %p3835_p5 = scmp.ge.s32.totalorder %s5253_s21, 1 }
   0xa   : > { %p5325_p4 = por %p6540_p1, %p43_p0  ;;  %p164_p7 = scmp.lt.s32.totalorder %s5253_s21, 5 }
   0xb   : > { %p5330_p6 = por %p157_p3, %p43_p0  ;;  %s5255_s27 = smov [#allocation5]  }
   0xc   : > { %s6546_s24 = scalar_select %p5325_p4, 1, 0 }
   0xd   : > { %s6547_s25 = scalar_select %p5330_p6, 1, 0 }
   0xe   : > { %p5335_p8 = pnand %p3835_p5, %p164_p7  ;;  %s176_s28 = sshll.u32 %s5255_s27, 4  ;;  %s5339_s28 = int_to_ptr.vmem [resolvable:$true] %s176_s28 }
   0xf   : > { %s5256_s30 = smov [#allocation7]   ;;  %s5257_s7 = smov [#allocation8]  }
  0x10   : > { %s6548_s26 = scalar_select %p5335_p8, 1, 0 }
  0x11   : > { %p4834_p9 = pneg %p5335_p8  ;;  %s189_s6 = sshll.u32 %s5256_s30, 4  ;;  %s5349_s6 = int_to_ptr.vmem [resolvable:$true] %s189_s6 }
  0x12   : > { %s5351_s8 = sshll.u32 %s5257_s7, 4  ;;  %s5065_s11 = scalar_lea.hbm %s6535_s1, 9216  ;;  %s203_s8 = int_to_ptr.vmem [resolvable:$true] %s5351_s8 }
  0x13   : > { %p5345_p10 = pnand %p4834_p9, %p6540_p1  ;;  %p5066_p11 = scmp.ne.s32.totalorder %s6535_s1, %s5065_s11 }
  0x14   : > { %p5072_p3 = scmp.lt.u32.totalorder %s5065_s11, %s6535_s1 }
  0x15   : > { %p5361_p12 = pneg %p5345_p10 }
  0x17   : > { %p5068_p13 = pnand %p5361_p12, %p5066_p11 }
  0x19   : > { %p5069_p0 = pneg %p5068_p13 }
  0x1b   : > { %p5074_p5 = pnand %p5072_p3, %p5069_p0 }
  0x1d   : > { %5077 = shalt.err (!%p5074_p5)
}
  0x1e   : > { %s5078_s17 = scalar_lea.vmem %s5339_s28, 9216  ;;  %p5086_p2 = scmp.lt.s32.totalorder %s5339_s28, %s5339_s28 }
  0x1f   : > { %p5079_p7 = scmp.ne.s32.totalorder %s5339_s28, %s5078_s17  ;;  %p5087_p6 = scmp.lt.s32.totalorder %s5078_s17, %s5078_s17 }
  0x21   : > { %p5081_p9 = pnand %p5079_p7, %p5361_p12  ;;  %p5088_p11 = por %p5087_p6, %p5086_p2 }
  0x23   : > { %p5082_p1 = pneg %p5081_p9 }
  0x25   : > { %p5089_p13 = pnand %p5088_p11, %p5082_p1 }
  0x27   : > { %5092 = shalt.err (!%p5089_p13)
}
  0x28   : > { %s6543_s23 = smov 64   ;;  %s5259_s27 = smov 4  }
  0x29   : > { %4837 = dma.hbm_to_vmem [thread:$0]  (!%p5345_p10), %s6535_s1, 9216, %s5339_s28, [#allocation6], %s6543_s23, %s6543_s23, %s5259_s27  }
  0x2a   : > { %s5093_s11 = scalar_lea.hbm %s6536_s2, 9216 }
  0x2b   : > { %p5094_p1 = scmp.ne.s32.totalorder %s6536_s2, %s5093_s11  ;;  %p5100_p0 = scmp.lt.u32.totalorder %s5093_s11, %s6536_s2 }
  0x2d   : > { %p5096_p2 = pnand %p5094_p1, %p5361_p12 }
  0x2f   : > { %p5097_p6 = pneg %p5096_p2 }
  0x31   : > { %p5102_p3 = pnand %p5100_p0, %p5097_p6 }
  0x33   : > { %5105 = shalt.err (!%p5102_p3)
}
  0x34   : > { %s5106_s28 = scalar_lea.vmem %s5349_s6, 9216  ;;  %p5114_p11 = scmp.lt.s32.totalorder %s5349_s6, %s5349_s6 }
  0x35   : > { %p5107_p5 = scmp.ne.s32.totalorder %s5349_s6, %s5106_s28  ;;  %p5115_p13 = scmp.lt.s32.totalorder %s5106_s28, %s5106_s28 }
  0x37   : > { %p5109_p7 = pnand %p5107_p5, %p5361_p12  ;;  %p5116_p1 = por %p5115_p13, %p5114_p11 }
  0x39   : > { %p5110_p9 = pneg %p5109_p7 }
  0x3b   : > { %p5117_p2 = pnand %p5116_p1, %p5110_p9 }
  0x3d   : > { %5120 = shalt.err (!%p5117_p2)
}
  0x3e   : > { %4840 = dma.hbm_to_vmem [thread:$0]  (!%p5345_p10), %s6536_s2, 9216, %s5349_s6, [#allocation6], %s6543_s23, %s6543_s23, %s5259_s27  }
  0x3f   : > { %s5121_s10 = scalar_lea.hbm %s6537_s3, 1024 }
  0x40   : > { %p5122_p6 = scmp.ne.s32.totalorder %s6537_s3, %s5121_s10  ;;  %p5128_p5 = scmp.lt.u32.totalorder %s5121_s10, %s6537_s3 }
  0x42   : > { %p5124_p0 = pnand %p5122_p6, %p5361_p12 }
  0x44   : > { %p5125_p3 = pneg %p5124_p0 }
  0x46   : > { %p5130_p7 = pnand %p5128_p5, %p5125_p3 }
  0x48   : > { %5133 = shalt.err (!%p5130_p7)
}
  0x49   : > { %s5134_s16 = scalar_lea.vmem %s203_s8, 1024  ;;  %p5142_p1 = scmp.lt.s32.totalorder %s203_s8, %s203_s8 }
  0x4a   : > { %p5135_p9 = scmp.ne.s32.totalorder %s203_s8, %s5134_s16  ;;  %p5143_p2 = scmp.lt.s32.totalorder %s5134_s16, %s5134_s16 }
  0x4c   : > { %p5137_p11 = pnand %p5135_p9, %p5361_p12  ;;  %p5144_p4 = por %p5143_p2, %p5142_p1 }
  0x4e   : > { %p5138_p13 = pneg %p5137_p11 }
  0x50   : > { %p5145_p8 = pnand %p5144_p4, %p5138_p13 }
  0x52   : > { %5148 = shalt.err (!%p5145_p8)
}
  0x53   : > { %4843 = dma.hbm_to_vmem [thread:$0]  (!%p5345_p10), %s6537_s3, 1024, %s203_s8, [#allocation9], %s6543_s23, %s6543_s23, %s5259_s27  }
  0x54   : > { %s5434_s14 = sadd.s32 1, %s5253_s21   ;;  %s30_s17 = sadd.s32 1, %s5249_s20 }
  0x55   : > { %s27_s29 = ssub.s32 %s5253_s21, %s5434_s14  ;;  %p37_p8 = scmp.ne.s32.totalorder %s5249_s20, %s5245_s19 }
  0x56   : > { %p28_p4 = scmp.eq.s32.totalorder %s27_s29, 0  ;;  %p38_p12 = scmp.eq.s32.totalorder %s5253_s21, 0 }
  0x57   : > { %p4855_p6 = scmp.lt.s32.totalorder %s5253_s21, 4  ;;  %p6551_p3 = scmp.eq.s32.totalorder %s5316_s22, 3 }
  0x58   : > { %s5444_s30 = scalar_select %p28_p4, %s5249_s20, %s30_s17  }
  0x59   : > { %p39_p0 = por %p38_p12, %p37_p8  ;;  %p5448_p5 = por %p6551_p3, %p37_p8 }
  0x5a   : > { %s219_s9 = sand.u32 1, %s5249_s20   ;;  %s4816_s10 = smul.u32 1536, %s5253_s21 }
  0x5b   : > { %s4815_s8 = smul.u32 96, %s219_s9  ;;  %p5454_p10 = pnand %p4855_p6, %p39_p0 }
  0x5c   : > { %s5461_s15 = scalar_lea.hbm %s6534_s0, %s4816_s10  ;;  %s5465_s28 = scalar_lea.sflag [#allocation3], %s219_s9 }
  0x5d   : > { %s223_s16 = scalar_lea.vmem [#allocation2], %s4815_s8  ;;  %s5149_s29 = scalar_lea.hbm %s5461_s15, 1536 }
  0x5e   : > { %s230_s6 = sshll.u32 %s223_s16, 4  ;;  %p5150_p7 = scmp.ne.s32.totalorder %s5461_s15, %s5149_s29  ;;  %s5463_s6 = int_to_ptr.vmem [resolvable:$true] %s230_s6 }
  0x5f   : > { %p5151_p9 = pneg %p5454_p10  ;;  %s5154_s12 = scalar_lea.hbm %s6534_s0, 6144 }
  0x60   : > { %p5155_p1 = scmp.lt.u32.totalorder %s5461_s15, %s6534_s0  ;;  %p5156_p2 = scmp.lt.u32.totalorder %s5154_s12, %s5149_s29 }
  0x61   : > { %p5152_p11 = pnand %p5151_p9, %p5150_p7  ;;  %p5158_p8 = scmp.lt.u32.totalorder %s5149_s29, %s5461_s15 }
  0x62   : > { %p5157_p4 = por %p5156_p2, %p5155_p1 }
  0x63   : > { %p5153_p13 = pneg %p5152_p11 }
  0x64   : > { %p5159_p12 = por %p5158_p8, %p5157_p4 }
  0x66   : > { %p5160_p6 = pnand %p5159_p12, %p5153_p13 }
  0x68   : > { %5163 = shalt.err (!%p5160_p6)
}
  0x69   : > { %s5164_s9 = scalar_lea.vmem %s5463_s6, 1536  ;;  %s5260_s8 = smov [#allocation2]  }
  0x6a   : > { %p5165_p0 = scmp.ne.s32.totalorder %s5463_s6, %s5164_s9  ;;  %s5169_s16 = sshll.u32 %s5260_s8, 4  ;;  %s5170_s16 = int_to_ptr.vmem [resolvable:$false] %s5169_s16 }
  0x6b   : > { %s5171_s23 = scalar_lea.vmem %s5170_s16, 3072  ;;  %p5172_p11 = scmp.lt.s32.totalorder %s5463_s6, %s5170_s16 }
  0x6c   : > { %p5167_p3 = pnand %p5165_p0, %p5151_p9  ;;  %p5173_p1 = scmp.lt.s32.totalorder %s5171_s23, %s5164_s9 }
  0x6e   : > { %p5168_p7 = pneg %p5167_p3  ;;  %p5174_p2 = por %p5173_p1, %p5172_p11 }
  0x70   : > { %p5175_p4 = pnand %p5174_p2, %p5168_p7 }
  0x72   : > { %5178 = shalt.err (!%p5175_p4)
}
  0x73   : > { %s6554_s29 = smov 64   ;;  %p6555_p9 = scmp.ne.s32.totalorder %s6548_s26, 0 }
  0x74   : > { %4847 = dma.hbm_to_vmem [thread:$0]  (!%p5454_p10), %s5461_s15, 1536, %s5463_s6, %s5465_s28, %s6554_s29, %s6554_s29, %s5259_s27  }
  0x75   : > { %242 = sbr.rel (%p6555_p9) target bundleno = 969 (0x3c9), region = 40 }
  0x7c   : > { %s5499_s17 = sand.u32 1, %s5245_s19   ;;  %p6556_p13 = scmp.ne.s32.totalorder %s6546_s24, 0 }
  0x7d   : > { %s4817_s10 = smul.u32 96, %s5499_s17  ;;  %s245_s12 = scalar_lea.sflag [#allocation3], %s5499_s17 }
  0x7f   : > { %s5503_s13 = scalar_lea.vmem [#allocation2], %s4817_s10 }
  0x80   : > { %5224 = dma.done.wait (%p6556_p13), %s245_s12, 1536  }
  0x81   : > { %5226 = vsyncadd (%p6556_p13), %s245_s12, 4294965760  ;;  %p6557_p10 = scmp.eq.s32.totalorder %s5316_s22, 0 }
  0x83   : > { %5228 = dma.done.wait (%p6557_p10), [#allocation6], 18432   ;;  %p6558_p8 = pmov %p6557_p10 }
  0x85   : > { %5230 = vsyncadd (%p6558_p8), [#allocation6], 4294948864  ;;  %p6559_p12 = pmov %p6558_p8 }
  0x86   : > { %p6560_p6 = pmov %p6558_p8 }
  0x87   : > { %5232 = dma.done.wait (%p6559_p12), [#allocation9], 1024  }
  0x88   : > { %5234 = vsyncadd (%p6560_p6), [#allocation9], 4294966272  ;;  %v4900_v0 = vld [vmem:[#allocation8] sm:$0xff]   ;;  %v4903_v3 = vld [vmem:[#allocation8 + $0x8] sm:$0xff]   ;;  %vm1084_vm0 = vcmask 1040384   ;;  %s289_s24 = ssub.s32 0, %s5316_s22 }
  0x89   : > { %v4901_v1 = vld [vmem:[#allocation5 + $0x40] sm:$0xff]   ;;  %4579 = vmatprep.subr.bf16.mxu0 %v4900_v0  ;;  %v4904_v4 = vld [vmem:[#allocation5 + $0x48] sm:$0xff]   ;;  %v4906_v6 = vld [vmem:[#allocation8 + $0x10] sm:$0xff]   ;;  %s3846_s26 = smin.u32 %s5316_s22, %s289_s24  ;;  %p288_p0 = scmp.lt.s32.totalorder %s5316_s22, 0  ;;  %vm2063_vm14 = vcmask 1046528  }
  0x8a   : > { %v4902_v2 = vld [vmem:[#allocation5] sm:$0xff]   ;;  %4057 = vmatprep.subr.bf16.mxu1 %v4901_v1  ;;  %4580 = vmatpush3.bf16.msra.mxu0 %v4900_v0  ;;  %v4905_v5 = vld [vmem:[#allocation5 + $0x8] sm:$0xff]   ;;  %v4907_v7 = vld [vmem:[#allocation5 + $0x50] sm:$0xff]   ;;  %s291_s27 = sand.u32 1, %s3846_s26   ;;  %s3845_s23 = sshll.u32 %s5499_s17, 7 }
  0x8b   : > { %4058 = vmatpush3.bf16.msra.mxu1 %v4902_v2  ;;  %4581 = vmatprep.subr.bf16.mxu0 %v4903_v3  ;;  %v4908_v8 = vld [vmem:[#allocation5 + $0x10] sm:$0xff]   ;;  %v4909_v9 = vld [vmem:[#allocation8 + $0x18] sm:$0xff]   ;;  %v4912_v12 = vld [vmem:[#allocation8 + $0x20] sm:$0xff]   ;;  %s292_s11 = ssub.s32 0, %s291_s27  ;;  %s6369_s29 = scalar_lea.vmem [#allocation10], %s3845_s23 }
  0x8c   : > { %4059 = vmatprep.subr.bf16.mxu1 %v4904_v4  ;;  %v4910_v10 = vld [vmem:[#allocation5 + $0x58] sm:$0xff]   ;;  %v4913_v13 = vld [vmem:[#allocation5 + $0x60] sm:$0xff]   ;;  %v4915_v15 = vld [vmem:[#allocation8 + $0x28] sm:$0xff]   ;;  %s6604_s11 = smov (!%p288_p0, %s292_s11), %s291_s27  ;;  %s4040_s10 = sshll.u32 %s5316_s22, 11 }
  0x8d   : > { %v4911_v11 = vld [vmem:[#allocation5 + $0x18] sm:$0xff]   ;;  %v4914_v14 = vld [vmem:[#allocation5 + $0x20] sm:$0xff]   ;;  %v4916_v16 = vld [vmem:[#allocation5 + $0x68] sm:$0xff]   ;;  %p3848_p3 = scmp.lt.s32.totalorder %s6604_s11, 0  ;;  %s298_s15 = sadd.s32 2, %s6604_s11 }
  0x8e   : > { %4582 = vmatpush3.bf16.msra.mxu0 %v4903_v3  ;;  %v4917_v17 = vld [vmem:[#allocation5 + $0x28] sm:$0xff]   ;;  %v4918_v18 = vld [vmem:[#allocation8 + $0x30] sm:$0xff]   ;;  %v4921_v21 = vld [vmem:[#allocation8 + $0x38] sm:$0xff]   ;;  %s3732_s12 = sshll.u32 %s6369_s29, 4  ;;  %s6486_s26 = scalar_lea.hbm %s6539_s5, %s4040_s10  ;;  %s6488_s12 = int_to_ptr.vmem [resolvable:$true] %s3732_s12 }
  0x8f   : > { %4060 = vmatpush3.bf16.msra.mxu1 %v4905_v5  ;;  %4583 = vmatprep.subr.bf16.mxu0 %v4906_v6  ;;  %v4919_v19 = vld [vmem:[#allocation5 + $0x70] sm:$0xff]   ;;  %v4922_v22 = vld [vmem:[#allocation5 + $0x78] sm:$0xff]   ;;  %v5521_v24 = vld [vmem:[%s5503_s13 + $0x8] sm:$0xff]   ;;  %s6606_s15 = smov (!%p3848_p3, %s298_s15), %s6604_s11  ;;  %s3719_s22 = scalar_lea.sflag [#allocation4], %s5499_s17 }
  0x90   : > { %4061 = vmatprep.subr.bf16.mxu1 %v4907_v7  ;;  %v4920_v20 = vld [vmem:[#allocation5 + $0x30] sm:$0xff]   ;;  %v4923_v25 = vld [vmem:[#allocation5 + $0x38] sm:$0xff]   ;;  %870 = vmatprep.mubr.bf16.mxu1 %v5521_v24  ;;  %v4928_v26 = vld [vmem:[#allocation5 + $0x80] sm:$0xff]   ;;  %s3867_s6 = sshll.u32 %s6606_s15, 3  ;;  %s5179_s27 = scalar_lea.vmem %s6488_s12, 2048 }
  0x91   : > { %v5518_v23 = vld [vmem:[%s5503_s13 + $0x10] sm:$0xff]   ;;  %v5526_v27 = vld [vmem:[%s5503_s13 + $0x18] sm:$0xff]   ;;  %v5529_v28 = vld [vmem:[%s5503_s13] sm:$0xff]   ;;  %p5180_p7 = scmp.ne.s32.totalorder %s6488_s12, %s5179_s27  ;;  %s5262_s11 = smov [#allocation10]  }
  0x92   : > { %4584 = vmatpush3.bf16.msra.mxu0 %v4906_v6  ;;  %4595 = vmatprep.mubr.bf16.mxu0 %v5518_v23  ;;  %v4929_v29 = vld [vmem:[#allocation5 + $0x88] sm:$0xff]   ;;  %v5532_v30 = vld [vmem:[%s5503_s13 + $0x20] sm:$0xff]   ;;  %v4932_v31 = vld [vmem:[#allocation5 + $0x90] sm:$0xff]   ;;  %s5183_s15 = sshll.u32 %s5262_s11, 4  ;;  %s5184_s15 = int_to_ptr.vmem [resolvable:$false] %s5183_s15 }
  0x93   : > { %4062 = vmatpush3.bf16.msra.mxu1 %v4908_v8  ;;  %4585 = vmatprep.subr.bf16.mxu0 %v4909_v9  ;;  %v5539_v32 = vld [vmem:[%s5503_s13 + $0x28] sm:$0xff]   ;;  %v4938_v33 = vld [vmem:[#allocation5 + $0x140] sm:$0xff]   ;;  %v4933_v34 = vld [vmem:[#allocation5 + $0x98] sm:$0xff]   ;;  %p5181_p11 = pnand %p5180_p7, %p5448_p5  ;;  %p5186_p2 = scmp.lt.s32.totalorder %s6488_s12, %s5184_s15 }
  0x94   : > { %4063 = vmatprep.subr.bf16.mxu1 %v4910_v10  ;;  %v5542_v35 = vld [vmem:[%s5503_s13 + $0x30] sm:$0xff]   ;;  %v4936_v36 = vld [vmem:[#allocation5 + $0xa0] sm:$0xff]   ;;  %v4944_v37 = vld [vmem:[#allocation5 + $0x148] sm:$0xff]  }
  0x95   : > { %v5549_v38 = vld [vmem:[%s5503_s13 + $0x38] sm:$0xff]   ;;  %v4937_v39 = vld [vmem:[#allocation5 + $0xa8] sm:$0xff]   ;;  %v5552_v40 = vld [vmem:[%s5503_s13 + $0x40] sm:$0xff]   ;;  %p5182_p1 = pneg %p5181_p11 }
  0x96   : > { %4586 = vmatpush3.bf16.msra.mxu0 %v4909_v9  ;;  %v4949_v41 = vld [vmem:[#allocation5 + $0x150] sm:$0xff]   ;;  %v5559_v43 = vld [vmem:[%s5503_s13 + $0x48] sm:$0xff]   ;;  %v4954_v44 = vld [vmem:[#allocation5 + $0x158] sm:$0xff]  }
  0x97   : > { %4064 = vmatpush3.bf16.msra.mxu1 %v4911_v11  ;;  %4587 = vmatprep.subr.bf16.mxu0 %v4912_v12  ;;  %v4941_v42 = vld [vmem:[#allocation5 + $0xb0] sm:$0xff]   ;;  %v4942_v45 = vld [vmem:[#allocation5 + $0xb8] sm:$0xff]   ;;  %v4959_v46 = vld [vmem:[#allocation5 + $0x160] sm:$0xff]  }
  0x98   : > { %4065 = vmatprep.subr.bf16.mxu1 %v4913_v13  ;;  %v4943_v47 = vld [vmem:[#allocation5 + $0x100] sm:$0xff]   ;;  %v4946_v49 = vld [vmem:[#allocation5 + $0x108] sm:$0xff]   ;;  %v4966_v52 = vld [vmem:[#allocation5 + $0x170] sm:$0xff]  }
  0x99   : > { %v4945_v48 = vld [vmem:[#allocation5 + $0xc0] sm:$0xff]   ;;  %v4965_v50 = vld [vmem:[#allocation5 + $0x168] sm:$0xff]   ;;  %v4948_v53 = vld [vmem:[#allocation5 + $0x110] sm:$0xff]  }
  0x9a   : > { %4588 = vmatpush3.bf16.msra.mxu0 %v4912_v12  ;;  %v4947_v51 = vld [vmem:[#allocation5 + $0xc8] sm:$0xff]   ;;  %v4950_v54 = vld [vmem:[#allocation5 + $0xd0] sm:$0xff]   ;;  %v4951_v55 = vld [vmem:[#allocation5 + $0x118] sm:$0xff]  }
  0x9b   : > { %4066 = vmatpush3.bf16.msra.mxu1 %v4914_v14  ;;  %4589 = vmatprep.subr.bf16.mxu0 %v4915_v15  ;;  %v4968_v56 = vld [vmem:[#allocation5 + $0x178] sm:$0xff]   ;;  %v4970_v58 = vld [vmem:[#allocation5 + $0x1c0] sm:$0xff]   ;;  %v4956_v61 = vld [vmem:[#allocation5 + $0x128] sm:$0xff]  }
  0x9c   : > { %4067 = vmatprep.subr.bf16.mxu1 %v4916_v16  ;;  %v4952_v57 = vld [vmem:[#allocation5 + $0xd8] sm:$0xff]   ;;  %v4953_v59 = vld [vmem:[#allocation5 + $0x120] sm:$0xff]   ;;  %v4957_v62 = vld [vmem:[#allocation5 + $0xe8] sm:$0xff]  }
  0x9d   : > { %v4955_v60 = vld [vmem:[#allocation5 + $0xe0] sm:$0xff]   ;;  %v4958_v63 = vld [vmem:[#allocation5 + $0x130] sm:$0xff]   ;;  %v4963_v2 = vld [vmem:[#allocation5 + $0x138] sm:$0xff]  }
  0x9e   : > { %4590 = vmatpush3.bf16.msra.mxu0 %v4915_v15  ;;  %v5578_v0 = vld [vmem:[%s5503_s13 + $0x50] sm:$0xff]   ;;  %v4964_v3 = vld [vmem:[#allocation5 + $0xf8] sm:$0xff]   ;;  %v4967_v4 = vld [vmem:[#allocation5 + $0x200] sm:$0xff]  }
  0x9f   : > { %4068 = vmatpush3.bf16.msra.mxu1 %v4917_v17  ;;  %4591 = vmatprep.subr.bf16.mxu0 %v4918_v18  ;;  %v4961_v1 = vld [vmem:[#allocation5 + $0xf0] sm:$0xff]   ;;  %v5585_v5 = vld [vmem:[%s5503_s13 + $0x58] sm:$0xff]   ;;  %v4969_v6 = vld [vmem:[#allocation5 + $0x208] sm:$0xff]  }
  0xa0   : > { %4069 = vmatprep.subr.bf16.mxu1 %v4919_v19  ;;  %v4973_v7 = vld [vmem:[#allocation5 + $0x210] sm:$0xff]   ;;  %v4971_v8 = vld [vmem:[#allocation5 + $0x180] sm:$0xff]   ;;  %v4972_v9 = vld [vmem:[#allocation5 + $0x1c8] sm:$0xff]  }
  0xa1   : > { %v4979_v10 = vld [vmem:[#allocation5 + $0x218] sm:$0xff]   ;;  %v4974_v11 = vld [vmem:[#allocation5 + $0x188] sm:$0xff]   ;;  %v4975_v12 = vld [vmem:[#allocation5 + $0x1d0] sm:$0xff]  }
  0xa2   : > { %4592 = vmatpush3.bf16.msra.mxu0 %v4918_v18  ;;  %v4976_v13 = vld [vmem:[#allocation5 + $0x190] sm:$0xff]   ;;  %v4985_v14 = vld [vmem:[#allocation5 + $0x220] sm:$0xff]   ;;  %v4977_v15 = vld [vmem:[#allocation5 + $0x1d8] sm:$0xff]  }
  0xa3   : > { %4070 = vmatpush3.bf16.msra.mxu1 %v4920_v20  ;;  %4593 = vmatprep.subr.bf16.mxu0 %v4921_v21  ;;  %v4989_v16 = vld [vmem:[#allocation5 + $0x228] sm:$0xff]   ;;  %v4978_v17 = vld [vmem:[#allocation5 + $0x198] sm:$0xff]   ;;  %v4980_v18 = vld [vmem:[#allocation5 + $0x1e0] sm:$0xff]  }
  0xa4   : > { %4071 = vmatprep.subr.bf16.mxu1 %v4922_v22  ;;  %v4990_v19 = vld [vmem:[#allocation5 + $0x230] sm:$0xff]   ;;  %v4981_v20 = vld [vmem:[#allocation5 + $0x1a0] sm:$0xff]   ;;  %v4991_v22 = vld [vmem:[#allocation5 + $0x238] sm:$0xff]  }
  0xa6   : > { %4594 = vmatpush3.bf16.msra.mxu0 %v4921_v21  ;;  %v4982_v21 = vld [vmem:[#allocation5 + $0x1e8] sm:$0xff]  }
  0xa7   : > { %4072 = vmatpush3.bf16.msra.mxu1 %v4923_v25  ;;  %4611 = vmatprep.subr.bf16.mxu0 %v4928_v26  ;;  %v4983_v25 = vld [vmem:[#allocation5 + $0x1a8] sm:$0xff]  }
  0xa8   : > { %4647 = vmatprep.subr.bf16.mxu1 %v4938_v33 }
  0xa9   : > { %4596 = vmatmul.mubr.bf16.vlgmr.msra.gmra.mrb[0].mxu0 %v5526_v27 }
  0xaa   : > { %871 = vmatmul.mubr.bf16.vlgmr.msra.gmra.mrb[0].mxu1 %v5529_v28  ;;  %4612 = vmatpush3.bf16.msra.mxu0 %v4928_v26  ;;  %v4984_v26 = vld [vmem:[#allocation5 + $0x1f0] sm:$0xff]  }
  0xab   : > { %4613 = vmatprep.subr.bf16.mxu0 %v4929_v29  ;;  %4599 = vmatprep.mubr.bf16.mxu0 %v5532_v30 }
  0xac   : > { %878 = vmatprep.mubr.bf16.mxu1 %v5518_v23  ;;  %4648 = vmatpush3.bf16.msra.mxu1 %v4938_v33  ;;  %v4988_v33 = vld [vmem:[#allocation5 + $0x1b8] sm:$0xff]  }
  0xad   : > { %4649 = vmatprep.subr.bf16.mxu1 %v4944_v37 }
  0xae   : > { %4614 = vmatpush3.bf16.msra.mxu0 %v4929_v29  ;;  %v4986_v29 = vld [vmem:[#allocation5 + $0x1b0] sm:$0xff]  }
  0xaf   : > { %4615 = vmatprep.subr.bf16.mxu0 %v4932_v31 }
  0xb0   : > { %4650 = vmatpush3.bf16.msra.mxu1 %v4944_v37 }
  0xb1   : > { %4600 = vmatmul.mubr.bf16.gmra.mrb[4].mxu0 %v5539_v32  ;;  %4651 = vmatprep.subr.bf16.mxu1 %v4949_v41 }
  0xb2   : > { %879 = vmatmul.mubr.bf16.gmra.mrb[4].mxu1 %v5521_v24  ;;  %4616 = vmatpush3.bf16.msra.mxu0 %v4932_v31  ;;  %v4987_v31 = vld [vmem:[#allocation5 + $0x1f8] sm:$0xff]  }
  0xb3   : > { %4617 = vmatprep.subr.bf16.mxu0 %v4933_v34  ;;  %4603 = vmatprep.mubr.bf16.mxu0 %v5542_v35 }
  0xb4   : > { %886 = vmatprep.mubr.bf16.mxu1 %v5526_v27  ;;  %4652 = vmatpush3.bf16.msra.mxu1 %v4949_v41 }
  0xb5   : > { %4653 = vmatprep.subr.bf16.mxu1 %v4954_v44 }
  0xb6   : > { %4618 = vmatpush3.bf16.msra.mxu0 %v4933_v34 }
  0xb7   : > { %4619 = vmatprep.subr.bf16.mxu0 %v4936_v36 }
  0xb8   : > { %4654 = vmatpush3.bf16.msra.mxu1 %v4954_v44 }
  0xb9   : > { %4604 = vmatmul.mubr.bf16.gmra.mrb[8].mxu0 %v5549_v38  ;;  %4655 = vmatprep.subr.bf16.mxu1 %v4959_v46 }
  0xba   : > { %887 = vmatmul.mubr.bf16.gmra.mrb[8].mxu1 %v5518_v23  ;;  %4620 = vmatpush3.bf16.msra.mxu0 %v4936_v36 }
  0xbb   : > { %4621 = vmatprep.subr.bf16.mxu0 %v4937_v39  ;;  %4607 = vmatprep.mubr.bf16.mxu0 %v5552_v40 }
  0xbc   : > { %894 = vmatprep.mubr.bf16.mxu1 %v5532_v30  ;;  %4656 = vmatpush3.bf16.msra.mxu1 %v4959_v46 }
  0xbd   : > { %4657 = vmatprep.subr.bf16.mxu1 %v4965_v50 }
  0xbe   : > { %4622 = vmatpush3.bf16.msra.mxu0 %v4937_v39  ;;  %v4992_v39 = vld [vmem:[#allocation7 + $0x80] sm:$0xff]  }
  0xbf   : > { %4623 = vmatprep.subr.bf16.mxu0 %v4941_v42 }
  0xc0   : > { %4658 = vmatpush3.bf16.msra.mxu1 %v4965_v50  ;;  %v4993_v50 = vld [vmem:[#allocation7 + $0x40] sm:$0xff]  }
  0xc1   : > { %4608 = vmatmul.mubr.bf16.gmra.mrb[12].mxu0 %v5559_v43  ;;  %4659 = vmatprep.subr.bf16.mxu1 %v4966_v52 }
  0xc2   : > { %895 = vmatmul.mubr.bf16.gmra.mrb[12].mxu1 %v5526_v27  ;;  %4624 = vmatpush3.bf16.msra.mxu0 %v4941_v42 }
  0xc3   : > { %4625 = vmatprep.subr.bf16.mxu0 %v4942_v45  ;;  %902 = vmatprep.mubr.bf16.mxu1 %v5539_v32 }
  0xc4   : > { %4627 = vmatprep.mubr.bf16.mxu0 %v5518_v23  ;;  %4660 = vmatpush3.bf16.msra.mxu1 %v4966_v52 }
  0xc5   : > { %4661 = vmatprep.subr.bf16.mxu1 %v4968_v56 }
  0xc6   : > { %4626 = vmatpush3.bf16.msra.mxu0 %v4942_v45 }
  0xc7   : > { %4151 = vmatprep.subr.bf16.mxu0 %v4943_v47 }
  0xc8   : > { %4662 = vmatpush3.bf16.msra.mxu1 %v4968_v56 }
  0xc9   : > { %4628 = vmatmul.mubr.bf16.vlgmr.msra.gmra.mrb[16].mxu0 %v5526_v27  ;;  %4245 = vmatprep.subr.bf16.mxu1 %v4970_v58 }
  0xca   : > { %903 = vmatmul.mubr.bf16.gmra.mrb[16].mxu1 %v5532_v30  ;;  %4152 = vmatpush3.bf16.msra.mxu0 %v4945_v48 }
  0xcb   : > { %4153 = vmatprep.subr.bf16.mxu0 %v4946_v49  ;;  %910 = vmatprep.mubr.bf16.mxu1 %v5542_v35 }
  0xcc   : > { %4631 = vmatprep.mubr.bf16.mxu0 %v5532_v30 }
  0xce   : > { %4154 = vmatpush3.bf16.msra.mxu0 %v4947_v51  ;;  %v4994_v51 = vld [vmem:[#allocation7] sm:$0xff]  }
  0xcf   : > { %4155 = vmatprep.subr.bf16.mxu0 %v4948_v53 }
  0xd1   : > { %4632 = vmatmul.mubr.bf16.gmra.mrb[20].mxu0 %v5539_v32 }
  0xd2   : > { %911 = vmatmul.mubr.bf16.gmra.mrb[20].mxu1 %v5539_v32  ;;  %4156 = vmatpush3.bf16.msra.mxu0 %v4950_v54 }
  0xd3   : > { %918 = vmatprep.mubr.bf16.mxu1 %v5549_v38  ;;  %4635 = vmatprep.mubr.bf16.mxu0 %v5542_v35 }
  0xd4   : > { %4157 = vmatprep.subr.bf16.mxu0 %v4951_v55 }
  0xd6   : > { %4158 = vmatpush3.bf16.msra.mxu0 %v4952_v57 }
  0xd7   : > { %4159 = vmatprep.subr.bf16.mxu0 %v4953_v59 }
  0xd9   : > { %4636 = vmatmul.mubr.bf16.gmra.mrb[24].mxu0 %v5549_v38 }
  0xda   : > { %919 = vmatmul.mubr.bf16.gmra.mrb[24].mxu1 %v5542_v35  ;;  %4160 = vmatpush3.bf16.msra.mxu0 %v4955_v60 }
  0xdb   : > { %926 = vmatprep.mubr.bf16.mxu1 %v5552_v40  ;;  %4639 = vmatprep.mubr.bf16.mxu0 %v5552_v40 }
  0xdc   : > { %4161 = vmatprep.subr.bf16.mxu0 %v4956_v61  ;;  %v4995_v61 = vld [vmem:[#allocation7 + $0x88] sm:$0xff]  }
  0xde   : > { %4162 = vmatpush3.bf16.msra.mxu0 %v4957_v62 }
  0xdf   : > { %4163 = vmatprep.subr.bf16.mxu0 %v4958_v63  ;;  %v4996_v63 = vld [vmem:[#allocation7 + $0x48] sm:$0xff]  }
  0xe1   : > { %4640 = vmatmul.mubr.bf16.gmra.mrb[28].mxu0 %v5559_v43 }
  0xe2   : > { %927 = vmatmul.mubr.bf16.gmra.mrb[28].mxu1 %v5549_v38  ;;  %4643 = vmatprep.mubr.bf16.mxu0 %v5578_v0 }
  0xe3   : > { %934 = vmatprep.mubr.bf16.mxu1 %v5559_v43  ;;  %4164 = vmatpush3.bf16.msra.mxu0 %v4961_v1 }
  0xe4   : > { %4165 = vmatprep.subr.bf16.mxu0 %v4963_v2 }
  0xe7   : > { %4166 = vmatpush3.bf16.msra.mxu0 %v4964_v3 }
  0xe8   : > { %4683 = vmatprep.subr.bf16.mxu0 %v4967_v4 }
  0xe9   : > { %4644 = vmatmul.mubr.bf16.gmra.mrb[32].mxu0 %v5585_v5 }
  0xea   : > { %935 = vmatmul.mubr.bf16.gmra.mrb[32].mxu1 %v5552_v40  ;;  %1410 = vmatprep.mubr.bf16.mxu0 %v5521_v24 }
  0xeb   : > { %942 = vmatprep.mubr.bf16.mxu1 %v5578_v0 }
  0xf1   : > { %1411 = vmatmul.mubr.bf16.vlgmr.msra.gmra.mrb[36].mxu0 %v5529_v28 }
  0xf2   : > { %943 = vmatmul.mubr.bf16.gmra.mrb[36].mxu1 %v5559_v43  ;;  %4684 = vmatpush3.bf16.msra.mxu0 %v4967_v4 }
  0xf3   : > { %1418 = vmatprep.mubr.bf16.mxu0 %v5518_v23  ;;  %4663 = vmatprep.mubr.bf16.mxu1 %v5518_v23 }
  0xf4   : > { %4685 = vmatprep.subr.bf16.mxu0 %v4969_v6 }
  0xf6   : > { %4686 = vmatpush3.bf16.msra.mxu0 %v4969_v6 }
  0xf7   : > { %4687 = vmatprep.subr.bf16.mxu0 %v4973_v7 }
  0xf9   : > { %1419 = vmatmul.mubr.bf16.gmra.mrb[40].mxu0 %v5521_v24 }
  0xfa   : > { %4664 = vmatmul.mubr.bf16.vlgmr.msra.gmra.mrb[40].mxu1 %v5526_v27  ;;  %1426 = vmatprep.mubr.bf16.mxu0 %v5526_v27 }
  0xfb   : > { %4667 = vmatprep.mubr.bf16.mxu1 %v5532_v30  ;;  %4246 = vmatpush3.bf16.msra.mxu1 %v4971_v8  ;;  %v4998_v8 = vld [vmem:[#allocation7 + $0x50] sm:$0xff]  }
  0xfc   : > { %4247 = vmatprep.subr.bf16.mxu1 %v4972_v9  ;;  %4688 = vmatpush3.bf16.msra.mxu0 %v4973_v7 }
  0xfd   : > { %4689 = vmatprep.subr.bf16.mxu0 %v4979_v10 }
  0xff   : > { %4248 = vmatpush3.bf16.msra.mxu1 %v4974_v11 }
 0x100   : > { %4249 = vmatprep.subr.bf16.mxu1 %v4975_v12  ;;  %4690 = vmatpush3.bf16.msra.mxu0 %v4979_v10  ;;  %v4999_v10 = vld [vmem:[#allocation7 + $0x10] sm:$0xff]  }
 0x101   : > { %1427 = vmatmul.mubr.bf16.gmra.mrb[44].mxu0 %v5518_v23  ;;  %4691 = vmatprep.subr.bf16.mxu0 %v4985_v14 }
 0x102   : > { %4668 = vmatmul.mubr.bf16.gmra.mrb[44].mxu1 %v5539_v32  ;;  %1434 = vmatprep.mubr.bf16.mxu0 %v5532_v30 }
 0x103   : > { %4671 = vmatprep.mubr.bf16.mxu1 %v5542_v35  ;;  %4250 = vmatpush3.bf16.msra.mxu1 %v4976_v13 }
 0x104   : > { %4251 = vmatprep.subr.bf16.mxu1 %v4977_v15  ;;  %4692 = vmatpush3.bf16.msra.mxu0 %v4985_v14 }
 0x105   : > { %4693 = vmatprep.subr.bf16.mxu0 %v4989_v16 }
 0x107   : > { %4252 = vmatpush3.bf16.msra.mxu1 %v4978_v17 }
 0x108   : > { %4253 = vmatprep.subr.bf16.mxu1 %v4980_v18  ;;  %4694 = vmatpush3.bf16.msra.mxu0 %v4989_v16  ;;  %v5001_v16 = vld [vmem:[#allocation7 + $0x58] sm:$0xff]  }
 0x109   : > { %1435 = vmatmul.mubr.bf16.gmra.mrb[48].mxu0 %v5526_v27  ;;  %4695 = vmatprep.subr.bf16.mxu0 %v4990_v19 }
 0x10a   : > { %4672 = vmatmul.mubr.bf16.gmra.mrb[48].mxu1 %v5549_v38  ;;  %1442 = vmatprep.mubr.bf16.mxu0 %v5539_v32 }
 0x10b   : > { %4675 = vmatprep.mubr.bf16.mxu1 %v5552_v40  ;;  %4254 = vmatpush3.bf16.msra.mxu1 %v4981_v20  ;;  %v5002_v20 = vld [vmem:[#allocation7 + $0x18] sm:$0xff]  }
 0x10c   : > { %4255 = vmatprep.subr.bf16.mxu1 %v4982_v21  ;;  %4696 = vmatpush3.bf16.msra.mxu0 %v4990_v19 }
 0x10d   : > { %4697 = vmatprep.subr.bf16.mxu0 %v4991_v22 }
 0x10f   : > { %4256 = vmatpush3.bf16.msra.mxu1 %v4983_v25 }
 0x110   : > { %4257 = vmatprep.subr.bf16.mxu1 %v4984_v26  ;;  %4698 = vmatpush3.bf16.msra.mxu0 %v4991_v22 }
 0x111   : > { %1443 = vmatmul.mubr.bf16.gmra.mrb[52].mxu0 %v5532_v30  ;;  %4339 = vmatprep.subr.bf16.mxu0 %v4993_v50 }
 0x112   : > { %4676 = vmatmul.mubr.bf16.gmra.mrb[52].mxu1 %v5559_v43  ;;  %1450 = vmatprep.mubr.bf16.mxu0 %v5542_v35 }
 0x113   : > { %4679 = vmatprep.mubr.bf16.mxu1 %v5578_v0  ;;  %4258 = vmatpush3.bf16.msra.mxu1 %v4986_v29 }
 0x114   : > { %4259 = vmatprep.subr.bf16.mxu1 %v4987_v31 }
 0x117   : > { %4260 = vmatpush3.bf16.msra.mxu1 %v4988_v33  ;;  %v5000_v33 = vld [vmem:[#allocation7 + $0x90] sm:$0xff]  }
 0x118   : > { %4719 = vmatprep.subr.bf16.mxu1 %v4992_v39 }
 0x119   : > { %1451 = vmatmul.mubr.bf16.gmra.mrb[56].mxu0 %v5539_v32 }
 0x11a   : > { %4680 = vmatmul.mubr.bf16.gmra.mrb[56].mxu1 %v5585_v5  ;;  %1458 = vmatprep.mubr.bf16.mxu0 %v5549_v38 }
 0x11b   : > { %1849 = vmatprep.mubr.bf16.mxu1 %v5521_v24 }
 0x121   : > { %1459 = vmatmul.mubr.bf16.gmra.mrb[60].mxu0 %v5542_v35 }
 0x122   : > { %1850 = vmatmul.mubr.bf16.vlgmr.msra.gmra.mrb[60].mxu1 %v5529_v28  ;;  %1466 = vmatprep.mubr.bf16.mxu0 %v5552_v40 }
 0x123   : > { %1857 = vmatprep.mubr.bf16.mxu1 %v5518_v23  ;;  %4720 = vmatpush3.bf16.msra.mxu1 %v4992_v39 }
 0x124   : > { %4721 = vmatprep.subr.bf16.mxu1 %v4995_v61 }
 0x127   : > { %4722 = vmatpush3.bf16.msra.mxu1 %v4995_v61  ;;  %v5007_v61 = vld [vmem:[#allocation7 + $0x28] sm:$0xff]  }
 0x128   : > { %4723 = vmatprep.subr.bf16.mxu1 %v5000_v33 }
 0x129   : > { %1467 = vmatmul.mubr.bf16.gmra.mrb[64].mxu0 %v5549_v38 }
 0x12a   : > { %1858 = vmatmul.mubr.bf16.gmra.mrb[64].mxu1 %v5521_v24  ;;  %1474 = vmatprep.mubr.bf16.mxu0 %v5559_v43 }
 0x12b   : > { %1865 = vmatprep.mubr.bf16.mxu1 %v5526_v27  ;;  %4724 = vmatpush3.bf16.msra.mxu1 %v5000_v33  ;;  %v5012_v33 = vld [vmem:[#allocation7 + $0xa8] sm:$0xff]  }
 0x131   : > { %1475 = vmatmul.mubr.bf16.gmra.mrb[68].mxu0 %v5552_v40 }
 0x132   : > { %1866 = vmatmul.mubr.bf16.gmra.mrb[68].mxu1 %v5518_v23  ;;  %1482 = vmatprep.mubr.bf16.mxu0 %v5578_v0 }
 0x133   : > { %1873 = vmatprep.mubr.bf16.mxu1 %v5532_v30 }
 0x139   : > { %1483 = vmatmul.mubr.bf16.gmra.mrb[72].mxu0 %v5559_v43 }
 0x13a   : > { %1874 = vmatmul.mubr.bf16.gmra.mrb[72].mxu1 %v5526_v27  ;;  %4699 = vmatprep.mubr.bf16.mxu0 %v5518_v23 }
 0x13b   : > { %1881 = vmatprep.mubr.bf16.mxu1 %v5539_v32 }
 0x141   : > { %4700 = vmatmul.mubr.bf16.vlgmr.msra.gmra.mrb[76].mxu0 %v5526_v27 }
 0x142   : > { %1882 = vmatmul.mubr.bf16.gmra.mrb[76].mxu1 %v5532_v30  ;;  %4703 = vmatprep.mubr.bf16.mxu0 %v5532_v30 }
 0x143   : > { %1889 = vmatprep.mubr.bf16.mxu1 %v5542_v35  ;;  %4340 = vmatpush3.bf16.msra.mxu0 %v4994_v51 }
 0x144   : > { %4341 = vmatprep.subr.bf16.mxu0 %v4996_v63 }
 0x149   : > { %4704 = vmatmul.mubr.bf16.gmra.mrb[80].mxu0 %v5539_v32 }
 0x14a   : > { %1890 = vmatmul.mubr.bf16.gmra.mrb[80].mxu1 %v5539_v32  ;;  %4707 = vmatprep.mubr.bf16.mxu0 %v5542_v35 }
 0x14b   : > { %1897 = vmatprep.mubr.bf16.mxu1 %v5549_v38 }
 0x151   : > { %4708 = vmatmul.mubr.bf16.gmra.mrb[84].mxu0 %v5549_v38 }
 0x152   : > { %1898 = vmatmul.mubr.bf16.gmra.mrb[84].mxu1 %v5542_v35  ;;  %4711 = vmatprep.mubr.bf16.mxu0 %v5552_v40 }
 0x153   : > { %1905 = vmatprep.mubr.bf16.mxu1 %v5552_v40 }
 0x159   : > { %4712 = vmatmul.mubr.bf16.gmra.mrb[88].mxu0 %v5559_v43 }
 0x15a   : > { %1906 = vmatmul.mubr.bf16.gmra.mrb[88].mxu1 %v5549_v38  ;;  %4715 = vmatprep.mubr.bf16.mxu0 %v5578_v0 }
 0x15b   : > { %1913 = vmatprep.mubr.bf16.mxu1 %v5559_v43 }
 0x161   : > { %4716 = vmatmul.mubr.bf16.gmra.mrb[92].mxu0 %v5585_v5 }
 0x162   : > { %1914 = vmatmul.mubr.bf16.gmra.mrb[92].mxu1 %v5552_v40 }
 0x163   : > { %1921 = vmatprep.mubr.bf16.mxu1 %v5578_v0  ;;  %v4997_v0 = vld [vmem:[#allocation7 + $0x8] sm:$0xff]  }
 0x164   : > { %4342 = vmatpush3.bf16.msra.mxu0 %v4997_v0 }
 0x165   : > { %4343 = vmatprep.subr.bf16.mxu0 %v4998_v8 }
 0x168   : > { %4344 = vmatpush3.bf16.msra.mxu0 %v4999_v10 }
 0x169   : > { %4345 = vmatprep.subr.bf16.mxu0 %v5001_v16 }
 0x16a   : > { %1922 = vmatmul.mubr.bf16.gmra.mrb[96].mxu1 %v5559_v43 }
 0x16c   : > { %4346 = vmatpush3.bf16.msra.mxu0 %v5002_v20 }
 0x17c   : > { %v5651_v23 = vpop.f32.mrb[0].mxu0 }
 0x17d   : > { %v5653_v24 = vpop.f32.mrb[1].mxu0  ;;  %v4073_v27 = vpop.f32.mrb[0].mxu1 }
 0x17e   : > { %v5655_v28 = vpop.f32.mrb[2].mxu0  ;;  %v4074_v30 = vpop.f32.mrb[1].mxu1 }
 0x17f   : > { %v5657_v32 = vpop.f32.mrb[3].mxu0  ;;  %v4075_v34 = vadd.f32 %v4074_v30, %v4073_v27  ;;  %v4076_v35 = vpop.f32.mrb[2].mxu1 }
 0x180   : > { %v4077_v36 = vpop.f32.mrb[3].mxu1 }
 0x181   : > { %v5659_v37 = vadd.f32 %v4077_v36, %v4076_v35  ;;  %v5003_v36 = vld [vmem:[#allocation7 + $0x60] sm:$0xff]  }
 0x182   : > { %4347 = vmatprep.subr.bf16.mxu0 %v5003_v36 }
 0x184   : > { %v5661_v38 = vpop.f32.mrb[4].mxu0 }
 0x185   : > { %6561 = vst [vmem:[#allocation15_spill] sm:$0xff] %v5661_v38  ;;  %v5663_v40 = vpop.f32.mrb[5].mxu0  ;;  %v4079_v41 = vpop.f32.mrb[4].mxu1 }
 0x186   : > { %6562 = vst [vmem:[#allocation16_spill] sm:$0xff] %v5663_v40  ;;  %v5665_v42 = vpop.f32.mrb[6].mxu0  ;;  %v4080_v43 = vpop.f32.mrb[5].mxu1 }
 0x187   : > { %6563 = vst [vmem:[#allocation17_spill] sm:$0xff] %v5665_v42  ;;  %v5667_v44 = vpop.f32.mrb[7].mxu0  ;;  %v4081_v45 = vadd.f32 %v4080_v43, %v4079_v41  ;;  %v4082_v46 = vpop.f32.mrb[6].mxu1  ;;  %v5004_v41 = vld [vmem:[#allocation7 + $0x20] sm:$0xff]  }
 0x188   : > { %6564 = vst [vmem:[#allocation18_spill] sm:$0xff] %v5667_v44  ;;  %v4083_v47 = vpop.f32.mrb[7].mxu1  ;;  %4348 = vmatpush3.bf16.msra.mxu0 %v5004_v41  ;;  %v5011_v41 = vld [vmem:[#allocation7 + $0x78] sm:$0xff]  }
 0x189   : > { %v4084_v48 = vadd.f32 %v4083_v47, %v4082_v46  ;;  %v5005_v47 = vld [vmem:[#allocation7 + $0x98] sm:$0xff]  }
 0x18a   : > { %4725 = vmatprep.subr.bf16.mxu1 %v5005_v47 }
 0x18b   : > { %4726 = vmatpush3.bf16.msra.mxu1 %v5005_v47 }
 0x18c   : > { %v5669_v49 = vpop.f32.mrb[8].mxu0 }
 0x18d   : > { %6565 = vst [vmem:[#allocation19_spill] sm:$0xff] %v5669_v49  ;;  %v5671_v52 = vpop.f32.mrb[9].mxu0  ;;  %v4085_v53 = vpop.f32.mrb[8].mxu1 }
 0x18e   : > { %6566 = vst [vmem:[#allocation20_spill] sm:$0xff] %v5671_v52  ;;  %v5673_v54 = vpop.f32.mrb[10].mxu0  ;;  %v4086_v55 = vpop.f32.mrb[9].mxu1 }
 0x18f   : > { %6567 = vst [vmem:[#allocation21_spill] sm:$0xff] %v5673_v54  ;;  %v5675_v56 = vpop.f32.mrb[11].mxu0  ;;  %v5677_v57 = vadd.f32 %v4086_v55, %v4085_v53  ;;  %v4088_v58 = vpop.f32.mrb[10].mxu1  ;;  %v5006_v53 = vld [vmem:[#allocation7 + $0x68] sm:$0xff]  }
 0x190   : > { %6568 = vst [vmem:[#allocation22_spill] sm:$0xff] %v5675_v56  ;;  %v4089_v59 = vpop.f32.mrb[11].mxu1  ;;  %4349 = vmatprep.subr.bf16.mxu0 %v5006_v53  ;;  %v6579_v56 = vmov 0.0  }
 0x191   : > { %v5679_v60 = vadd.f32 %v4089_v59, %v4088_v58  ;;  %4350 = vmatpush3.bf16.msra.mxu0 %v5007_v61  ;;  %v5014_v61 = vld [vmem:[#allocation7 + $0xb0] sm:$0xff]  }
 0x194   : > { %v5681_v62 = vpop.f32.mrb[12].mxu0 }
 0x195   : > { %6569 = vst [vmem:[#allocation23_spill] sm:$0xff] %v5681_v62  ;;  %v5683_v1 = vpop.f32.mrb[13].mxu0  ;;  %v4091_v2 = vpop.f32.mrb[12].mxu1 }
 0x196   : > { %6570 = vst [vmem:[#allocation24_spill] sm:$0xff] %v5683_v1  ;;  %v5685_v3 = vpop.f32.mrb[14].mxu0  ;;  %v4092_v4 = vpop.f32.mrb[13].mxu1 }
 0x197   : > { %6571 = vst [vmem:[#allocation25_spill] sm:$0xff] %v5685_v3  ;;  %v5687_v5 = vpop.f32.mrb[15].mxu0  ;;  %v4093_v6 = vadd.f32 %v4092_v4, %v4091_v2  ;;  %v4094_v7 = vpop.f32.mrb[14].mxu1 }
 0x198   : > { %6572 = vst [vmem:[#allocation26_spill] sm:$0xff] %v5687_v5  ;;  %v4095_v9 = vpop.f32.mrb[15].mxu1 }
 0x199   : > { %v4096_v11 = vadd.f32 %v4095_v9, %v4094_v7 }
 0x19c   : > { %v4629_v12 = vpop.f32.mrb[16].mxu0 }
 0x19d   : > { %v994_v13 = vadd.f32 %v4629_v12, %v4081_v45  ;;  %v985_v14 = vpop.f32.mrb[17].mxu0  ;;  %v4097_v15 = vpop.f32.mrb[16].mxu1 }
 0x19e   : > { %v5689_v17 = vadd.f32 %v4075_v34, %v985_v14  ;;  %v4630_v18 = vpop.f32.mrb[18].mxu0  ;;  %v4098_v19 = vpop.f32.mrb[17].mxu1  ;;  %v5010_v14 = vld [vmem:[#allocation7 + $0xa0] sm:$0xff]  }
 0x19f   : > { %v997_v21 = vadd.f32 %v4630_v18, %v4084_v48  ;;  %v988_v22 = vpop.f32.mrb[19].mxu0  ;;  %v4099_v25 = vadd.f32 %v4098_v19, %v4097_v15  ;;  %v4100_v26 = vpop.f32.mrb[18].mxu1  ;;  %v1088_v27 = vrot.slane %v994_v13, 7  ;;  %v5008_v15 = vld [vmem:[#allocation7 + $0x70] sm:$0xff]   ;;  %4727 = vmatprep.subr.bf16.mxu1 %v5010_v14 }
 0x1a0   : > { %v989_v29 = vadd.f32 %v5659_v37, %v988_v22  ;;  %v4101_v31 = vpop.f32.mrb[19].mxu1  ;;  %v1085_v34 = vrot.slane %v5689_v17, 7  ;;  %v5009_v19 = vld [vmem:[#allocation7 + $0x30] sm:$0xff]   ;;  %4351 = vmatprep.subr.bf16.mxu0 %v5008_v15  ;;  %4728 = vmatpush3.bf16.msra.mxu1 %v5010_v14 }
 0x1a1   : > { %v1090_v30 = vrot.slane %v997_v21, 7  ;;  %v4102_v35 = vadd.f32 %v4101_v31, %v4100_v26  ;;  %4352 = vmatpush3.bf16.msra.mxu0 %v5009_v19  ;;  %4729 = vmatprep.subr.bf16.mxu1 %v5012_v33 }
 0x1a2   : > { %v1086_v39 = vrot.slane %v989_v29, 7  ;;  %4353 = vmatprep.subr.bf16.mxu0 %v5011_v41 }
 0x1a3   : > { %v5694_v43 = vsel %vm1084_vm0, %v1088_v27, %v1090_v30 }
 0x1a4   : > { %v5697_v45 = vsel %vm1084_vm0, %v1086_v39, %v1088_v27  ;;  %v4633_v37 = vpop.f32.mrb[20].mxu0  ;;  %v5702_v46 = vsel %vm1084_vm0, %v1085_v34, %v1086_v39  ;;  %4730 = vmatpush3.bf16.msra.mxu1 %v5012_v33 }
 0x1a5   : > { %v1010_v48 = vadd.f32 %v4633_v37, %v4093_v6  ;;  %v1001_v50 = vpop.f32.mrb[21].mxu0  ;;  %v4103_v51 = vpop.f32.mrb[20].mxu1  ;;  %4731 = vmatprep.subr.bf16.mxu1 %v5014_v61 }
 0x1a6   : > { %v1002_v55 = vadd.f32 %v5677_v57, %v1001_v50  ;;  %v4634_v58 = vpop.f32.mrb[22].mxu0  ;;  %v4104_v59 = vpop.f32.mrb[21].mxu1  ;;  %v5013_v50 = vld [vmem:[#allocation7 + $0x38] sm:$0xff]  }
 0x1a7   : > { %v1013_v63 = vadd.f32 %v4634_v58, %v4096_v11  ;;  %v1004_v0 = vpop.f32.mrb[23].mxu0  ;;  %v4105_v2 = vadd.f32 %v4104_v59, %v4103_v51  ;;  %v4106_v4 = vpop.f32.mrb[22].mxu1  ;;  %v1096_v6 = vrot.slane %v1010_v48, 7  ;;  %4354 = vmatpush3.bf16.msra.mxu0 %v5013_v50 }
 0x1a8   : > { %v1092_v7 = vrot.slane %v1002_v55, 7  ;;  %v1005_v8 = vadd.f32 %v5679_v60, %v1004_v0  ;;  %v4107_v9 = vpop.f32.mrb[23].mxu1  ;;  %4732 = vmatpush3.bf16.msra.mxu1 %v5014_v61  ;;  %v341_v61 = vlaneseq }
 0x1a9   : > { %v1098_v10 = vrot.slane %v1013_v63, 7  ;;  %v4108_v12 = vadd.f32 %v4107_v9, %v4106_v4 }
 0x1aa   : > { %v1094_v13 = vrot.slane %v1005_v8, 7  ;;  %v5707_v57 = vsel %vm1084_vm0, %v1090_v30, %v1092_v7 }
 0x1ab   : > { %v5710_v11 = vsel %vm1084_vm0, %v1096_v6, %v1098_v10 }
 0x1ac   : > { %v5713_v16 = vsel %vm1084_vm0, %v1094_v13, %v1096_v6  ;;  %v4637_v18 = vpop.f32.mrb[24].mxu0  ;;  %v5716_v60 = vsel %vm1084_vm0, %v1092_v7, %v1094_v13 }
 0x1ad   : > { %v1026_v20 = vadd.f32 %v4637_v18, %v4105_v2  ;;  %v1017_v21 = vpop.f32.mrb[25].mxu0  ;;  %v4109_v22 = vpop.f32.mrb[24].mxu1 }
 0x1ae   : > { %v1018_v26 = vadd.f32 %v4099_v25, %v1017_v21  ;;  %v4638_v29 = vpop.f32.mrb[26].mxu0  ;;  %v4110_v31 = vpop.f32.mrb[25].mxu1 }
 0x1af   : > { %v1029_v27 = vadd.f32 %v4638_v29, %v4108_v12  ;;  %v1020_v30 = vpop.f32.mrb[27].mxu0  ;;  %v4111_v36 = vadd.f32 %v4110_v31, %v4109_v22  ;;  %v4112_v39 = vpop.f32.mrb[26].mxu1  ;;  %v1104_v51 = vrot.slane %v1026_v20, 7 }
 0x1b0   : > { %v1100_v37 = vrot.slane %v1018_v26, 7  ;;  %v1021_v47 = vadd.f32 %v4102_v35, %v1020_v30  ;;  %v4113_v48 = vpop.f32.mrb[27].mxu1 }
 0x1b1   : > { %v1106_v53 = vrot.slane %v1029_v27, 7  ;;  %v4114_v55 = vadd.f32 %v4113_v48, %v4112_v39 }
 0x1b2   : > { %v1102_v25 = vrot.slane %v1021_v47, 7  ;;  %v5719_v58 = vsel %vm1084_vm0, %v1098_v10, %v1100_v37 }
 0x1b3   : > { %v5722_v59 = vsel %vm1084_vm0, %v1104_v51, %v1106_v53 }
 0x1b4   : > { %v5725_v63 = vsel %vm1084_vm0, %v1102_v25, %v1104_v51  ;;  %v4641_v35 = vpop.f32.mrb[28].mxu0  ;;  %v5728_v0 = vsel %vm1084_vm0, %v1100_v37, %v1102_v25 }
 0x1b5   : > { %v4115_v2 = vpop.f32.mrb[28].mxu1  ;;  %v1033_v4 = vpop.f32.mrb[29].mxu0 }
 0x1b6   : > { %v4116_v7 = vpop.f32.mrb[29].mxu1  ;;  %v1034_v8 = vadd.f32 %v4111_v36, %v1033_v4  ;;  %v4642_v9 = vpop.f32.mrb[30].mxu0 }
 0x1b7   : > { %v4117_v6 = vadd.f32 %v4116_v7, %v4115_v2  ;;  %v4118_v10 = vpop.f32.mrb[30].mxu1  ;;  %v1036_v12 = vpop.f32.mrb[31].mxu0 }
 0x1b8   : > { %v1108_v13 = vrot.slane %v1034_v8, 7  ;;  %v4119_v14 = vpop.f32.mrb[31].mxu1  ;;  %v1037_v15 = vadd.f32 %v4114_v55, %v1036_v12 }
 0x1b9   : > { %v1042_v18 = vadd.f32 %v4641_v35, %v4117_v6  ;;  %v4120_v19 = vadd.f32 %v4119_v14, %v4118_v10  ;;  %v5745_v10 = vld [vmem:[#allocation7 + $0x140] sm:$0xff]  }
 0x1ba   : > { %v1110_v20 = vrot.slane %v1037_v15, 7  ;;  %v5731_v21 = vsel %vm1084_vm0, %v1106_v53, %v1108_v13  ;;  %v5016_v53 = vld [vmem:[#allocation7 + $0xb8] sm:$0xff]   ;;  %v5747_v15 = vshrl.u32 %v341_v61, 7  ;;  %4751 = vmatprep.subr.bf16.mxu0 %v5745_v10 }
 0x1bb   : > { %v1112_v22 = vrot.slane %v1042_v18, 7  ;;  %v1045_v26 = vadd.f32 %v4642_v9, %v4120_v19  ;;  %4733 = vmatprep.subr.bf16.mxu1 %v5016_v53 }
 0x1bc   : > { %v4645_v29 = vpop.f32.mrb[32].mxu0  ;;  %v5734_v31 = vsel %vm1084_vm0, %v1108_v13, %v1110_v20  ;;  %4734 = vmatpush3.bf16.msra.mxu1 %v5016_v53  ;;  %vm541_vm1 = vcmp.ne.s32.totalorder %v5747_v15, 0  ;;  %v1144_v53 = vsel %vm1084_vm0, 0.0, %v1085_v34 }
 0x1bd   : > { %v1114_v33 = vrot.slane %v1045_v26, 7  ;;  %v5737_v27 = vsel %vm1084_vm0, %v1110_v20, %v1112_v22  ;;  %v4121_v30 = vpop.f32.mrb[32].mxu1  ;;  %v1049_v36 = vpop.f32.mrb[33].mxu0 }
 0x1be   : > { %v4122_v39 = vpop.f32.mrb[33].mxu1  ;;  %v4646_v41 = vpop.f32.mrb[34].mxu0 }
 0x1bf   : > { %v4123_v37 = vadd.f32 %v4122_v39, %v4121_v30  ;;  %v4124_v47 = vpop.f32.mrb[34].mxu1  ;;  %v1052_v48 = vpop.f32.mrb[35].mxu0  ;;  %v5740_v50 = vsel %vm1084_vm0, %v1112_v22, %v1114_v33  ;;  %v5018_v30 = vld [vmem:[#allocation7 + $0x100] sm:$0xff]  }
 0x1c0   : > { %v4125_v51 = vpop.f32.mrb[35].mxu1  ;;  %4419 = vmatprep.subr.bf16.mxu1 %v5018_v30 }
 0x1c1   : > { %v1050_v55 = vadd.f32 %v4123_v37, %v1049_v36  ;;  %v4126_v25 = vadd.f32 %v4125_v51, %v4124_v47 }
 0x1c3   : > { %v1116_v35 = vrot.slane %v1050_v55, 7  ;;  %v1053_v2 = vadd.f32 %v4126_v25, %v1052_v48  ;;  %v6544_v48 = vmov 0.0  }
 0x1c4   : > { %v4167_v4 = vpop.f32.mrb[36].mxu0  ;;  %v5755_v51 = vsel %vm541_vm1, 1.0, %v6544_v48 }
 0x1c5   : > { %v5743_v7 = vsel %vm1084_vm0, %v1114_v33, %v1116_v35  ;;  %v1118_v8 = vrot.slane %v1053_v2, 7  ;;  %v4127_v9 = vpop.f32.mrb[36].mxu1  ;;  %v4168_v6 = vpop.f32.mrb[37].mxu0  ;;  %v1147_v17 = vmul.f32 %v5755_v51, %v5697_v45 }
 0x1c6   : > { %v4128_v12 = vpop.f32.mrb[37].mxu1  ;;  %v4169_v13 = vadd.f32 %v4168_v6, %v4167_v4  ;;  %v4170_v14 = vpop.f32.mrb[38].mxu0 }
 0x1c7   : > { %v4129_v18 = vadd.f32 %v4128_v12, %v4127_v9  ;;  %v4130_v19 = vpop.f32.mrb[38].mxu1  ;;  %v4171_v20 = vpop.f32.mrb[39].mxu0  ;;  %v5750_v22 = vsel %vm1084_vm0, %v1116_v35, %v1118_v8 }
 0x1c8   : > { %v4131_v26 = vpop.f32.mrb[39].mxu1  ;;  %v4172_v33 = vadd.f32 %v4171_v20, %v4170_v14 }
 0x1c9   : > { %v1058_v36 = vadd.f32 %v4645_v29, %v4129_v18  ;;  %v4132_v39 = vadd.f32 %v4131_v26, %v4130_v19 }
 0x1cb   : > { %v1120_v37 = vrot.slane %v1058_v36, 7  ;;  %v1061_v47 = vadd.f32 %v4646_v41, %v4132_v39  ;;  %v1145_v41 = vmul.f32 %v5755_v51, %v1144_v53 }
 0x1cc   : > { %v4173_v55 = vpop.f32.mrb[40].mxu0 }
 0x1cd   : > { %v1122_v25 = vrot.slane %v1061_v47, 7  ;;  %v4665_v61 = vpop.f32.mrb[40].mxu1  ;;  %v4174_v35 = vpop.f32.mrb[41].mxu0  ;;  %v5761_v2 = vsel %vm1084_vm0, %v1118_v8, %v1120_v37 }
 0x1ce   : > { %v4175_v29 = vadd.f32 %v4174_v35, %v4173_v55  ;;  %v1525_v4 = vpop.f32.mrb[41].mxu1  ;;  %v4176_v9 = vpop.f32.mrb[42].mxu0 }
 0x1cf   : > { %v1526_v6 = vadd.f32 %v4169_v13, %v1525_v4  ;;  %v4666_v12 = vpop.f32.mrb[42].mxu1  ;;  %v4177_v14 = vpop.f32.mrb[43].mxu0  ;;  %v5765_v18 = vsel %vm1084_vm0, %v1120_v37, %v1122_v25 }
 0x1d0   : > { %v1534_v34 = vadd.f32 %v4665_v61, %v4175_v29  ;;  %v4178_v19 = vadd.f32 %v4177_v14, %v4176_v9  ;;  %v1528_v20 = vpop.f32.mrb[43].mxu1 }
 0x1d1   : > { %v5769_v26 = vadd.f32 %v1526_v6, %v1145_v41  ;;  %v1529_v8 = vadd.f32 %v4172_v33, %v1528_v20  ;;  %v1149_v33 = vmul.f32 %v5755_v51, %v5707_v57 }
 0x1d2   : > { %v5771_v30 = vadd.f32 %v1534_v34, %v1147_v17  ;;  %v1537_v36 = vadd.f32 %v4666_v12, %v4178_v19 }
 0x1d3   : > { %v5774_v39 = vadd.f32 %v1529_v8, %v5702_v46 }
 0x1d4   : > { %v5777_v13 = vadd.f32 %v1537_v36, %v5694_v43  ;;  %v4179_v37 = vpop.f32.mrb[44].mxu0  ;;  %v1151_v36 = vmul.f32 %v5755_v51, %v5713_v16  ;;  %v1153_v16 = vmul.f32 %v5755_v51, %v5719_v58 }
 0x1d5   : > { %v4180_v47 = vpop.f32.mrb[45].mxu0  ;;  %v4669_v53 = vpop.f32.mrb[44].mxu1 }
 0x1d6   : > { %v4181_v55 = vadd.f32 %v4180_v47, %v4179_v37  ;;  %v4182_v45 = vpop.f32.mrb[46].mxu0  ;;  %v1541_v25 = vpop.f32.mrb[45].mxu1 }
 0x1d7   : > { %v4183_v61 = vpop.f32.mrb[47].mxu0  ;;  %v4670_v35 = vpop.f32.mrb[46].mxu1 }
 0x1d8   : > { %v4184_v29 = vadd.f32 %v4183_v61, %v4182_v45  ;;  %v1542_v4 = vadd.f32 %v4181_v55, %v1541_v25  ;;  %v1544_v9 = vpop.f32.mrb[47].mxu1 }
 0x1da   : > { %v5781_v41 = vadd.f32 %v1542_v4, %v1149_v33  ;;  %v1545_v46 = vadd.f32 %v4184_v29, %v1544_v9 }
 0x1dc   : > { %v5784_v43 = vadd.f32 %v1545_v46, %v5716_v60  ;;  %v4185_v6 = vpop.f32.mrb[48].mxu0 }
 0x1dd   : > { %v4186_v12 = vpop.f32.mrb[49].mxu0  ;;  %v4673_v14 = vpop.f32.mrb[48].mxu1 }
 0x1de   : > { %v4187_v17 = vadd.f32 %v4186_v12, %v4185_v6  ;;  %v4188_v34 = vpop.f32.mrb[50].mxu0  ;;  %v1557_v19 = vpop.f32.mrb[49].mxu1 }
 0x1df   : > { %v4189_v20 = vpop.f32.mrb[51].mxu0  ;;  %v4674_v8 = vpop.f32.mrb[50].mxu1 }
 0x1e0   : > { %v1550_v57 = vadd.f32 %v4669_v53, %v4187_v17  ;;  %v4190_v37 = vadd.f32 %v4189_v20, %v4188_v34  ;;  %v1560_v47 = vpop.f32.mrb[51].mxu1 }
 0x1e2   : > { %v5788_v55 = vadd.f32 %v1550_v57, %v1151_v36  ;;  %v1553_v45 = vadd.f32 %v4670_v35, %v4190_v37 }
 0x1e4   : > { %v5791_v60 = vadd.f32 %v1553_v45, %v5710_v11  ;;  %v4191_v25 = vpop.f32.mrb[52].mxu0 }
 0x1e5   : > { %v4192_v61 = vpop.f32.mrb[53].mxu0  ;;  %v4677_v29 = vpop.f32.mrb[52].mxu1 }
 0x1e6   : > { %v4193_v33 = vadd.f32 %v4192_v61, %v4191_v25  ;;  %v4194_v4 = vpop.f32.mrb[54].mxu0  ;;  %v1573_v9 = vpop.f32.mrb[53].mxu1 }
 0x1e7   : > { %v4195_v46 = vpop.f32.mrb[55].mxu0  ;;  %v5793_v6 = vpop.f32.mrb[54].mxu1 }
 0x1e8   : > { %v4196_v12 = vadd.f32 %v4195_v46, %v4194_v4  ;;  %v1558_v53 = vadd.f32 %v4193_v33, %v1557_v19  ;;  %v1576_v17 = vpop.f32.mrb[55].mxu1  ;;  %v1155_v19 = vmul.f32 %v5755_v51, %v5725_v63 }
 0x1ea   : > { %v5797_v35 = vadd.f32 %v1558_v53, %v1153_v16  ;;  %v1561_v11 = vadd.f32 %v4196_v12, %v1560_v47 }
 0x1ec   : > { %v5800_v34 = vadd.f32 %v1561_v11, %v5728_v0  ;;  %v4197_v20 = vpop.f32.mrb[56].mxu0 }
 0x1ed   : > { %v4198_v36 = vpop.f32.mrb[57].mxu0  ;;  %v5802_v57 = vpop.f32.mrb[56].mxu1 }
 0x1ee   : > { %v4199_v37 = vadd.f32 %v4198_v36, %v4197_v20  ;;  %v4200_v45 = vpop.f32.mrb[58].mxu0  ;;  %v5804_v25 = vpop.f32.mrb[57].mxu1 }
 0x1ef   : > { %v4201_v61 = vpop.f32.mrb[59].mxu0  ;;  %v5806_v58 = vpop.f32.mrb[58].mxu1 }
 0x1f0   : > { %v1566_v33 = vadd.f32 %v4673_v14, %v4199_v37  ;;  %v4202_v47 = vadd.f32 %v4201_v61, %v4200_v45  ;;  %v5810_v4 = vpop.f32.mrb[59].mxu1 }
 0x1f2   : > { %v5813_v0 = vadd.f32 %v1566_v33, %v1155_v19  ;;  %v1569_v46 = vadd.f32 %v4674_v8, %v4202_v47  ;;  %v1157_v8 = vmul.f32 %v5755_v51, %v5731_v21 }
 0x1f4   : > { %v5817_v12 = vadd.f32 %v1569_v46, %v5722_v59  ;;  %v4203_v16 = vpop.f32.mrb[60].mxu0 }
 0x1f5   : > { %v4204_v53 = vpop.f32.mrb[61].mxu0  ;;  %v4261_v11 = vpop.f32.mrb[60].mxu1 }
 0x1f6   : > { %v4205_v20 = vadd.f32 %v4204_v53, %v4203_v16  ;;  %v4206_v36 = vpop.f32.mrb[62].mxu0  ;;  %v4262_v48 = vpop.f32.mrb[61].mxu1 }
 0x1f7   : > { %v4207_v63 = vpop.f32.mrb[63].mxu0  ;;  %v5819_v14 = vadd.f32 %v4262_v48, %v4261_v11  ;;  %v4264_v37 = vpop.f32.mrb[62].mxu1 }
 0x1f8   : > { %v4208_v45 = vadd.f32 %v4207_v63, %v4206_v36  ;;  %v1574_v61 = vadd.f32 %v4205_v20, %v1573_v9  ;;  %v4265_v19 = vpop.f32.mrb[63].mxu1 }
 0x1f9   : > { %v5824_v59 = vadd.f32 %v4265_v19, %v4264_v37  ;;  %v1159_v37 = vmul.f32 %v5755_v51, %v5737_v27 }
 0x1fa   : > { %v5826_v33 = vadd.f32 %v1574_v61, %v1157_v8  ;;  %v1577_v47 = vadd.f32 %v4208_v45, %v1576_v17 }
 0x1fc   : > { %v5829_v46 = vadd.f32 %v1577_v47, %v5734_v31  ;;  %v4209_v16 = vpop.f32.mrb[64].mxu0 }
 0x1fd   : > { %v4210_v48 = vpop.f32.mrb[65].mxu0  ;;  %v4267_v53 = vpop.f32.mrb[64].mxu1 }
 0x1fe   : > { %v4211_v11 = vadd.f32 %v4210_v48, %v4209_v16  ;;  %v4212_v36 = vpop.f32.mrb[66].mxu0  ;;  %v4268_v63 = vpop.f32.mrb[65].mxu1 }
 0x1ff   : > { %v4213_v21 = vpop.f32.mrb[67].mxu0  ;;  %v5831_v9 = vadd.f32 %v4268_v63, %v4267_v53  ;;  %v4270_v20 = vpop.f32.mrb[66].mxu1 }
 0x200   : > { %v1582_v8 = vadd.f32 %v4677_v29, %v4211_v11  ;;  %v4214_v61 = vadd.f32 %v4213_v21, %v4212_v36  ;;  %v4271_v17 = vpop.f32.mrb[67].mxu1 }
 0x201   : > { %v5835_v31 = vadd.f32 %v4271_v17, %v4270_v20  ;;  %v1161_v20 = vmul.f32 %v5755_v51, %v5743_v7 }
 0x202   : > { %v5837_v45 = vadd.f32 %v1582_v8, %v1159_v37  ;;  %v1585_v19 = vadd.f32 %v5793_v6, %v4214_v61 }
 0x204   : > { %v5841_v47 = vadd.f32 %v1585_v19, %v5740_v50  ;;  %v4215_v16 = vpop.f32.mrb[68].mxu0  ;;  %v5853_v19 = vstv %s3867_s6  ;;  %s5185_s6 = scalar_lea.vmem %s5184_s15, 4096 }
 0x205   : > { %v4216_v48 = vpop.f32.mrb[69].mxu0  ;;  %v4273_v53 = vpop.f32.mrb[68].mxu1  ;;  %vm573_vm2 = vcmp.ge.s32.totalorder %v5853_v19, 0  ;;  %vm583_vm3 = vcmp.lt.s32.totalorder %v5853_v19, 16  ;;  %p5187_p4 = scmp.lt.s32.totalorder %s5185_s6, %s5179_s27 }
 0x206   : > { %v4217_v63 = vadd.f32 %v4216_v48, %v4215_v16  ;;  %v4218_v27 = vpop.f32.mrb[70].mxu0  ;;  %v4274_v29 = vpop.f32.mrb[69].mxu1  ;;  %vm5887_vm8 = vmand %vm573_vm2, %vm583_vm3 }
 0x207   : > { %v4219_v11 = vpop.f32.mrb[71].mxu0  ;;  %v5843_v36 = vadd.f32 %v4274_v29, %v4273_v53  ;;  %v4276_v21 = vpop.f32.mrb[70].mxu1  ;;  %v556_v53 = vadd.s32 3, %v5853_v19  ;;  %p5188_p9 = por %p5187_p4, %p5186_p2 }
 0x208   : > { %v1590_v37 = vadd.f32 %v4217_v63, %v5804_v25  ;;  %v4220_v6 = vadd.f32 %v4219_v11, %v4218_v27  ;;  %v4277_v50 = vpop.f32.mrb[71].mxu1  ;;  %v555_v11 = vadd.s32 2, %v5853_v19 }
 0x209   : > { %v5848_v8 = vadd.f32 %v4277_v50, %v4276_v21  ;;  %v3870_v3 = vadd.s32 4294967295, %v556_v53  ;;  %v557_v53 = vadd.s32 4, %v5853_v19  ;;  %p5189_p13 = pnand %p5188_p9, %p5182_p1 }
 0x20a   : > { %v5850_v61 = vadd.f32 %v1590_v37, %v1161_v20  ;;  %v1593_v17 = vadd.f32 %v4220_v6, %v5810_v4  ;;  %v3868_v20 = vadd.s32 4294967295, %v5853_v19 }
 0x20b   : > { %vm575_vm6 = vcmp.ge.s32.totalorder %v3870_v3, 0  ;;  %vm585_vm7 = vcmp.lt.s32.totalorder %v3870_v3, 16  ;;  %v5919_v3 = vsel %vm5887_vm8, 1.0, %v6579_v56 }
 0x20c   : > { %v5856_v16 = vadd.f32 %v1593_v17, %v5750_v22  ;;  %v4221_v48 = vpop.f32.mrb[72].mxu0  ;;  %v1163_v22 = vmul.f32 %v5755_v51, %v5761_v2  ;;  %v3869_v2 = vadd.s32 4294967295, %v555_v11  ;;  %vm572_vm4 = vcmp.ge.s32.totalorder %v3868_v20, 0  ;;  %vm5905_vm13 = vmand %vm575_vm6, %vm585_vm7 }
 0x20d   : > { %v4222_v7 = vpop.f32.mrb[73].mxu0  ;;  %v4279_v29 = vpop.f32.mrb[72].mxu1  ;;  %vm582_vm5 = vcmp.lt.s32.totalorder %v3868_v20, 16 }
 0x20e   : > { %v4223_v25 = vadd.f32 %v4222_v7, %v4221_v48  ;;  %v4224_v63 = vpop.f32.mrb[74].mxu0  ;;  %v4280_v27 = vpop.f32.mrb[73].mxu1  ;;  %v2166_v48 = vsub.s32 0, %v5747_v15  ;;  %v540_v7 = vadd.s32 8, %v5747_v15  ;;  %vm5896_vm10 = vmand %vm572_vm4, %vm582_vm5  ;;  %vm574_vm11 = vcmp.ge.s32.totalorder %v3869_v2, 0 }
 0x20f   : > { %v4225_v21 = vpop.f32.mrb[75].mxu0  ;;  %v5861_v37 = vadd.f32 %v4280_v27, %v4279_v29  ;;  %v4282_v4 = vpop.f32.mrb[74].mxu1  ;;  %vm584_vm12 = vcmp.lt.s32.totalorder %v3869_v2, 16 }
 0x210   : > { %v1598_v6 = vadd.f32 %v5802_v57, %v4223_v25  ;;  %v4226_v50 = vadd.f32 %v4225_v21, %v4224_v63  ;;  %v4283_v17 = vpop.f32.mrb[75].mxu1  ;;  %v558_v57 = vadd.s32 5, %v5853_v19  ;;  %v2190_v25 = vsub.s32 1, %v5747_v15  ;;  %vm594_vm15 = vmand %vm574_vm11, %vm584_vm12 }
 0x211   : > { %v5869_v62 = vadd.f32 %v4283_v17, %v4282_v4  ;;  %vm548_vm9 = vcmp.ne.s32.totalorder %v540_v7, 15 }
 0x212   : > { %v5871_v5 = vadd.f32 %v1598_v6, %v1163_v22  ;;  %v1601_v29 = vadd.f32 %v5806_v58, %v4226_v50  ;;  %v300_v58 = vld [vmem:[%s6538_s4] sm:$0xff]  ;;  %v3872_v20 = vadd.s32 4294967295, %v558_v57  ;;  %v5913_v49 = vsel %vm548_vm9, 1.0, %v6579_v56 }
 0x213   : > { %v5909_v54 = vrot.slane %v300_v58, %v2190_v25 }
 0x214   : > { %v5879_v63 = vadd.f32 %v1601_v29, %v5765_v18  ;;  %v4701_v27 = vpop.f32.mrb[76].mxu0  ;;  %v5891_v18 = vrot.slane %v300_v58, %v2166_v48  ;;  %vm577_vm1 = vcmp.ge.s32.totalorder %v3872_v20, 0  ;;  %vm587_vm2 = vcmp.lt.s32.totalorder %v3872_v20, 16 }
 0x215   : > { %v1973_v11 = vadd.f32 %v4701_v27, %v5831_v9  ;;  %v1964_v21 = vpop.f32.mrb[77].mxu0  ;;  %v4285_v22 = vpop.f32.mrb[76].mxu1  ;;  %v5943_v48 = vsel %vm594_vm15, 1.0, %v6579_v56  ;;  %vm5949_vm5 = vmand %vm577_vm1, %vm587_vm2 }
 0x216   : > { %v1965_v6 = vadd.f32 %v5819_v14, %v1964_v21  ;;  %v4702_v50 = vpop.f32.mrb[78].mxu0  ;;  %v4286_v9 = vpop.f32.mrb[77].mxu1  ;;  %v3871_v21 = vadd.s32 4294967295, %v557_v53  ;;  %v5926_v53 = vsel %vm5896_vm10, 1.0, %v6579_v56 }
 0x217   : > { %v1976_v29 = vadd.f32 %v4702_v50, %v5835_v31  ;;  %v1967_v27 = vpop.f32.mrb[79].mxu0  ;;  %v5901_v1 = vadd.f32 %v4286_v9, %v4285_v22  ;;  %v4288_v14 = vpop.f32.mrb[78].mxu1  ;;  %v2067_v50 = vrot.slane %v1973_v11, 1 }
 0x218   : > { %v1968_v31 = vadd.f32 %v5824_v59, %v1967_v27  ;;  %v4289_v22 = vpop.f32.mrb[79].mxu1  ;;  %v2064_v57 = vrot.slane %v1965_v6, 1  ;;  %v5931_v59 = vsel %vm5905_vm13, 1.0, %v6579_v56  ;;  %vm576_vm3 = vcmp.ge.s32.totalorder %v3871_v21, 0 }
 0x219   : > { %v2069_v9 = vrot.slane %v1976_v29, 1  ;;  %v5921_v52 = vadd.f32 %v4289_v22, %v4288_v14  ;;  %vm586_vm4 = vcmp.lt.s32.totalorder %v3871_v21, 16  ;;  %v5968_v21 = vsel %vm5949_vm5, 1.0, %v6579_v56 }
 0x21a   : > { %v2065_v7 = vrot.slane %v1968_v31, 1  ;;  %vm596_vm6 = vmand %vm576_vm3, %vm586_vm4 }
 0x21b   : > { %v2070_v25 = vsel %vm2063_vm14, %v2067_v50, %v2069_v9 }
 0x21c   : > { %v2146_v58 = vadd.f32 %v2070_v25, %v5771_v30  ;;  %v2066_v11 = vsel %vm2063_vm14, %v2064_v57, %v2065_v7  ;;  %v2068_v4 = vsel %vm2063_vm14, %v2065_v7, %v2067_v50  ;;  %v4705_v6 = vpop.f32.mrb[80].mxu0 }
 0x21d   : > { %v2125_v17 = vmul.f32 %v5913_v49, %v2068_v4  ;;  %v2144_v29 = vadd.f32 %v2066_v11, %v5769_v26  ;;  %v1989_v2 = vadd.f32 %v4705_v6, %v5861_v37  ;;  %v1980_v27 = vpop.f32.mrb[81].mxu0  ;;  %v4291_v14 = vpop.f32.mrb[80].mxu1  ;;  %v560_v26 = vadd.s32 7, %v5853_v19 }
 0x21e   : > { %v2170_v31 = vmul.f32 %v5891_v18, %v2146_v58  ;;  %v1981_v30 = vadd.f32 %v5843_v36, %v1980_v27  ;;  %v4706_v22 = vpop.f32.mrb[82].mxu0  ;;  %v4292_v57 = vpop.f32.mrb[81].mxu1  ;;  %v559_v37 = vadd.s32 6, %v5853_v19 }
 0x21f   : > { %v2145_v7 = vadd.f32 %v2125_v17, %v5774_v39  ;;  %v2168_v25 = vmul.f32 %v5891_v18, %v2144_v29  ;;  %v2075_v11 = vrot.slane %v1989_v2, 1  ;;  %v1992_v58 = vadd.f32 %v4706_v22, %v5869_v62  ;;  %v1983_v36 = vpop.f32.mrb[83].mxu0  ;;  %v4294_v4 = vpop.f32.mrb[82].mxu1 }
 0x220   : > { %v2194_v20 = vadd.f32 %v5909_v54, %v2170_v31  ;;  %v2071_v6 = vrot.slane %v1981_v30, 1  ;;  %v1984_v27 = vadd.f32 %v5848_v8, %v1983_v36  ;;  %v4293_v42 = vadd.f32 %v4292_v57, %v4291_v14  ;;  %v4295_v44 = vpop.f32.mrb[83].mxu1 }
 0x221   : > { %v2169_v38 = vmul.f32 %v5891_v18, %v2145_v7  ;;  %v2192_v39 = vadd.f32 %v5909_v54, %v2168_v25  ;;  %v2077_v17 = vrot.slane %v1992_v58, 1  ;;  %v4296_v29 = vadd.f32 %v4295_v44, %v4294_v4 }
 0x222   : > { %v2072_v62 = vsel %vm2063_vm14, %v2069_v9, %v2071_v6  ;;  %v2073_v2 = vrot.slane %v1984_v27, 1  ;;  %v5971_v31 = vsel %vm596_vm6, 1.0, %v6579_v56  ;;  %v5975_v30 = vadd.s32 4294967295, %v560_v26 }
 0x223   : > { %v2127_v8 = vmul.f32 %v5913_v49, %v2072_v62  ;;  %v2078_v14 = vsel %vm2063_vm14, %v2075_v11, %v2077_v17  ;;  %v5977_v22 = vadd.s32 4294967295, %v559_v37  ;;  %v2214_v44 = vmax.f32 %v2194_v20, 0.0 }
 0x224   : > { %v2150_v9 = vadd.f32 %v2078_v14, %v5788_v55  ;;  %v2074_v57 = vsel %vm2063_vm14, %v2071_v6, %v2073_v2  ;;  %v2076_v50 = vsel %vm2063_vm14, %v2073_v2, %v2075_v11  ;;  %v4709_v7 = vpop.f32.mrb[84].mxu0  ;;  %v5983_v25 = vadd.f32 %v5909_v54, %v2169_v38 }
 0x225   : > { %v2212_v58 = vmax.f32 %v2192_v39, 0.0  ;;  %v2147_v36 = vadd.f32 %v2127_v8, %v5777_v13  ;;  %v2129_v4 = vmul.f32 %v5913_v49, %v2076_v50  ;;  %v1996_v26 = vpop.f32.mrb[85].mxu0  ;;  %v4297_v27 = vpop.f32.mrb[84].mxu1  ;;  %v2148_v20 = vadd.f32 %v2074_v57, %v5781_v41 }
 0x226   : > { %v2174_v37 = vmul.f32 %v5891_v18, %v2150_v9  ;;  %v2005_v55 = vadd.f32 %v4709_v7, %v4293_v42  ;;  %v1997_v6 = vadd.f32 %v5901_v1, %v1996_v26  ;;  %v4710_v62 = vpop.f32.mrb[86].mxu0  ;;  %v4298_v11 = vpop.f32.mrb[85].mxu1  ;;  %v2234_v50 = vmul.f32 %v5919_v3, %v2214_v44 }
 0x227   : > { %v2171_v2 = vmul.f32 %v5891_v18, %v2147_v36  ;;  %v2149_v38 = vadd.f32 %v2129_v4, %v5784_v43  ;;  %v5992_v39 = vadd.f32 %v4710_v62, %v4296_v29  ;;  %v1999_v13 = vpop.f32.mrb[87].mxu0  ;;  %v4299_v8 = vadd.f32 %v4298_v11, %v4297_v27  ;;  %v4300_v14 = vpop.f32.mrb[86].mxu1 }
 0x228   : > { %v2172_v9 = vmul.f32 %v5891_v18, %v2148_v20  ;;  %v2083_v40 = vrot.slane %v2005_v55, 1  ;;  %v2079_v41 = vrot.slane %v1997_v6, 1  ;;  %v4301_v42 = vpop.f32.mrb[87].mxu1  ;;  %v2000_v43 = vadd.f32 %v5921_v52, %v1999_v13 }
 0x229   : > { %v2195_v1 = vadd.f32 %v5909_v54, %v2171_v2  ;;  %v2173_v57 = vmul.f32 %v5891_v18, %v2149_v38  ;;  %v2085_v7 = vrot.slane %v5992_v39, 1  ;;  %v2198_v29 = vadd.f32 %v5909_v54, %v2174_v37 }
 0x22a   : > { %v2196_v36 = vadd.f32 %v5909_v54, %v2172_v9  ;;  %v2080_v4 = vsel %vm2063_vm14, %v2077_v17, %v2079_v41  ;;  %v4302_v44 = vadd.f32 %v4301_v42, %v4300_v14  ;;  %v2213_v6 = vmax.f32 %v5983_v25, 0.0 }
 0x22b   : > { %v2215_v26 = vmax.f32 %v2195_v1, 0.0  ;;  %v2197_v27 = vadd.f32 %v5909_v54, %v2173_v57  ;;  %v2131_v20 = vmul.f32 %v5913_v49, %v2080_v4  ;;  %v2086_v55 = vsel %vm2063_vm14, %v2083_v40, %v2085_v7 }
 0x22c   : > { %v2216_v62 = vmax.f32 %v2196_v36, 0.0  ;;  %v2154_v11 = vadd.f32 %v2086_v55, %v5813_v0  ;;  %v2081_v52 = vrot.slane %v2000_v43, 1  ;;  %v4713_v2 = vpop.f32.mrb[88].mxu0  ;;  %v2232_v37 = vmul.f32 %v5926_v53, %v2212_v58 }
 0x22d   : > { %v2235_v38 = vmul.f32 %v5919_v3, %v2215_v26  ;;  %v2217_v17 = vmax.f32 %v2197_v27, 0.0  ;;  %v2151_v39 = vadd.f32 %v2131_v20, %v5791_v60  ;;  %v4303_v13 = vpop.f32.mrb[88].mxu1  ;;  %v2012_v14 = vpop.f32.mrb[89].mxu0  ;;  %v2218_v9 = vmax.f32 %v2198_v29, 0.0 }
 0x22e   : > { %v2236_v42 = vmul.f32 %v5943_v48, %v2216_v62  ;;  %v2082_v1 = vsel %vm2063_vm14, %v2079_v41, %v2081_v52  ;;  %v2084_v25 = vsel %vm2063_vm14, %v2081_v52, %v2083_v40  ;;  %v4304_v57 = vpop.f32.mrb[89].mxu1  ;;  %v4714_v0 = vpop.f32.mrb[90].mxu0  ;;  %v2013_v27 = vadd.f32 %v4299_v8, %v2012_v14 }
 0x22f   : > { %v6014_v43 = vpack.c.bf16 %v2235_v38, %v2234_v50  ;;  %v2237_v58 = vmul.f32 %v5943_v48, %v2217_v17  ;;  %v2175_v3 = vmul.f32 %v5891_v18, %v2151_v39  ;;  %v2133_v36 = vmul.f32 %v5913_v49, %v2084_v25  ;;  %v4306_v60 = vpop.f32.mrb[90].mxu1  ;;  %v2015_v4 = vpop.f32.mrb[91].mxu0 }
 0x230   : > { %v2152_v29 = vadd.f32 %v2082_v1, %v5797_v35  ;;  %v4305_v26 = vadd.f32 %v4304_v57, %v4303_v13  ;;  %v4307_v20 = vpop.f32.mrb[91].mxu1  ;;  %v2233_v41 = vmul.f32 %v5926_v53, %v2213_v6  ;;  %v2178_v62 = vmul.f32 %v5891_v18, %v2154_v11 }
 0x231   : > { %v6021_v40 = vpack.c.bf16 %v2237_v58, %v2236_v42  ;;  %v2199_v50 = vadd.f32 %v5909_v54, %v2175_v3  ;;  %v2153_v55 = vadd.f32 %v2133_v36, %v5800_v34  ;;  %v4308_v48 = vadd.f32 %v4307_v20, %v4306_v60  ;;  %2486 = vmatprep.mubr.bf16.mxu0 %v6014_v43  ;;  %v5017_v20 = vld [vmem:[#allocation7 + $0x148] sm:$0xff]  }
 0x232   : > { %v2176_v52 = vmul.f32 %v5891_v18, %v2152_v29  ;;  %v2021_v38 = vadd.f32 %v4713_v2, %v4305_v26  ;;  %v2087_v35 = vrot.slane %v2013_v27, 1  ;;  %vm578_vm7 = vcmp.ge.s32.totalorder %v5977_v22, 0 }
 0x233   : > { %v2219_v8 = vmax.f32 %v2199_v50, 0.0  ;;  %v2177_v53 = vmul.f32 %v5891_v18, %v2153_v55  ;;  %v6030_v6 = vadd.f32 %v4714_v0, %v4308_v48  ;;  %v2016_v17 = vadd.f32 %v4302_v44, %v2015_v4  ;;  %4735 = vmatprep.mubr.bf16.mxu1 %v6021_v40 }
 0x234   : > { %v2238_v34 = vmul.f32 %v5931_v59, %v2218_v9  ;;  %v2200_v39 = vadd.f32 %v5909_v54, %v2176_v52  ;;  %v2091_v13 = vrot.slane %v2021_v38, 1  ;;  %v2088_v11 = vsel %vm2063_vm14, %v2085_v7, %v2087_v35  ;;  %v6036_v14 = vpop.f32.mrb[92].mxu0 }
 0x235   : > { %v2239_v2 = vmul.f32 %v5931_v59, %v2219_v8  ;;  %v2201_v42 = vadd.f32 %v5909_v54, %v2177_v53  ;;  %v2135_v1 = vmul.f32 %v5913_v49, %v2088_v11  ;;  %v2093_v25 = vrot.slane %v6030_v6, 1  ;;  %v4309_v44 = vpop.f32.mrb[92].mxu1  ;;  %v2028_v57 = vpop.f32.mrb[93].mxu0  ;;  %v5020_v53 = vld [vmem:[#allocation7 + $0x108] sm:$0xff]  }
 0x236   : > { %v2202_v0 = vadd.f32 %v5909_v54, %v2178_v62  ;;  %v2220_v9 = vmax.f32 %v2200_v39, 0.0  ;;  %v2089_v58 = vrot.slane %v2016_v17, 1  ;;  %v6043_v3 = vpack.c.bf16 %v2233_v41, %v2232_v37  ;;  %v4310_v36 = vpop.f32.mrb[93].mxu1  ;;  %v6045_v7 = vpop.f32.mrb[94].mxu0  ;;  %v5019_v62 = vld [vmem:[#allocation7 + $0xc0] sm:$0xff]  }
 0x237   : > { %v6047_v60 = vpack.c.bf16 %v2239_v2, %v2238_v34  ;;  %v2221_v59 = vmax.f32 %v2201_v42, 0.0  ;;  %v2155_v4 = vadd.f32 %v2135_v1, %v5817_v12  ;;  %v2094_v29 = vsel %vm2063_vm14, %v2091_v13, %v2093_v25  ;;  %v4312_v26 = vpop.f32.mrb[94].mxu1  ;;  %v2031_v27 = vpop.f32.mrb[95].mxu0 }
 0x238   : > { %v2240_v50 = vmul.f32 %v5971_v31, %v2220_v9  ;;  %v2158_v37 = vadd.f32 %v2094_v29, %v5837_v45  ;;  %v2090_v41 = vsel %vm2063_vm14, %v2087_v35, %v2089_v58  ;;  %v2092_v55 = vsel %vm2063_vm14, %v2089_v58, %v2091_v13  ;;  %2487 = vmatmul.mubr.bf16.vlgmr.msra.gmra.mrb[96].mxu0 %v6043_v3  ;;  %v4313_v48 = vpop.f32.mrb[95].mxu1  ;;  %v5022_v13 = vld [vmem:[#allocation7 + $0x150] sm:$0xff]  }
 0x239   : > { %v2241_v12 = vmul.f32 %v5971_v31, %v2221_v59  ;;  %v2179_v52 = vmul.f32 %v5891_v18, %v2155_v4  ;;  %v2137_v38 = vmul.f32 %v5913_v49, %v2092_v55  ;;  %v2156_v8 = vadd.f32 %v2090_v41, %v5826_v33  ;;  %2494 = vmatprep.mubr.bf16.mxu0 %v6021_v40  ;;  %v5023_v9 = vld [vmem:[#allocation7 + $0x110] sm:$0xff]   ;;  %v5027_v55 = vld [vmem:[#allocation7 + $0x158] sm:$0xff]  }
 0x23a   : > { %v2222_v45 = vmax.f32 %v2202_v0, 0.0  ;;  %vm588_vm8 = vcmp.lt.s32.totalorder %v5977_v22, 16  ;;  %4752 = vmatpush3.bf16.msra.mxu0 %v5745_v10  ;;  %v4311_v35 = vadd.f32 %v4310_v36, %v4309_v44  ;;  %v4314_v17 = vadd.f32 %v4313_v48, %v4312_v26  ;;  %4736 = vmatmul.mubr.bf16.vlgmr.msra.gmra.mrb[100].mxu1 %v6047_v60  ;;  %v5021_v10 = vld [vmem:[#allocation7 + $0xc8] sm:$0xff]  }
 0x23b   : > { %v6066_v34 = vpack.c.bf16 %v2241_v12, %v2240_v50  ;;  %v2203_v31 = vadd.f32 %v5909_v54, %v2179_v52  ;;  %v2157_v39 = vadd.f32 %v2137_v38, %v5829_v46  ;;  %v2180_v33 = vmul.f32 %v5891_v18, %v2156_v8  ;;  %4753 = vmatprep.subr.bf16.mxu0 %v5017_v20  ;;  %vm6078_vm10 = vmand %vm578_vm7, %vm588_vm8  ;;  %v5025_v8 = vld [vmem:[#allocation7 + $0x118] sm:$0xff]  }
 0x23c   : > { %vm579_vm9 = vcmp.ge.s32.totalorder %v5975_v30, 0  ;;  %v2029_v11 = vadd.f32 %v4311_v35, %v2028_v57  ;;  %v6072_v2 = vadd.f32 %v4314_v17, %v2031_v27  ;;  %4420 = vmatpush3.bf16.msra.mxu1 %v5019_v62  ;;  %v561_v0 = vadd.s32 8, %v5853_v19  ;;  %v5024_v62 = vld [vmem:[#allocation7 + $0xd0] sm:$0xff]  }
 0x23d   : > { %v2223_v42 = vmax.f32 %v2203_v31, 0.0  ;;  %v2181_v46 = vmul.f32 %v5891_v18, %v2157_v39  ;;  %v2204_v44 = vadd.f32 %v5909_v54, %v2180_v33  ;;  %4739 = vmatprep.mubr.bf16.mxu1 %v6066_v34  ;;  %v4315_v57 = vpop.f32.mrb[96].mxu1  ;;  %4421 = vmatprep.subr.bf16.mxu1 %v5020_v53  ;;  %v2242_v58 = vmul.f32 %v5968_v21, %v2222_v45 }
 0x23e   : > { %v2182_v36 = vmul.f32 %v5891_v18, %v2158_v37  ;;  %v2095_v22 = vrot.slane %v2029_v11, 1  ;;  %v2097_v59 = vrot.slane %v6072_v2, 1  ;;  %4754 = vmatpush3.bf16.msra.mxu0 %v5017_v20  ;;  %v4316_v4 = vpop.f32.mrb[97].mxu1  ;;  %vm589_vm11 = vcmp.lt.s32.totalorder %v5975_v30, 16  ;;  %v5032_v11 = vld [vmem:[#allocation7 + $0x160] sm:$0xff]  }
 0x23f   : > { %v2243_v29 = vmul.f32 %v5968_v21, %v2223_v42  ;;  %v2205_v26 = vadd.f32 %v5909_v54, %v2181_v46  ;;  %v2224_v27 = vmax.f32 %v2204_v44, 0.0  ;;  %v4317_v50 = vadd.f32 %v4316_v4, %v4315_v57  ;;  %v4318_v41 = vpop.f32.mrb[98].mxu1  ;;  %4755 = vmatprep.subr.bf16.mxu0 %v5022_v13  ;;  %vm599_vm12 = vmand %vm579_vm9, %vm589_vm11  ;;  %v5037_v57 = vld [vmem:[#allocation7 + $0x168] sm:$0xff]  }
 0x240   : > { %v3883_v37 = vsel %vm6078_vm10, 1.0, %v6579_v56  ;;  %v2096_v20 = vsel %vm2063_vm14, %v2093_v25, %v2095_v22  ;;  %v2098_v48 = vsel %vm2063_vm14, %v2095_v22, %v2097_v59  ;;  %2495 = vmatmul.mubr.bf16.gmra.mrb[100].mxu0 %v6014_v43  ;;  %v4319_v21 = vpop.f32.mrb[99].mxu1  ;;  %4422 = vmatpush3.bf16.msra.mxu1 %v5021_v10  ;;  %v562_v6 = vadd.s32 9, %v5853_v19  ;;  %v5028_v10 = vld [vmem:[#allocation7 + $0x120] sm:$0xff]  }
 0x241   : > { %v6100_v12 = vpack.c.bf16 %v2243_v29, %v2242_v58  ;;  %v2225_v52 = vmax.f32 %v2205_v26, 0.0  ;;  %v2139_v38 = vmul.f32 %v5913_v49, %v2096_v20  ;;  %2502 = vmatprep.mubr.bf16.mxu0 %v6047_v60  ;;  %4423 = vmatprep.subr.bf16.mxu1 %v5023_v9  ;;  %v2206_v25 = vadd.f32 %v5909_v54, %v2182_v36  ;;  %v5029_v22 = vld [vmem:[#allocation7 + $0xe0] sm:$0xff]   ;;  %v5038_v20 = vld [vmem:[#allocation7 + $0x170] sm:$0xff]  }
 0x242   : > { %v2160_v53 = vadd.f32 %v2098_v48, %v5850_v61  ;;  %v2037_v45 = vadd.f32 %v6036_v14, %v4317_v50  ;;  %v4320_v35 = vadd.f32 %v4319_v21, %v4318_v41  ;;  %4756 = vmatpush3.bf16.msra.mxu0 %v5022_v13  ;;  %v2244_v17 = vmul.f32 %v3883_v37, %v2224_v27  ;;  %v5026_v13 = vld [vmem:[#allocation7 + $0xd8] sm:$0xff]   ;;  %v5030_v27 = vld [vmem:[#allocation7 + $0x128] sm:$0xff]  }
 0x243   : > { %v2245_v31 = vmul.f32 %v3883_v37, %v2225_v52  ;;  %v2159_v39 = vadd.f32 %v2139_v38, %v5841_v47  ;;  %v3875_v33 = vadd.s32 4294967295, %v561_v0  ;;  %4740 = vmatmul.mubr.bf16.gmra.mrb[104].mxu1 %v6100_v12  ;;  %4757 = vmatprep.subr.bf16.mxu0 %v5027_v55  ;;  %v2226_v42 = vmax.f32 %v2206_v25, 0.0  ;;  %v5031_v21 = vld [vmem:[#allocation7 + $0xe8] sm:$0xff]  }
 0x244   : > { %v2184_v61 = vmul.f32 %v5891_v18, %v2160_v53  ;;  %v2099_v19 = vrot.slane %v2037_v45, 1  ;;  %v2040_v14 = vadd.f32 %v6045_v7, %v4320_v35  ;;  %4424 = vmatpush3.bf16.msra.mxu1 %v5024_v62  ;;  %v3876_v30 = vadd.s32 4294967295, %v562_v6 }
 0x245   : > { %v6116_v2 = vpack.c.bf16 %v2245_v31, %v2244_v17  ;;  %v2183_v47 = vmul.f32 %v5891_v18, %v2159_v39  ;;  %4425 = vmatprep.subr.bf16.mxu1 %v5025_v8  ;;  %v3884_v44 = vsel %vm599_vm12, 1.0, %v6579_v56  ;;  %vm580_vm13 = vcmp.ge.s32.totalorder %v3875_v33, 0  ;;  %v5034_v17 = vld [vmem:[#allocation7 + $0xf0] sm:$0xff]  }
 0x246   : > { %v2100_v1 = vsel %vm2063_vm14, %v2097_v59, %v2099_v19  ;;  %v2101_v46 = vrot.slane %v2040_v14, 1  ;;  %4758 = vmatpush3.bf16.msra.mxu0 %v5027_v55  ;;  %vm590_vm15 = vcmp.lt.s32.totalorder %v3875_v33, 16  ;;  %v2208_v9 = vadd.f32 %v5909_v54, %v2184_v61  ;;  %v5040_v14 = vld [vmem:[#allocation7 + $0x1c0] sm:$0xff]   ;;  %v5059_v55 = vld [vmem:[#allocation7 + $0x1f8] sm:$0xff]  }
 0x247   : > { %v2207_v0 = vadd.f32 %v5909_v54, %v2183_v47  ;;  %v2141_v7 = vmul.f32 %v5913_v49, %v2100_v1  ;;  %4743 = vmatprep.mubr.bf16.mxu1 %v6116_v2  ;;  %4759 = vmatprep.subr.bf16.mxu0 %v5032_v11  ;;  %v2246_v50 = vmul.f32 %v3884_v44, %v2226_v42  ;;  %vm581_vm1 = vcmp.ge.s32.totalorder %v3876_v30, 0  ;;  %vm6134_vm3 = vmand %vm580_vm13, %vm590_vm15  ;;  %v5042_v47 = vld [vmem:[#allocation7 + $0x200] sm:$0xff]   ;;  %v5052_v42 = vld [vmem:[#allocation7 + $0x210] sm:$0xff]  }
 0x248   : > { %v2102_v58 = vsel %vm2063_vm14, %v2099_v19, %v2101_v46  ;;  %v2123_v36 = vsel %vm2063_vm14, %v2101_v46, 0.0  ;;  %2503 = vmatmul.mubr.bf16.gmra.mrb[104].mxu0 %v6021_v40  ;;  %4426 = vmatpush3.bf16.msra.mxu1 %v5026_v13  ;;  %vm591_vm2 = vcmp.lt.s32.totalorder %v3876_v30, 16  ;;  %v2228_v48 = vmax.f32 %v2208_v9, 0.0  ;;  %v5055_v1 = vld [vmem:[#allocation7 + $0x218] sm:$0xff]   ;;  %v5058_v46 = vld [vmem:[#allocation7 + $0x220] sm:$0xff]   ;;  %v5061_v30 = vld [vmem:[#allocation7 + $0x228] sm:$0xff]  }
 0x249   : > { %v2227_v59 = vmax.f32 %v2207_v0, 0.0  ;;  %v2161_v4 = vadd.f32 %v2141_v7, %v5856_v16  ;;  %v2143_v29 = vmul.f32 %v5913_v49, %v2123_v36  ;;  %v2162_v26 = vadd.f32 %v2102_v58, %v5871_v5  ;;  %2510 = vmatprep.mubr.bf16.mxu0 %v6066_v34  ;;  %4427 = vmatprep.subr.bf16.mxu1 %v5028_v10  ;;  %vm601_vm4 = vmand %vm581_vm1, %vm591_vm2  ;;  %v5047_v10 = vld [vmem:[#allocation7 + $0x208] sm:$0xff]   ;;  %v5041_v0 = vld [vmem:[#allocation7 + $0x180] sm:$0xff]  }
 0x24a   : > { %4760 = vmatpush3.bf16.msra.mxu0 %v5032_v11  ;;  %v3885_v6 = vsel %vm6134_vm3, 1.0, %v6579_v56  ;;  %v3886_v35 = vsel %vm601_vm4, 1.0, %v6579_v56  ;;  %v5035_v11 = vld [vmem:[#allocation7 + $0x138] sm:$0xff]   ;;  %v5043_v7 = vld [vmem:[#allocation7 + $0x1c8] sm:$0xff]   ;;  %v5045_v58 = vld [vmem:[#allocation7 + $0x1d0] sm:$0xff]  }
 0x24b   : > { %v2247_v41 = vmul.f32 %v3884_v44, %v2227_v59  ;;  %v2185_v16 = vmul.f32 %v5891_v18, %v2161_v4  ;;  %v2163_v37 = vadd.f32 %v2143_v29, %v5879_v63  ;;  %v2186_v5 = vmul.f32 %v5891_v18, %v2162_v26  ;;  %4761 = vmatprep.subr.bf16.mxu0 %v5037_v57  ;;  %v5033_v63 = vld [vmem:[#allocation7 + $0x130] sm:$0xff]   ;;  %v5036_v56 = vld [vmem:[#allocation7 + $0xf8] sm:$0xff]   ;;  %v5044_v9 = vld [vmem:[#allocation7 + $0x188] sm:$0xff]  }
 0x24c   : > { %4428 = vmatpush3.bf16.msra.mxu1 %v5029_v22  ;;  %v2248_v31 = vmul.f32 %v3885_v6, %v2228_v48  ;;  %v5062_v44 = vld [vmem:[#allocation7 + $0x230] sm:$0xff]   ;;  %v5048_v22 = vld [vmem:[#allocation7 + $0x1d8] sm:$0xff]   ;;  %v5050_v4 = vld [vmem:[#allocation7 + $0x1e0] sm:$0xff]  }
 0x24d   : > { %v6141_v62 = vpack.c.bf16 %v2247_v41, %v2246_v50  ;;  %v2209_v52 = vadd.f32 %v5909_v54, %v2185_v16  ;;  %v2187_v38 = vmul.f32 %v5891_v18, %v2163_v37  ;;  %4429 = vmatprep.subr.bf16.mxu1 %v5030_v27  ;;  %v2210_v8 = vadd.f32 %v5909_v54, %v2186_v5  ;;  %v5039_v18 = vld [vmem:[#allocation7 + $0x178] sm:$0xff]   ;;  %v5046_v36 = vld [vmem:[#allocation7 + $0x190] sm:$0xff]   ;;  %v5051_v29 = vld [vmem:[#allocation7 + $0x1a0] sm:$0xff]  }
 0x24e   : > { %4762 = vmatpush3.bf16.msra.mxu0 %v5037_v57  ;;  %v5063_v57 = vld [vmem:[#allocation7 + $0x238] sm:$0xff]   ;;  %v5053_v26 = vld [vmem:[#allocation7 + $0x1e8] sm:$0xff]   ;;  %v5056_v50 = vld [vmem:[#allocation7 + $0x1f0] sm:$0xff]  }
 0x24f   : > { %v2229_v25 = vmax.f32 %v2209_v52, 0.0  ;;  %4744 = vmatmul.mubr.bf16.gmra.mrb[108].mxu1 %v6141_v62  ;;  %v2211_v53 = vadd.f32 %v5909_v54, %v2187_v38  ;;  %v2230_v45 = vmax.f32 %v2210_v8, 0.0  ;;  %4763 = vmatprep.subr.bf16.mxu0 %v5038_v20  ;;  %v5049_v59 = vld [vmem:[#allocation7 + $0x198] sm:$0xff]   ;;  %v5054_v27 = vld [vmem:[#allocation7 + $0x1a8] sm:$0xff]   ;;  %v5057_v41 = vld [vmem:[#allocation7 + $0x1b0] sm:$0xff]  }
 0x250   : > { %2511 = vmatmul.mubr.bf16.gmra.mrb[108].mxu0 %v6047_v60  ;;  %4430 = vmatpush3.bf16.msra.mxu1 %v5031_v21  ;;  %v5060_v16 = vld [vmem:[#allocation7 + $0x1b8] sm:$0xff]  }
 0x251   : > { %v2249_v39 = vmul.f32 %v3885_v6, %v2229_v25  ;;  %2518 = vmatprep.mubr.bf16.mxu0 %v6100_v12  ;;  %v2231_v33 = vmax.f32 %v2211_v53, 0.0  ;;  %4431 = vmatprep.subr.bf16.mxu1 %v5033_v63  ;;  %v2250_v54 = vmul.f32 %v3886_v35, %v2230_v45 }
 0x252   : > { %4764 = vmatpush3.bf16.msra.mxu0 %v5038_v20 }
 0x253   : > { %v6156_v61 = vpack.c.bf16 %v2249_v39, %v2248_v31  ;;  %v2251_v19 = vmul.f32 %v3886_v35, %v2231_v33  ;;  %4765 = vmatprep.subr.bf16.mxu0 %v5039_v18 }
 0x254   : > { %4432 = vmatpush3.bf16.msra.mxu1 %v5034_v17 }
 0x255   : > { %4747 = vmatprep.mubr.bf16.mxu1 %v6156_v61  ;;  %v6159_v13 = vpack.c.bf16 %v2251_v19, %v2250_v54  ;;  %4433 = vmatprep.subr.bf16.mxu1 %v5035_v11 }
 0x256   : > { %4766 = vmatpush3.bf16.msra.mxu0 %v5039_v18 }
 0x257   : > { %4748 = vmatmul.mubr.bf16.gmra.mrb[112].mxu1 %v6159_v13  ;;  %4499 = vmatprep.subr.bf16.mxu0 %v5040_v14 }
 0x258   : > { %2519 = vmatmul.mubr.bf16.gmra.mrb[112].mxu0 %v6066_v34  ;;  %2969 = vmatprep.mubr.bf16.mxu1 %v6014_v43 }
 0x259   : > { %2526 = vmatprep.mubr.bf16.mxu0 %v6116_v2  ;;  %4434 = vmatpush3.bf16.msra.mxu1 %v5036_v56 }
 0x25a   : > { %4783 = vmatprep.subr.bf16.mxu1 %v5042_v47 }
 0x25f   : > { %2970 = vmatmul.mubr.bf16.vlgmr.msra.gmra.mrb[116].mxu1 %v6043_v3 }
 0x260   : > { %2527 = vmatmul.mubr.bf16.gmra.mrb[116].mxu0 %v6100_v12  ;;  %2977 = vmatprep.mubr.bf16.mxu1 %v6021_v40 }
 0x261   : > { %2534 = vmatprep.mubr.bf16.mxu0 %v6141_v62  ;;  %4784 = vmatpush3.bf16.msra.mxu1 %v5042_v47 }
 0x262   : > { %4785 = vmatprep.subr.bf16.mxu1 %v5047_v10 }
 0x265   : > { %4786 = vmatpush3.bf16.msra.mxu1 %v5047_v10 }
 0x266   : > { %4787 = vmatprep.subr.bf16.mxu1 %v5052_v42 }
 0x267   : > { %2978 = vmatmul.mubr.bf16.gmra.mrb[120].mxu1 %v6014_v43 }
 0x268   : > { %2535 = vmatmul.mubr.bf16.gmra.mrb[120].mxu0 %v6116_v2  ;;  %2985 = vmatprep.mubr.bf16.mxu1 %v6047_v60 }
 0x269   : > { %2542 = vmatprep.mubr.bf16.mxu0 %v6156_v61  ;;  %4788 = vmatpush3.bf16.msra.mxu1 %v5052_v42 }
 0x26a   : > { %4789 = vmatprep.subr.bf16.mxu1 %v5055_v1 }
 0x26d   : > { %4790 = vmatpush3.bf16.msra.mxu1 %v5055_v1 }
 0x26e   : > { %4791 = vmatprep.subr.bf16.mxu1 %v5058_v46 }
 0x26f   : > { %2986 = vmatmul.mubr.bf16.gmra.mrb[124].mxu1 %v6021_v40 }
 0x270   : > { %2543 = vmatmul.mubr.bf16.gmra.mrb[124].mxu0 %v6141_v62  ;;  %2993 = vmatprep.mubr.bf16.mxu1 %v6066_v34 }
 0x271   : > { %4767 = vmatprep.mubr.bf16.mxu0 %v6021_v40  ;;  %4792 = vmatpush3.bf16.msra.mxu1 %v5058_v46 }
 0x272   : > { %4793 = vmatprep.subr.bf16.mxu1 %v5061_v30 }
 0x275   : > { %4794 = vmatpush3.bf16.msra.mxu1 %v5061_v30 }
 0x276   : > { %4795 = vmatprep.subr.bf16.mxu1 %v5062_v44 }
 0x277   : > { %2994 = vmatmul.mubr.bf16.gmra.mrb[128].mxu1 %v6047_v60 }
 0x278   : > { %4768 = vmatmul.mubr.bf16.vlgmr.msra.gmra.mrb[128].mxu0 %v6047_v60  ;;  %3001 = vmatprep.mubr.bf16.mxu1 %v6100_v12 }
 0x279   : > { %4771 = vmatprep.mubr.bf16.mxu0 %v6066_v34  ;;  %4500 = vmatpush3.bf16.msra.mxu0 %v5041_v0 }
 0x27a   : > { %4501 = vmatprep.subr.bf16.mxu0 %v5043_v7  ;;  %4796 = vmatpush3.bf16.msra.mxu1 %v5062_v44 }
 0x27b   : > { %4797 = vmatprep.subr.bf16.mxu1 %v5063_v57 }
 0x27d   : > { %4502 = vmatpush3.bf16.msra.mxu0 %v5044_v9 }
 0x27e   : > { %4503 = vmatprep.subr.bf16.mxu0 %v5045_v58  ;;  %4798 = vmatpush3.bf16.msra.mxu1 %v5063_v57 }
 0x27f   : > { %3002 = vmatmul.mubr.bf16.gmra.mrb[132].mxu1 %v6066_v34 }
 0x280   : > { %4772 = vmatmul.mubr.bf16.gmra.mrb[132].mxu0 %v6100_v12  ;;  %3009 = vmatprep.mubr.bf16.mxu1 %v6116_v2 }
 0x281   : > { %4775 = vmatprep.mubr.bf16.mxu0 %v6116_v2  ;;  %4504 = vmatpush3.bf16.msra.mxu0 %v5046_v36 }
 0x282   : > { %4505 = vmatprep.subr.bf16.mxu0 %v5048_v22 }
 0x285   : > { %4506 = vmatpush3.bf16.msra.mxu0 %v5049_v59 }
 0x286   : > { %4507 = vmatprep.subr.bf16.mxu0 %v5050_v4 }
 0x287   : > { %3010 = vmatmul.mubr.bf16.gmra.mrb[136].mxu1 %v6100_v12 }
 0x288   : > { %4776 = vmatmul.mubr.bf16.gmra.mrb[136].mxu0 %v6141_v62  ;;  %3017 = vmatprep.mubr.bf16.mxu1 %v6141_v62 }
 0x289   : > { %4779 = vmatprep.mubr.bf16.mxu0 %v6156_v61  ;;  %4508 = vmatpush3.bf16.msra.mxu0 %v5051_v29 }
 0x28a   : > { %4509 = vmatprep.subr.bf16.mxu0 %v5053_v26 }
 0x28d   : > { %4510 = vmatpush3.bf16.msra.mxu0 %v5054_v27 }
 0x28e   : > { %4511 = vmatprep.subr.bf16.mxu0 %v5056_v50 }
 0x28f   : > { %3018 = vmatmul.mubr.bf16.gmra.mrb[140].mxu1 %v6116_v2 }
 0x290   : > { %4780 = vmatmul.mubr.bf16.gmra.mrb[140].mxu0 %v6159_v13  ;;  %3025 = vmatprep.mubr.bf16.mxu1 %v6156_v61 }
 0x291   : > { %4512 = vmatpush3.bf16.msra.mxu0 %v5057_v41  ;;  %3372 = vmatprep.mubr.bf16.mxu0 %v6014_v43 }
 0x292   : > { %4513 = vmatprep.subr.bf16.mxu0 %v5059_v55 }
 0x295   : > { %4514 = vmatpush3.bf16.msra.mxu0 %v5060_v16 }
 0x297   : > { %3026 = vmatmul.mubr.bf16.gmra.mrb[144].mxu1 %v6141_v62 }
 0x298   : > { %3373 = vmatmul.mubr.bf16.vlgmr.msra.gmra.mrb[144].mxu0 %v6043_v3  ;;  %4799 = vmatprep.mubr.bf16.mxu1 %v6021_v40 }
 0x299   : > { %3380 = vmatprep.mubr.bf16.mxu0 %v6021_v40 }
 0x29f   : > { %4800 = vmatmul.mubr.bf16.vlgmr.msra.gmra.mrb[148].mxu1 %v6047_v60 }
 0x2a0   : > { %3381 = vmatmul.mubr.bf16.gmra.mrb[148].mxu0 %v6014_v43  ;;  %4803 = vmatprep.mubr.bf16.mxu1 %v6066_v34 }
 0x2a1   : > { %3388 = vmatprep.mubr.bf16.mxu0 %v6047_v60 }
 0x2a7   : > { %4804 = vmatmul.mubr.bf16.gmra.mrb[152].mxu1 %v6100_v12 }
 0x2a8   : > { %3389 = vmatmul.mubr.bf16.gmra.mrb[152].mxu0 %v6021_v40  ;;  %4807 = vmatprep.mubr.bf16.mxu1 %v6116_v2 }
 0x2a9   : > { %3396 = vmatprep.mubr.bf16.mxu0 %v6066_v34 }
 0x2af   : > { %4808 = vmatmul.mubr.bf16.gmra.mrb[156].mxu1 %v6141_v62 }
 0x2b0   : > { %3397 = vmatmul.mubr.bf16.gmra.mrb[156].mxu0 %v6047_v60  ;;  %4811 = vmatprep.mubr.bf16.mxu1 %v6156_v61 }
 0x2b1   : > { %3404 = vmatprep.mubr.bf16.mxu0 %v6100_v12 }
 0x2b7   : > { %4812 = vmatmul.mubr.bf16.gmra.mrb[160].mxu1 %v6159_v13 }
 0x2b8   : > { %3405 = vmatmul.mubr.bf16.gmra.mrb[160].mxu0 %v6066_v34 }
 0x2b9   : > { %3412 = vmatprep.mubr.bf16.mxu0 %v6116_v2 }
 0x2c0   : > { %3413 = vmatmul.mubr.bf16.gmra.mrb[164].mxu0 %v6100_v12 }
 0x2c1   : > { %3420 = vmatprep.mubr.bf16.mxu0 %v6141_v62 }
 0x2c8   : > { %3421 = vmatmul.mubr.bf16.gmra.mrb[168].mxu0 %v6116_v2 }
 0x2c9   : > { %3428 = vmatprep.mubr.bf16.mxu0 %v6156_v61 }
 0x2d0   : > { %3429 = vmatmul.mubr.bf16.gmra.mrb[172].mxu0 %v6141_v62 }
 0x30b   : > { %v4355_v43 = vpop.f32.mrb[96].mxu0 }
 0x30c   : > { %v4356_v40 = vpop.f32.mrb[97].mxu0 }
 0x30d   : > { %v4357_v3 = vadd.f32 %v4356_v40, %v4355_v43  ;;  %v4358_v60 = vpop.f32.mrb[98].mxu0  ;;  %v4737_v37 = vpop.f32.mrb[100].mxu1 }
 0x30e   : > { %v4359_v5 = vpop.f32.mrb[99].mxu0  ;;  %v2585_v20 = vpop.f32.mrb[101].mxu1 }
 0x30f   : > { %v4360_v34 = vadd.f32 %v4359_v5, %v4358_v60  ;;  %v6217_v48 = vadd.f32 %v4357_v3, %v2585_v20  ;;  %v4738_v21 = vpop.f32.mrb[102].mxu1 }
 0x310   : > { %v2588_v12 = vpop.f32.mrb[103].mxu1 }
 0x311   : > { %v2589_v52 = vadd.f32 %v4360_v34, %v2588_v12  ;;  %v2664_v2 = vrot.slane %v6217_v48, 7 }
 0x313   : > { %v4361_v38 = vpop.f32.mrb[100].mxu0  ;;  %v2665_v8 = vrot.slane %v2589_v52, 7 }
 0x314   : > { %v4362_v63 = vpop.f32.mrb[101].mxu0 }
 0x315   : > { %v4363_v6 = vadd.f32 %v4362_v63, %v4361_v38  ;;  %v4364_v62 = vpop.f32.mrb[102].mxu0  ;;  %v6223_v25 = vsel %vm1084_vm0, %v2664_v2, %v2665_v8 }
 0x316   : > { %v4365_v53 = vpop.f32.mrb[103].mxu0  ;;  %v4741_v45 = vpop.f32.mrb[104].mxu1 }
 0x317   : > { %v2594_v18 = vadd.f32 %v4737_v37, %v4363_v6  ;;  %v4366_v35 = vadd.f32 %v4365_v53, %v4364_v62  ;;  %v2601_v17 = vpop.f32.mrb[105].mxu1 }
 0x318   : > { %v4742_v31 = vpop.f32.mrb[106].mxu1 }
 0x319   : > { %v2667_v39 = vrot.slane %v2594_v18, 7  ;;  %v2597_v33 = vadd.f32 %v4738_v21, %v4366_v35  ;;  %v2604_v11 = vpop.f32.mrb[107].mxu1 }
 0x31b   : > { %v2669_v61 = vrot.slane %v2597_v33, 7  ;;  %v4367_v54 = vpop.f32.mrb[104].mxu0  ;;  %v6226_v19 = vsel %vm1084_vm0, %v2665_v8, %v2667_v39 }
 0x31c   : > { %v4368_v14 = vpop.f32.mrb[105].mxu0 }
 0x31d   : > { %v4369_v13 = vadd.f32 %v4368_v14, %v4367_v54  ;;  %v4370_v56 = vpop.f32.mrb[106].mxu0  ;;  %v6229_v47 = vsel %vm1084_vm0, %v2667_v39, %v2669_v61 }
 0x31e   : > { %v4371_v10 = vpop.f32.mrb[107].mxu0 }
 0x31f   : > { %v2602_v42 = vadd.f32 %v4369_v13, %v2601_v17  ;;  %v4372_v1 = vadd.f32 %v4371_v10, %v4370_v56 }
 0x321   : > { %v2671_v46 = vrot.slane %v2602_v42, 7  ;;  %v2605_v30 = vadd.f32 %v4372_v1, %v2604_v11 }
 0x322   : > { %v4745_v44 = vpop.f32.mrb[108].mxu1 }
 0x323   : > { %v2673_v0 = vrot.slane %v2605_v30, 7  ;;  %v4373_v7 = vpop.f32.mrb[108].mxu0  ;;  %v2617_v57 = vpop.f32.mrb[109].mxu1  ;;  %v6232_v9 = vsel %vm1084_vm0, %v2669_v61, %v2671_v46 }
 0x324   : > { %v4374_v58 = vpop.f32.mrb[109].mxu0  ;;  %v4746_v36 = vpop.f32.mrb[110].mxu1 }
 0x325   : > { %v4375_v22 = vadd.f32 %v4374_v58, %v4373_v7  ;;  %v4376_v59 = vpop.f32.mrb[110].mxu0  ;;  %v2620_v4 = vpop.f32.mrb[111].mxu1  ;;  %v6235_v29 = vsel %vm1084_vm0, %v2671_v46, %v2673_v0 }
 0x326   : > { %v4377_v26 = vpop.f32.mrb[111].mxu0 }
 0x327   : > { %v2610_v27 = vadd.f32 %v4741_v45, %v4375_v22  ;;  %v4378_v50 = vadd.f32 %v4377_v26, %v4376_v59 }
 0x329   : > { %v2675_v41 = vrot.slane %v2610_v27, 7  ;;  %v2613_v55 = vadd.f32 %v4742_v31, %v4378_v50 }
 0x32a   : > { %v6237_v16 = vpop.f32.mrb[112].mxu1 }
 0x32b   : > { %v2677_v43 = vrot.slane %v2613_v55, 7  ;;  %v4379_v40 = vpop.f32.mrb[112].mxu0  ;;  %v2633_v3 = vpop.f32.mrb[113].mxu1  ;;  %v6240_v60 = vsel %vm1084_vm0, %v2673_v0, %v2675_v41 }
 0x32c   : > { %v4380_v37 = vpop.f32.mrb[113].mxu0  ;;  %v6242_v5 = vpop.f32.mrb[114].mxu1 }
 0x32d   : > { %v4381_v20 = vadd.f32 %v4380_v37, %v4379_v40  ;;  %v4382_v34 = vpop.f32.mrb[114].mxu0  ;;  %v2636_v21 = vpop.f32.mrb[115].mxu1  ;;  %v6245_v12 = vsel %vm1084_vm0, %v2675_v41, %v2677_v43 }
 0x32e   : > { %v4383_v52 = vpop.f32.mrb[115].mxu0 }
 0x32f   : > { %v2618_v38 = vadd.f32 %v4381_v20, %v2617_v57  ;;  %v4384_v8 = vadd.f32 %v4383_v52, %v4382_v34 }
 0x331   : > { %v2679_v63 = vrot.slane %v2618_v38, 7  ;;  %v2621_v6 = vadd.f32 %v4384_v8, %v2620_v4 }
 0x332   : > { %v4435_v62 = vpop.f32.mrb[116].mxu1 }
 0x333   : > { %v2681_v53 = vrot.slane %v2621_v6, 7  ;;  %v4385_v45 = vpop.f32.mrb[116].mxu0  ;;  %v4436_v18 = vpop.f32.mrb[117].mxu1  ;;  %v6248_v35 = vsel %vm1084_vm0, %v2677_v43, %v2679_v63 }
 0x334   : > { %v4386_v17 = vpop.f32.mrb[117].mxu0  ;;  %v4437_v31 = vadd.f32 %v4436_v18, %v4435_v62  ;;  %v4438_v39 = vpop.f32.mrb[118].mxu1 }
 0x335   : > { %v4387_v33 = vadd.f32 %v4386_v17, %v4385_v45  ;;  %v4388_v11 = vpop.f32.mrb[118].mxu0  ;;  %v4439_v61 = vpop.f32.mrb[119].mxu1  ;;  %v6251_v54 = vsel %vm1084_vm0, %v2679_v63, %v2681_v53 }
 0x336   : > { %v4389_v14 = vpop.f32.mrb[119].mxu0  ;;  %v4440_v13 = vadd.f32 %v4439_v61, %v4438_v39  ;;  %v2711_v61 = vsel %vm1084_vm0, 0.0, %v2664_v2 }
 0x337   : > { %v2626_v56 = vadd.f32 %v4745_v44, %v4387_v33  ;;  %v4390_v10 = vadd.f32 %v4389_v14, %v4388_v11 }
 0x339   : > { %v2683_v42 = vrot.slane %v2626_v56, 7  ;;  %v2629_v1 = vadd.f32 %v4746_v36, %v4390_v10 }
 0x33a   : > { %v4441_v46 = vpop.f32.mrb[120].mxu1 }
 0x33b   : > { %v2685_v30 = vrot.slane %v2629_v1, 7  ;;  %v4391_v0 = vpop.f32.mrb[120].mxu0  ;;  %v4442_v7 = vpop.f32.mrb[121].mxu1  ;;  %v6254_v57 = vsel %vm1084_vm0, %v2681_v53, %v2683_v42 }
 0x33c   : > { %v4392_v58 = vpop.f32.mrb[121].mxu0  ;;  %v4443_v22 = vadd.f32 %v4442_v7, %v4441_v46  ;;  %v4444_v59 = vpop.f32.mrb[122].mxu1  ;;  %v2714_v46 = vmul.f32 %v5755_v51, %v6226_v19 }
 0x33d   : > { %v4393_v4 = vadd.f32 %v4392_v58, %v4391_v0  ;;  %v4394_v26 = vpop.f32.mrb[122].mxu0  ;;  %v4445_v27 = vpop.f32.mrb[123].mxu1  ;;  %v6257_v50 = vsel %vm1084_vm0, %v2683_v42, %v2685_v30 }
 0x33e   : > { %v4395_v44 = vpop.f32.mrb[123].mxu0  ;;  %v4446_v41 = vadd.f32 %v4445_v27, %v4444_v59 }
 0x33f   : > { %v2634_v55 = vadd.f32 %v4393_v4, %v2633_v3  ;;  %v4396_v36 = vadd.f32 %v4395_v44, %v4394_v26 }
 0x341   : > { %v2687_v43 = vrot.slane %v2634_v55, 7  ;;  %v2637_v40 = vadd.f32 %v4396_v36, %v2636_v21 }
 0x342   : > { %v4447_v37 = vpop.f32.mrb[124].mxu1 }
 0x343   : > { %v2689_v20 = vrot.slane %v2637_v40, 7  ;;  %v4397_v34 = vpop.f32.mrb[124].mxu0  ;;  %v4448_v52 = vpop.f32.mrb[125].mxu1  ;;  %v6260_v38 = vsel %vm1084_vm0, %v2685_v30, %v2687_v43 }
 0x344   : > { %v4398_v8 = vpop.f32.mrb[125].mxu0  ;;  %v4449_v63 = vadd.f32 %v4448_v52, %v4447_v37  ;;  %v4450_v6 = vpop.f32.mrb[126].mxu1  ;;  %v2718_v37 = vmul.f32 %v5755_v51, %v6240_v60 }
 0x345   : > { %v4399_v62 = vadd.f32 %v4398_v8, %v4397_v34  ;;  %v4400_v53 = vpop.f32.mrb[126].mxu0  ;;  %v4451_v45 = vpop.f32.mrb[127].mxu1  ;;  %v6263_v18 = vsel %vm1084_vm0, %v2687_v43, %v2689_v20  ;;  %v2716_v8 = vmul.f32 %v5755_v51, %v6232_v9 }
 0x346   : > { %v4401_v3 = vpop.f32.mrb[127].mxu0  ;;  %v4452_v17 = vadd.f32 %v4451_v45, %v4450_v6 }
 0x347   : > { %v2642_v21 = vadd.f32 %v6237_v16, %v4399_v62  ;;  %v4402_v39 = vadd.f32 %v4401_v3, %v4400_v53 }
 0x349   : > { %v2691_v33 = vrot.slane %v2642_v21, 7  ;;  %v2645_v11 = vadd.f32 %v6242_v5, %v4402_v39  ;;  %v2712_v5 = vmul.f32 %v5755_v51, %v2711_v61 }
 0x34a   : > { %v4453_v14 = vpop.f32.mrb[128].mxu1 }
 0x34b   : > { %v2693_v56 = vrot.slane %v2645_v11, 7  ;;  %v4769_v10 = vpop.f32.mrb[128].mxu0  ;;  %v4454_v42 = vpop.f32.mrb[129].mxu1  ;;  %v6271_v1 = vsel %vm1084_vm0, %v2689_v20, %v2691_v33 }
 0x34c   : > { %v3077_v30 = vadd.f32 %v4769_v10, %v4443_v22  ;;  %v3068_v16 = vpop.f32.mrb[129].mxu0  ;;  %v4455_v0 = vadd.f32 %v4454_v42, %v4453_v14  ;;  %v4456_v7 = vpop.f32.mrb[130].mxu1 }
 0x34d   : > { %v3069_v58 = vadd.f32 %v4437_v31, %v3068_v16  ;;  %v4770_v48 = vpop.f32.mrb[130].mxu0  ;;  %v4457_v59 = vpop.f32.mrb[131].mxu1  ;;  %v6277_v2 = vsel %vm1084_vm0, %v2691_v33, %v2693_v56  ;;  %v2720_v56 = vmul.f32 %v5755_v51, %v6248_v35 }
 0x34e   : > { %v6279_v4 = vadd.f32 %v3077_v30, %v2714_v46  ;;  %v3080_v26 = vadd.f32 %v4770_v48, %v4446_v41  ;;  %v3071_v27 = vpop.f32.mrb[131].mxu0  ;;  %v4458_v44 = vadd.f32 %v4457_v59, %v4456_v7 }
 0x34f   : > { %v6281_v55 = vadd.f32 %v3069_v58, %v2712_v5  ;;  %v3072_v19 = vadd.f32 %v4440_v13, %v3071_v27 }
 0x350   : > { %v6284_v22 = vadd.f32 %v3080_v26, %v6229_v47 }
 0x351   : > { %v6287_v36 = vadd.f32 %v3072_v19, %v6223_v25 }
 0x352   : > { %v4459_v31 = vpop.f32.mrb[132].mxu1 }
 0x353   : > { %v4773_v43 = vpop.f32.mrb[132].mxu0  ;;  %v4460_v40 = vpop.f32.mrb[133].mxu1 }
 0x354   : > { %v3093_v20 = vadd.f32 %v4773_v43, %v4455_v0  ;;  %v3084_v34 = vpop.f32.mrb[133].mxu0  ;;  %v4461_v41 = vadd.f32 %v4460_v40, %v4459_v31  ;;  %v4462_v52 = vpop.f32.mrb[134].mxu1  ;;  %v2724_v40 = vmul.f32 %v5755_v51, %v6260_v38  ;;  %v2726_v38 = vmul.f32 %v5755_v51, %v6271_v1 }
 0x355   : > { %v3085_v13 = vadd.f32 %v4449_v63, %v3084_v34  ;;  %v4774_v6 = vpop.f32.mrb[134].mxu0  ;;  %v4463_v47 = vpop.f32.mrb[135].mxu1 }
 0x356   : > { %v6293_v62 = vadd.f32 %v3093_v20, %v2718_v37  ;;  %v3096_v25 = vadd.f32 %v4774_v6, %v4458_v44  ;;  %v3087_v53 = vpop.f32.mrb[135].mxu0  ;;  %v4464_v45 = vadd.f32 %v4463_v47, %v4462_v52 }
 0x357   : > { %v6295_v3 = vadd.f32 %v3085_v13, %v2716_v8  ;;  %v3088_v21 = vadd.f32 %v4452_v17, %v3087_v53 }
 0x358   : > { %v6298_v60 = vadd.f32 %v3096_v25, %v6245_v12  ;;  %v2722_v12 = vmul.f32 %v5755_v51, %v6254_v57 }
 0x359   : > { %v6301_v39 = vadd.f32 %v3088_v21, %v6235_v29 }
 0x35a   : > { %v4465_v33 = vpop.f32.mrb[136].mxu1 }
 0x35b   : > { %v4777_v11 = vpop.f32.mrb[136].mxu0  ;;  %v4466_v9 = vpop.f32.mrb[137].mxu1 }
 0x35c   : > { %v3100_v63 = vpop.f32.mrb[137].mxu0  ;;  %v4467_v61 = vadd.f32 %v4466_v9, %v4465_v33  ;;  %v4468_v14 = vpop.f32.mrb[138].mxu1 }
 0x35d   : > { %v3101_v10 = vadd.f32 %v4461_v41, %v3100_v63  ;;  %v4778_v42 = vpop.f32.mrb[138].mxu0  ;;  %v4469_v46 = vpop.f32.mrb[139].mxu1 }
 0x35e   : > { %v3103_v30 = vpop.f32.mrb[139].mxu0  ;;  %v3109_v17 = vadd.f32 %v4777_v11, %v4467_v61  ;;  %v4470_v16 = vadd.f32 %v4469_v46, %v4468_v14 }
 0x35f   : > { %v6307_v29 = vadd.f32 %v3101_v10, %v2720_v56  ;;  %v3104_v0 = vadd.f32 %v4464_v45, %v3103_v30 }
 0x360   : > { %v6309_v7 = vadd.f32 %v3109_v17, %v2722_v12  ;;  %v3112_v5 = vadd.f32 %v4778_v42, %v4470_v16  ;;  %v3632_v16 = vsub.s32 2, %v5747_v15 }
 0x361   : > { %v6312_v58 = vadd.f32 %v3104_v0, %v6251_v54 }
 0x362   : > { %v6315_v35 = vadd.f32 %v3112_v5, %v6257_v50  ;;  %v4471_v48 = vpop.f32.mrb[140].mxu1 }
 0x363   : > { %v4781_v59 = vpop.f32.mrb[140].mxu0  ;;  %v4472_v26 = vpop.f32.mrb[141].mxu1 }
 0x364   : > { %v3116_v27 = vpop.f32.mrb[141].mxu0  ;;  %v4473_v44 = vadd.f32 %v4472_v26, %v4471_v48  ;;  %v4474_v57 = vpop.f32.mrb[142].mxu1 }
 0x365   : > { %v4782_v19 = vpop.f32.mrb[142].mxu0  ;;  %v4475_v31 = vpop.f32.mrb[143].mxu1 }
 0x366   : > { %v3119_v43 = vpop.f32.mrb[143].mxu0  ;;  %v3117_v37 = vadd.f32 %v4473_v44, %v3116_v27  ;;  %v4476_v20 = vadd.f32 %v4475_v31, %v4474_v57  ;;  %v343_v27 = vsub.s32 4, %v5747_v15 }
 0x368   : > { %v6319_v34 = vadd.f32 %v3117_v37, %v2724_v40  ;;  %v3120_v54 = vadd.f32 %v4476_v20, %v3119_v43 }
 0x36a   : > { %v6322_v50 = vadd.f32 %v3120_v54, %v6263_v18  ;;  %v4477_v41 = vpop.f32.mrb[144].mxu1 }
 0x36b   : > { %v4515_v52 = vpop.f32.mrb[144].mxu0  ;;  %v4478_v8 = vpop.f32.mrb[145].mxu1 }
 0x36c   : > { %v4516_v13 = vpop.f32.mrb[145].mxu0  ;;  %v4479_v6 = vadd.f32 %v4478_v8, %v4477_v41  ;;  %v4480_v47 = vpop.f32.mrb[146].mxu1 }
 0x36d   : > { %v4517_v25 = vadd.f32 %v4516_v13, %v4515_v52  ;;  %v4518_v53 = vpop.f32.mrb[146].mxu0  ;;  %v4481_v45 = vpop.f32.mrb[147].mxu1 }
 0x36e   : > { %v4519_v21 = vpop.f32.mrb[147].mxu0  ;;  %v3125_v33 = vadd.f32 %v4781_v59, %v4479_v6  ;;  %v4482_v11 = vadd.f32 %v4481_v45, %v4480_v47  ;;  %v3652_v59 = vsub.s32 3, %v5747_v15 }
 0x36f   : > { %v4520_v9 = vadd.f32 %v4519_v21, %v4518_v53 }
 0x370   : > { %v6326_v63 = vadd.f32 %v3125_v33, %v2726_v38  ;;  %v3128_v18 = vadd.f32 %v4782_v19, %v4482_v11  ;;  %v5064_v19 = vld [vmem:[%s6538_s4] sm:$0xff] }
 0x371   : > { %v6337_v31 = vrot.slane %v5064_v19, %v3632_v16  ;;  %v6340_v20 = vrot.slane %v5064_v19, %v3652_v59  ;;  %v6345_v47 = vrot.slane %v5064_v19, %v343_v27 }
 0x372   : > { %v6329_v61 = vadd.f32 %v3128_v18, %v6277_v2  ;;  %v4801_v14 = vpop.f32.mrb[148].mxu1 }
 0x373   : > { %v4521_v56 = vpop.f32.mrb[148].mxu0  ;;  %v3471_v10 = vpop.f32.mrb[149].mxu1  ;;  %v484_v16 = vadd.f32 %v5651_v23, %v6345_v47 }
 0x374   : > { %v4522_v42 = vpop.f32.mrb[149].mxu0  ;;  %v3472_v46 = vadd.f32 %v4517_v25, %v3471_v10  ;;  %v4802_v30 = vpop.f32.mrb[150].mxu1 }
 0x375   : > { %v4523_v12 = vadd.f32 %v4522_v42, %v4521_v56  ;;  %v4524_v17 = vpop.f32.mrb[150].mxu0  ;;  %v3474_v51 = vpop.f32.mrb[151].mxu1  ;;  %v476_v42 = vadd.f32 %v5653_v24, %v6345_v47  ;;  %v479_v24 = vadd.f32 %v5657_v32, %v6345_v47 }
 0x376   : > { %v4525_v1 = vpop.f32.mrb[151].mxu0  ;;  %v3475_v0 = vadd.f32 %v4520_v9, %v3474_v51  ;;  %v3550_v26 = vrot.slane %v3472_v46, 1 }
 0x377   : > { %v4526_v5 = vadd.f32 %v4525_v1, %v4524_v17  ;;  %v3480_v48 = vadd.f32 %v4801_v14, %v4523_v12 }
 0x378   : > { %v3551_v2 = vrot.slane %v3475_v0, 1 }
 0x379   : > { %v3553_v44 = vrot.slane %v3480_v48, 1  ;;  %v3483_v57 = vadd.f32 %v4802_v30, %v4526_v5 }
 0x37a   : > { %v3552_v43 = vsel %vm2063_vm14, %v3550_v26, %v3551_v2  ;;  %v4805_v40 = vpop.f32.mrb[152].mxu1 }
 0x37b   : > { %v3555_v37 = vrot.slane %v3483_v57, 1  ;;  %v3554_v54 = vsel %vm2063_vm14, %v3551_v2, %v3553_v44  ;;  %v3614_v41 = vadd.f32 %v3552_v43, %v6281_v55  ;;  %v4527_v15 = vpop.f32.mrb[152].mxu0  ;;  %v3487_v52 = vpop.f32.mrb[153].mxu1 }
 0x37c   : > { %v3599_v8 = vmul.f32 %v5913_v49, %v3554_v54  ;;  %v4528_v13 = vpop.f32.mrb[153].mxu0  ;;  %v4806_v6 = vpop.f32.mrb[154].mxu1 }
 0x37d   : > { %v3556_v25 = vsel %vm2063_vm14, %v3553_v44, %v3555_v37  ;;  %v3634_v53 = vmul.f32 %v6337_v31, %v3614_v41  ;;  %v4529_v45 = vadd.f32 %v4528_v13, %v4527_v15  ;;  %v4530_v21 = vpop.f32.mrb[154].mxu0  ;;  %v3490_v38 = vpop.f32.mrb[155].mxu1 }
 0x37e   : > { %v3616_v33 = vadd.f32 %v3556_v25, %v6279_v4  ;;  %v3615_v11 = vadd.f32 %v3599_v8, %v6287_v36  ;;  %v4531_v55 = vpop.f32.mrb[155].mxu0 }
 0x37f   : > { %v3654_v9 = vadd.f32 %v6340_v20, %v3634_v53  ;;  %v4532_v18 = vadd.f32 %v4531_v55, %v4530_v21  ;;  %v3488_v14 = vadd.f32 %v4529_v45, %v3487_v52 }
 0x380   : > { %v3636_v56 = vmul.f32 %v6337_v31, %v3616_v33  ;;  %v3635_v10 = vmul.f32 %v6337_v31, %v3615_v11 }
 0x381   : > { %v3670_v46 = vmax.f32 %v3654_v9, 0.0  ;;  %v3557_v30 = vrot.slane %v3488_v14, 1  ;;  %v3491_v12 = vadd.f32 %v4532_v18, %v3490_v38  ;;  %v6586_v9 = vld [vmem:[#allocation16_spill] sm:$0xff] }
 0x382   : > { %v3656_v4 = vadd.f32 %v6340_v20, %v3636_v56  ;;  %v3655_v36 = vadd.f32 %v6340_v20, %v3635_v10  ;;  %v6359_v17 = vpop.f32.mrb[156].mxu1  ;;  %v492_v18 = vadd.f32 %v6586_v9, %v6345_v47 }
 0x383   : > { %v3686_v51 = vadd.f32 %v3670_v46, %v476_v42  ;;  %v3558_v1 = vsel %vm2063_vm14, %v3555_v37, %v3557_v30  ;;  %v3559_v0 = vrot.slane %v3491_v12, 1  ;;  %v4533_v5 = vpop.f32.mrb[156].mxu0  ;;  %v3503_v48 = vpop.f32.mrb[157].mxu1 }
 0x384   : > { %v3672_v59 = vmax.f32 %v3656_v4, 0.0  ;;  %v3671_v26 = vmax.f32 %v3655_v36, 0.0  ;;  %v3601_v2 = vmul.f32 %v5913_v49, %v3558_v1  ;;  %v4534_v27 = vpop.f32.mrb[157].mxu0  ;;  %v6367_v44 = vpop.f32.mrb[158].mxu1 }
 0x385   : > { %3702 = vst [vmem:[%s6369_s29] sm:$0xff] %v3686_v51  ;;  %v3560_v23 = vsel %vm2063_vm14, %v3557_v30, %v3559_v0  ;;  %v4535_v57 = vadd.f32 %v4534_v27, %v4533_v5  ;;  %v4536_v19 = vpop.f32.mrb[158].mxu0  ;;  %v3506_v43 = vpop.f32.mrb[159].mxu1 }
 0x386   : > { %v3688_v37 = vadd.f32 %v3672_v59, %v484_v16  ;;  %v3687_v32 = vadd.f32 %v3671_v26, %v479_v24  ;;  %v3617_v54 = vadd.f32 %v3601_v2, %v6284_v22  ;;  %v3618_v41 = vadd.f32 %v3560_v23, %v6295_v3  ;;  %v4537_v15 = vpop.f32.mrb[159].mxu0 }
 0x387   : > { %v3496_v52 = vadd.f32 %v4805_v40, %v4535_v57  ;;  %v4538_v8 = vadd.f32 %v4537_v15, %v4536_v19  ;;  %v487_v22 = vadd.f32 %v5655_v28, %v6345_v47  ;;  %v6587_v57 = vld [vmem:[#allocation15_spill] sm:$0xff] }
 0x388   : > { %3704 = vst [vmem:[%s6369_s29 + $0x10] sm:$0xff] %v3688_v37  ;;  %3703 = vst [vmem:[%s6369_s29 + $0x8] sm:$0xff] %v3687_v32  ;;  %v3637_v13 = vmul.f32 %v6337_v31, %v3617_v54  ;;  %v3638_v25 = vmul.f32 %v6337_v31, %v3618_v41  ;;  %v6588_v37 = vld [vmem:[#allocation18_spill] sm:$0xff] }
 0x389   : > { %v3561_v53 = vrot.slane %v3496_v52, 1  ;;  %v3499_v45 = vadd.f32 %v4806_v6, %v4538_v8  ;;  %v495_v32 = vadd.f32 %v6588_v37, %v6345_v47 }
 0x38a   : > { %v3657_v21 = vadd.f32 %v6340_v20, %v3637_v13  ;;  %v3658_v38 = vadd.f32 %v6340_v20, %v3638_v25  ;;  %v6381_v33 = vpop.f32.mrb[160].mxu1 }
 0x38b   : > { %v3562_v3 = vsel %vm2063_vm14, %v3559_v0, %v3561_v53  ;;  %v3563_v40 = vrot.slane %v3499_v45, 1  ;;  %v4539_v11 = vpop.f32.mrb[160].mxu0  ;;  %v6386_v55 = vpop.f32.mrb[161].mxu1 }
 0x38c   : > { %v3673_v14 = vmax.f32 %v3657_v21, 0.0  ;;  %v3674_v6 = vmax.f32 %v3658_v38, 0.0  ;;  %v3603_v56 = vmul.f32 %v5913_v49, %v3562_v3  ;;  %v4540_v10 = vpop.f32.mrb[161].mxu0  ;;  %v6391_v42 = vpop.f32.mrb[162].mxu1 }
 0x38d   : > { %v3564_v28 = vsel %vm2063_vm14, %v3561_v53, %v3563_v40  ;;  %v4541_v46 = vadd.f32 %v4540_v10, %v4539_v11  ;;  %v4542_v30 = vpop.f32.mrb[162].mxu0  ;;  %v6394_v12 = vpop.f32.mrb[163].mxu1 }
 0x38e   : > { %v3689_v4 = vadd.f32 %v3673_v14, %v487_v22  ;;  %v3690_v36 = vadd.f32 %v3674_v6, %v492_v18  ;;  %v3619_v16 = vadd.f32 %v3603_v56, %v6301_v39  ;;  %v3620_v51 = vadd.f32 %v3564_v28, %v6293_v62  ;;  %v4543_v1 = vpop.f32.mrb[163].mxu0  ;;  %v6590_v28 = vld [vmem:[#allocation20_spill] sm:$0xff] }
 0x38f   : > { %v3504_v0 = vadd.f32 %v4541_v46, %v3503_v48  ;;  %v4544_v5 = vadd.f32 %v4543_v1, %v4542_v30  ;;  %v500_v39 = vadd.f32 %v6587_v57, %v6345_v47  ;;  %v508_v46 = vadd.f32 %v6590_v28, %v6345_v47 }
 0x390   : > { %3705 = vst [vmem:[%s6369_s29 + $0x18] sm:$0xff] %v3689_v4  ;;  %3706 = vst [vmem:[%s6369_s29 + $0x20] sm:$0xff] %v3690_v36  ;;  %v3639_v24 = vmul.f32 %v6337_v31, %v3619_v16  ;;  %v3640_v59 = vmul.f32 %v6337_v31, %v3620_v51 }
 0x391   : > { %v3565_v26 = vrot.slane %v3504_v0, 1  ;;  %v3507_v2 = vadd.f32 %v4544_v5, %v3506_v43 }
 0x392   : > { %v3659_v27 = vadd.f32 %v6340_v20, %v3639_v24  ;;  %v3660_v23 = vadd.f32 %v6340_v20, %v3640_v59 }
 0x393   : > { %v3566_v62 = vsel %vm2063_vm14, %v3563_v40, %v3565_v26  ;;  %v3567_v19 = vrot.slane %v3507_v2, 1  ;;  %v4545_v48 = vpop.f32.mrb[164].mxu0 }
 0x394   : > { %v3675_v54 = vmax.f32 %v3659_v27, 0.0  ;;  %v3676_v41 = vmax.f32 %v3660_v23, 0.0  ;;  %v3605_v43 = vmul.f32 %v5913_v49, %v3566_v62  ;;  %v4546_v15 = vpop.f32.mrb[165].mxu0 }
 0x395   : > { %v3568_v52 = vsel %vm2063_vm14, %v3565_v26, %v3567_v19  ;;  %v4547_v8 = vadd.f32 %v4546_v15, %v4545_v48  ;;  %v4548_v13 = vpop.f32.mrb[166].mxu0 }
 0x396   : > { %v3691_v25 = vadd.f32 %v3675_v54, %v495_v32  ;;  %v3692_v53 = vadd.f32 %v3676_v41, %v500_v39  ;;  %v3621_v45 = vadd.f32 %v3605_v43, %v6298_v60  ;;  %v3622_v21 = vadd.f32 %v3568_v52, %v6307_v29  ;;  %v4549_v38 = vpop.f32.mrb[167].mxu0  ;;  %v6589_v60 = vld [vmem:[#allocation17_spill] sm:$0xff]  ;;  %v6592_v54 = vld [vmem:[#allocation22_spill] sm:$0xff] }
 0x397   : > { %v3512_v22 = vadd.f32 %v6359_v17, %v4547_v8  ;;  %v4550_v3 = vadd.f32 %v4549_v38, %v4548_v13  ;;  %v503_v29 = vadd.f32 %v6589_v60, %v6345_v47  ;;  %v511_v41 = vadd.f32 %v6592_v54, %v6345_v47 }
 0x398   : > { %3707 = vst [vmem:[%s6369_s29 + $0x28] sm:$0xff] %v3691_v25  ;;  %3708 = vst [vmem:[%s6369_s29 + $0x30] sm:$0xff] %v3692_v53  ;;  %v3641_v40 = vmul.f32 %v6337_v31, %v3621_v45  ;;  %v3642_v11 = vmul.f32 %v6337_v31, %v3622_v21 }
 0x399   : > { %v3569_v9 = vrot.slane %v3512_v22, 1  ;;  %v3515_v18 = vadd.f32 %v6367_v44, %v4550_v3 }
 0x39a   : > { %v3661_v14 = vadd.f32 %v6340_v20, %v3641_v40  ;;  %v3662_v6 = vadd.f32 %v6340_v20, %v3642_v11 }
 0x39b   : > { %v3570_v56 = vsel %vm2063_vm14, %v3567_v19, %v3569_v9  ;;  %v3571_v17 = vrot.slane %v3515_v18, 1  ;;  %v4551_v10 = vpop.f32.mrb[168].mxu0 }
 0x39c   : > { %v3677_v30 = vmax.f32 %v3661_v14, 0.0  ;;  %v3678_v4 = vmax.f32 %v3662_v6, 0.0  ;;  %v3607_v44 = vmul.f32 %v5913_v49, %v3570_v56  ;;  %v4552_v36 = vpop.f32.mrb[169].mxu0  ;;  %v6594_v56 = vld [vmem:[#allocation24_spill] sm:$0xff] }
 0x39d   : > { %v3572_v16 = vsel %vm2063_vm14, %v3569_v9, %v3571_v17  ;;  %v4553_v51 = vadd.f32 %v4552_v36, %v4551_v10  ;;  %v4554_v1 = vpop.f32.mrb[170].mxu0 }
 0x39e   : > { %v3693_v0 = vadd.f32 %v3677_v30, %v503_v29  ;;  %v3694_v5 = vadd.f32 %v3678_v4, %v508_v46  ;;  %v3623_v24 = vadd.f32 %v3607_v44, %v6312_v58  ;;  %v3624_v59 = vadd.f32 %v3572_v16, %v6309_v7  ;;  %v4555_v26 = vpop.f32.mrb[171].mxu0  ;;  %v6591_v58 = vld [vmem:[#allocation19_spill] sm:$0xff] }
 0x39f   : > { %v3520_v2 = vadd.f32 %v4553_v51, %v6386_v55  ;;  %v4556_v27 = vadd.f32 %v4555_v26, %v4554_v1  ;;  %v516_v7 = vadd.f32 %v6591_v58, %v6345_v47 }
 0x3a0   : > { %3709 = vst [vmem:[%s6369_s29 + $0x38] sm:$0xff] %v3693_v0  ;;  %3710 = vst [vmem:[%s6369_s29 + $0x40] sm:$0xff] %v3694_v5  ;;  %v3643_v23 = vmul.f32 %v6337_v31, %v3623_v24  ;;  %v3644_v57 = vmul.f32 %v6337_v31, %v3624_v59 }
 0x3a1   : > { %v3573_v39 = vrot.slane %v3520_v2, 1  ;;  %v3523_v62 = vadd.f32 %v4556_v27, %v6394_v12 }
 0x3a2   : > { %v3663_v19 = vadd.f32 %v6340_v20, %v3643_v23  ;;  %v3664_v48 = vadd.f32 %v6340_v20, %v3644_v57 }
 0x3a3   : > { %v3574_v37 = vsel %vm2063_vm14, %v3571_v17, %v3573_v39  ;;  %v3575_v55 = vrot.slane %v3523_v62, 1  ;;  %v4557_v32 = vpop.f32.mrb[172].mxu0  ;;  %v524_v17 = vadd.f32 %v6594_v56, %v6345_v47 }
 0x3a4   : > { %v3679_v43 = vmax.f32 %v3663_v19, 0.0  ;;  %v3680_v15 = vmax.f32 %v3664_v48, 0.0  ;;  %v3609_v12 = vmul.f32 %v5913_v49, %v3574_v37  ;;  %v4558_v52 = vpop.f32.mrb[173].mxu0 }
 0x3a5   : > { %v3576_v8 = vsel %vm2063_vm14, %v3573_v39, %v3575_v55  ;;  %v4559_v13 = vadd.f32 %v4558_v52, %v4557_v32  ;;  %v4560_v25 = vpop.f32.mrb[174].mxu0 }
 0x3a6   : > { %v3695_v53 = vadd.f32 %v3679_v43, %v511_v41  ;;  %v3696_v45 = vadd.f32 %v3680_v15, %v516_v7  ;;  %v3625_v21 = vadd.f32 %v3609_v12, %v6315_v35  ;;  %v3626_v38 = vadd.f32 %v3576_v8, %v6319_v34  ;;  %v4561_v22 = vpop.f32.mrb[175].mxu0  ;;  %v6593_v34 = vld [vmem:[#allocation21_spill] sm:$0xff] }
 0x3a7   : > { %v3528_v3 = vadd.f32 %v6381_v33, %v4559_v13  ;;  %v4562_v40 = vadd.f32 %v4561_v22, %v4560_v25  ;;  %v519_v60 = vadd.f32 %v6593_v34, %v6345_v47 }
 0x3a8   : > { %3711 = vst [vmem:[%s6369_s29 + $0x48] sm:$0xff] %v3695_v53  ;;  %3712 = vst [vmem:[%s6369_s29 + $0x50] sm:$0xff] %v3696_v45  ;;  %v3645_v11 = vmul.f32 %v6337_v31, %v3625_v21  ;;  %v3646_v9 = vmul.f32 %v6337_v31, %v3626_v38 }
 0x3a9   : > { %v3577_v18 = vrot.slane %v3528_v3, 1  ;;  %v3531_v14 = vadd.f32 %v6391_v42, %v4562_v40 }
 0x3aa   : > { %v3665_v6 = vadd.f32 %v6340_v20, %v3645_v11  ;;  %v3666_v35 = vadd.f32 %v6340_v20, %v3646_v9 }
 0x3ab   : > { %v3578_v33 = vsel %vm2063_vm14, %v3575_v55, %v3577_v18  ;;  %v3579_v29 = vrot.slane %v3531_v14, 1 }
 0x3ac   : > { %v3681_v10 = vmax.f32 %v3665_v6, 0.0  ;;  %v3682_v28 = vmax.f32 %v3666_v35, 0.0  ;;  %v3611_v46 = vmul.f32 %v5913_v49, %v3578_v33 }
 0x3ad   : > { %v3580_v42 = vsel %vm2063_vm14, %v3577_v18, %v3579_v29  ;;  %v3597_v30 = vsel %vm2063_vm14, %v3579_v29, 0.0 }
 0x3ae   : > { %v3697_v4 = vadd.f32 %v3681_v10, %v519_v60  ;;  %v3698_v44 = vadd.f32 %v3682_v28, %v524_v17  ;;  %v3627_v36 = vadd.f32 %v3611_v46, %v6322_v50  ;;  %v3613_v16 = vmul.f32 %v5913_v49, %v3597_v30  ;;  %v6595_v50 = vld [vmem:[#allocation26_spill] sm:$0xff] }
 0x3af   : > { %v3628_v51 = vadd.f32 %v3580_v42, %v6326_v63  ;;  %v527_v49 = vadd.f32 %v6595_v50, %v6345_v47 }
 0x3b0   : > { %3713 = vst [vmem:[%s6369_s29 + $0x58] sm:$0xff] %v3697_v4  ;;  %3714 = vst [vmem:[%s6369_s29 + $0x60] sm:$0xff] %v3698_v44  ;;  %v3647_v1 = vmul.f32 %v6337_v31, %v3627_v36  ;;  %v3629_v0 = vadd.f32 %v3613_v16, %v6329_v61  ;;  %v6596_v61 = vld [vmem:[#allocation23_spill] sm:$0xff] }
 0x3b1   : > { %v3648_v5 = vmul.f32 %v6337_v31, %v3628_v51  ;;  %v532_v27 = vadd.f32 %v6596_v61, %v6345_v47 }
 0x3b2   : > { %v3667_v24 = vadd.f32 %v6340_v20, %v3647_v1  ;;  %v3649_v59 = vmul.f32 %v6337_v31, %v3629_v0  ;;  %v6597_v31 = vld [vmem:[#allocation25_spill] sm:$0xff] }
 0x3b3   : > { %v3668_v26 = vadd.f32 %v6340_v20, %v3648_v5  ;;  %v535_v57 = vadd.f32 %v6597_v31, %v6345_v47 }
 0x3b4   : > { %v3683_v63 = vmax.f32 %v3667_v24, 0.0  ;;  %v3669_v2 = vadd.f32 %v6340_v20, %v3649_v59 }
 0x3b5   : > { %v3684_v23 = vmax.f32 %v3668_v26, 0.0 }
 0x3b6   : > { %v3699_v39 = vadd.f32 %v3683_v63, %v527_v49  ;;  %v3685_v62 = vmax.f32 %v3669_v2, 0.0 }
 0x3b7   : > { %v3700_v19 = vadd.f32 %v3684_v23, %v532_v27 }
 0x3b8   : > { %3715 = vst [vmem:[%s6369_s29 + $0x68] sm:$0xff] %v3699_v39  ;;  %v3701_v20 = vadd.f32 %v3685_v62, %v535_v57 }
 0x3b9   : > { %3716 = vst [vmem:[%s6369_s29 + $0x70] sm:$0xff] %v3700_v19 }
 0x3ba   : > { %3717 = vst [vmem:[%s6369_s29 + $0x78] sm:$0xff] %v3701_v20 }
 0x3bb   : > { %5192 = shalt.err (!%p5189_p13)
}
 0x3bc   : > { %s5193_s28 = scalar_lea.hbm %s6486_s26, 2048  ;;  %s5197_s16 = scalar_lea.hbm %s6539_s5, 8192 }
 0x3bd   : > { %p5194_p10 = scmp.ne.s32.totalorder %s6486_s26, %s5193_s28  ;;  %p5198_p6 = scmp.lt.u32.totalorder %s6486_s26, %s6539_s5 }
 0x3be   : > { %p5199_p0 = scmp.lt.u32.totalorder %s5197_s16, %s5193_s28  ;;  %p5201_p7 = scmp.lt.u32.totalorder %s5193_s28, %s6486_s26 }
 0x3bf   : > { %p5195_p8 = pnand %p5194_p10, %p5448_p5 }
 0x3c0   : > { %p5200_p3 = por %p5199_p0, %p5198_p6 }
 0x3c1   : > { %p5196_p12 = pneg %p5195_p8 }
 0x3c2   : > { %p5202_p11 = por %p5201_p7, %p5200_p3 }
 0x3c4   : > { %p5203_p1 = pnand %p5202_p11, %p5196_p12 }
 0x3c6   : > { %5206 = shalt.err (!%p5203_p1)
}
 0x3c7   : > { %s5263_s10 = smov 128   ;;  %s5264_s13 = smov 8  }
 0x3c8   : > { %4832 = dma.vmem_to_hbm [thread:$0]  (%p5448_p5), %s6488_s12, 2048, %s6486_s26, %s3719_s22, %s5263_s10, %s5263_s10, %s5264_s13  }
 0x3c9 PF: > { %p4859_p2 = scmp.ge.s32.totalorder %s5253_s21, 2  ;;  %s3747_s24 = sand.u32 1, %s5241_s18  }
 0x3ca   : > { %p6598_p4 = scmp.ne.s32.totalorder %s6547_s25, 0  ;;  %s3748_s27 = scalar_lea.sflag [#allocation4], %s3747_s24 }
 0x3cc   : > { %p4849_p9 = pnand %p4859_p2, %p6598_p4 }
 0x3ce   : > { %5236 = dma.done.wait (!%p4849_p9), %s3748_s27, 2048  }
 0x3cf   : > { %5238 = vsyncadd (!%p4849_p9), %s3748_s27, 4294965248  ;;  %p20_p13 = scmp.ge.s32.totalorder %s5434_s14, 6   ;;  %s6599_s18 = smov %s5245_s19 }
 0x3d0   : > { %s6600_s19 = smov %s5249_s20  ;;  %s6601_s20 = smov %s5444_s30 }
 0x3d1   : > { %s6602_s21 = smov %s5434_s14  ;;  %22 = sbr.rel (!%p20_p13) target bundleno = 7 (0x7), region = 101 }
 0x3d8   :  { %3753 = vsyncpa [#allocation3], 1 }
 0x3d9   :  { %3755 = vsyncpa [#allocation3 + $0x1], 1 }
 0x3da   :  { %3756 = vsyncpa [#allocation6], 1 }
 0x3db   :  { %3757 = vsyncpa [#allocation9], 1 }
 0x3dc   :  { %3758 = vsyncpa [#allocation4], 1 }
 0x3dd   :  { %3760 = vsyncpa [#allocation4 + $0x1], 1 }

</bundles_post_ra>
